<compile_context>
chip_gen: v6e
topology: v6e:2x2x1
jax: 0.10.0
libtpu: 0.0.40
codegen_flags: <defaults>
</compile_context>

<pallas_src>
import jax
import jax.numpy as jnp
from jax.experimental import pallas as pl
from jax.experimental.pallas import tpu as pltpu


def _round_up(x, m):
    return (x + m - 1) // m * m


# ------------------------- fused MLP kernel -------------------------

def _discriminator_kernel(x_ref, w1_ref, b1_ref, w2_ref, b2_ref,
                          w3_ref, b3_ref, o_ref, acc_ref):
    k = pl.program_id(0)

    @pl.when(k == 0)
    def _():
        acc_ref[...] = jnp.zeros_like(acc_ref)

    # Streamed first Linear: (B, tk) @ (tk, Hp) accumulated in f32 on the MXU.
    acc_ref[...] += jnp.dot(x_ref[...], w1_ref[...],
                            preferred_element_type=jnp.float32)

    @pl.when(k == pl.num_programs(0) - 1)
    def _():
        # Layer 1 epilogue: bias + (eval-mode dropout = identity) + ReLU.
        h1 = jnp.maximum(acc_ref[...] + b1_ref[...], 0.0)
        # Layer 2: Linear + bias + ReLU (W2 resident in VMEM).
        h2 = jnp.dot(h1.astype(w2_ref.dtype), w2_ref[...],
                     preferred_element_type=jnp.float32) + b2_ref[...]
        h2 = jnp.maximum(h2, 0.0)
        # Layer 3: Linear -> logits.
        logits = jnp.dot(h2.astype(w3_ref.dtype), w3_ref[...],
                         preferred_element_type=jnp.float32) + b3_ref[...]
        # LogSoftmax over the class axis.
        m = jnp.max(logits, axis=1, keepdims=True)
        z = logits - m
        lse = jnp.log(jnp.sum(jnp.exp(z), axis=1, keepdims=True))
        o_ref[...] = z - lse


def discriminator_forward(x, params, *, tk=2048):
    """Eval-mode Discriminator forward.  x: (B, ...) -> (B, n_classes)."""
    B = x.shape[0]
    x2 = x.reshape(B, -1).astype(jnp.float32)
    K = x2.shape[1]

    w1, b1 = params["w1"], params["b1"]   # (K, H), (H,)
    w2, b2 = params["w2"], params["b2"]   # (H, H), (H,)
    w3, b3 = params["w3"], params["b3"]   # (H, C), (C,)
    H = w1.shape[1]
    C = w3.shape[1]

    # Lane-dense hidden dim; zero padding is semantically inert (see header).
    Hp = _round_up(H, 128)
    # Contraction tile: multiple of 128, tiled exactly over the (padded) K.
    tk = min(tk, _round_up(K, 128))
    Kp = _round_up(K, tk)
    nk = Kp // tk

    xp = jnp.pad(x2, ((0, 0), (0, Kp - K))).astype(jnp.bfloat16)
    w1p = jnp.pad(w1, ((0, Kp - K), (0, Hp - H))).astype(jnp.bfloat16)
    b1p = jnp.pad(b1, (0, Hp - H)).reshape(1, Hp).astype(jnp.float32)
    w2p = jnp.pad(w2, ((0, Hp - H), (0, Hp - H))).astype(jnp.bfloat16)
    b2p = jnp.pad(b2, (0, Hp - H)).reshape(1, Hp).astype(jnp.float32)
    w3p = jnp.pad(w3, ((0, Hp - H), (0, 0))).astype(jnp.bfloat16)
    b3p = b3.reshape(1, C).astype(jnp.float32)

    return pl.pallas_call(
        _discriminator_kernel,
        out_shape=jax.ShapeDtypeStruct((B, C), jnp.float32),
        grid=(nk,),
        in_specs=[
            pl.BlockSpec((B, tk), lambda k: (0, k)),     # x: K-tiled
            pl.BlockSpec((tk, Hp), lambda k: (k, 0)),    # W1: K-tiled
            pl.BlockSpec((1, Hp), lambda k: (0, 0)),     # b1 (resident)
            pl.BlockSpec((Hp, Hp), lambda k: (0, 0)),    # W2 (resident)
            pl.BlockSpec((1, Hp), lambda k: (0, 0)),     # b2 (resident)
            pl.BlockSpec((Hp, C), lambda k: (0, 0)),     # W3 (resident)
            pl.BlockSpec((1, C), lambda k: (0, 0)),      # b3 (resident)
        ],
        out_specs=pl.BlockSpec((B, C), lambda k: (0, 0)),
        scratch_shapes=[pltpu.VMEM((B, Hp), jnp.float32)],
        compiler_params=pltpu.CompilerParams(
            dimension_semantics=("arbitrary",)),
    )(xp, w1p, b1p, w2p, b2p, w3p, b3p)


# ------------------------- pure-JAX reference -------------------------

def reference_forward(x, params):
    B = x.shape[0]
    x2 = x.reshape(B, -1).astype(jnp.float32)
    h1 = jnp.maximum(x2 @ params["w1"] + params["b1"], 0.0)
    h2 = jnp.maximum(h1 @ params["w2"] + params["b2"], 0.0)
    logits = h2 @ params["w3"] + params["b3"]
    return jax.nn.log_softmax(logits, axis=1)


# ------------------------- main -------------------------

if __name__ == "__main__":
    key = jax.random.PRNGKey(0)

    # The real module flattens to 524288 features; use a small stand-in input
    # (2, 8, 32, 32) -> 8192 features so the demo stays tiny.  The kernel
    # tiles the contraction dim over the grid, so it scales to 524288 as-is.
    B, Cc, Hh, Ww = 2, 8, 32, 32
    in_features = Cc * Hh * Ww
    neurons, n_classes = 500, 10

    kx, k1, k2, k3, kb1, kb2, kb3 = jax.random.split(key, 7)

    def uinit(k, shape, fan_in):
        lim = 1.0 / float(fan_in) ** 0.5          # PyTorch Linear default init
        return jax.random.uniform(k, shape, jnp.float32, -lim, lim)

    params = {
        "w1": uinit(k1, (in_features, neurons), in_features),
        "b1": uinit(kb1, (neurons,), in_features),
        "w2": uinit(k2, (neurons, neurons), neurons),
        "b2": uinit(kb2, (neurons,), neurons),
        "w3": uinit(k3, (neurons, n_classes), neurons),
        "b3": uinit(kb3, (n_classes,), neurons),
    }
    x = jax.random.normal(kx, (B, Cc, Hh, Ww), jnp.float32)

    fwd = jax.jit(lambda a: discriminator_forward(a, params))
    out = jax.block_until_ready(fwd(x))
    assert out.shape == (B, n_classes), out.shape

    ref = reference_forward(x, params)
    assert jnp.allclose(out, ref, rtol=5e-2, atol=5e-2), \
        float(jnp.max(jnp.abs(out - ref)))
    # Rows of a log-softmax must exponentiate to probabilities summing to 1.
    assert jnp.allclose(jnp.sum(jnp.exp(out), axis=1), 1.0, atol=1e-3)

    # Also exercise the module's default head (n_classes=1): LogSoftmax over a
    # single class is identically zero.
    params1 = dict(params,
                   w3=uinit(k3, (neurons, 1), neurons),
                   b3=uinit(kb3, (1,), neurons))
    out1 = jax.block_until_ready(
        jax.jit(lambda a: discriminator_forward(a, params1))(x))
    assert out1.shape == (B, 1) and bool(jnp.allclose(out1, 0.0, atol=1e-5))

    print("KERNEL_OK")
</pallas_src>

<mosaic_0001>
module attributes {stable_mosaic.version = 11 : i64} {
  func.func @_discriminator_kernel(%arg0: i32, %arg1: memref<2x2048xbf16, #tpu.memory_space<vmem>>, %arg2: memref<2048x512xbf16, #tpu.memory_space<vmem>>, %arg3: memref<1x512xf32, #tpu.memory_space<vmem>>, %arg4: memref<512x512xbf16, #tpu.memory_space<vmem>>, %arg5: memref<1x512xf32, #tpu.memory_space<vmem>>, %arg6: memref<512x10xbf16, #tpu.memory_space<vmem>>, %arg7: memref<1x10xf32, #tpu.memory_space<vmem>>, %arg8: memref<2x10xf32, #tpu.memory_space<vmem>>, %arg9: memref<2x512xf32, #tpu.memory_space<vmem>>) attributes {dimension_semantics = [#tpu.dimension_semantics<arbitrary>], iteration_bounds = array<i64: 4>, scalar_prefetch = 0 : i64, scratch_operands = 1 : i64, tpu.core_type = #tpu.core_type<tc>, window_params = [{transform_indices = @transform_0, window_bounds = array<i64: 2, 2048>}, {transform_indices = @transform_1, window_bounds = array<i64: 2048, 512>}, {pipeline_mode = #tpu.pipeline_mode<synchronous>, transform_indices = @transform_2, window_bounds = array<i64: 1, 512>}, {pipeline_mode = #tpu.pipeline_mode<synchronous>, transform_indices = @transform_3, window_bounds = array<i64: 512, 512>}, {pipeline_mode = #tpu.pipeline_mode<synchronous>, transform_indices = @transform_4, window_bounds = array<i64: 1, 512>}, {pipeline_mode = #tpu.pipeline_mode<synchronous>, transform_indices = @transform_5, window_bounds = array<i64: 512, 10>}, {pipeline_mode = #tpu.pipeline_mode<synchronous>, transform_indices = @transform_6, window_bounds = array<i64: 1, 10>}, {pipeline_mode = #tpu.pipeline_mode<synchronous>, transform_indices = @transform_7, window_bounds = array<i64: 2, 10>}]} {
    %c0_i32 = arith.constant 0 : i32
    %0 = arith.cmpi eq, %arg0, %c0_i32 : i32
    %1 = arith.extui %0 : i1 to i32
    %c0_i32_0 = arith.constant 0 : i32
    %2 = arith.cmpi ne, %1, %c0_i32_0 : i32
    scf.if %2 {
      %cst_9 = arith.constant 0.000000e+00 : f32
      %12 = vector.broadcast %cst_9 : f32 to vector<2x512xf32>
      %c0_10 = arith.constant 0 : index
      %c0_11 = arith.constant 0 : index
      %13 = vector.load %arg9[%c0_10, %c0_11] : memref<2x512xf32, #tpu.memory_space<vmem>>, vector<2x512xf32>
      tpu.vector_store %arg9[%c0_10, %c0_11], %12 {strides = array<i32>} : memref<2x512xf32, #tpu.memory_space<vmem>>, vector<2x512xf32>,
    } else {
    }
    %c0 = arith.constant 0 : index
    %c0_1 = arith.constant 0 : index
    %3 = vector.load %arg9[%c0, %c0_1] : memref<2x512xf32, #tpu.memory_space<vmem>>, vector<2x512xf32>
    %c0_2 = arith.constant 0 : index
    %c0_3 = arith.constant 0 : index
    %4 = vector.load %arg1[%c0_2, %c0_3] : memref<2x2048xbf16, #tpu.memory_space<vmem>>, vector<2x2048xbf16>
    %c0_4 = arith.constant 0 : index
    %c0_5 = arith.constant 0 : index
    %5 = vector.load %arg2[%c0_4, %c0_5] : memref<2048x512xbf16, #tpu.memory_space<vmem>>, vector<2048x512xbf16>
    %cst = arith.constant dense<0.000000e+00> : vector<2x512xf32>
    %6 = tpu.matmul %4, %5, %cst {dimension_numbers = #tpu.dot_dimension_numbers<[1], [0], [0], [1], [0, 0, 1, 1], [], []>} : vector<2x2048xbf16>, vector<2048x512xbf16>, vector<2x512xf32> -> vector<2x512xf32>
    %7 = arith.addf %3, %6 : vector<2x512xf32>
    %c0_6 = arith.constant 0 : index
    %c0_7 = arith.constant 0 : index
    %8 = vector.load %arg9[%c0_6, %c0_7] : memref<2x512xf32, #tpu.memory_space<vmem>>, vector<2x512xf32>
    tpu.vector_store %arg9[%c0_6, %c0_7], %7 {strides = array<i32>} : memref<2x512xf32, #tpu.memory_space<vmem>>, vector<2x512xf32>,
    %c3_i32 = arith.constant 3 : i32
    %9 = arith.cmpi eq, %arg0, %c3_i32 : i32
    %10 = arith.extui %9 : i1 to i32
    %c0_i32_8 = arith.constant 0 : i32
    %11 = arith.cmpi ne, %10, %c0_i32_8 : i32
    scf.if %11 {
      %c0_9 = arith.constant 0 : index
      %c0_10 = arith.constant 0 : index
      %12 = vector.load %arg9[%c0_9, %c0_10] : memref<2x512xf32, #tpu.memory_space<vmem>>, vector<2x512xf32>
      %c0_11 = arith.constant 0 : index
      %c0_12 = arith.constant 0 : index
      %13 = vector.load %arg3[%c0_11, %c0_12] : memref<1x512xf32, #tpu.memory_space<vmem>>, vector<1x512xf32>
      %14 = vector.broadcast %13 : vector<1x512xf32> to vector<2x512xf32>
      %15 = arith.addf %12, %14 : vector<2x512xf32>
      %cst_13 = arith.constant 0.000000e+00 : f32
      %16 = vector.broadcast %cst_13 : f32 to vector<2x512xf32>
      %17 = arith.maximumf %15, %16 : vector<2x512xf32>
      %18 = arith.truncf %17 : vector<2x512xf32> to vector<2x512xbf16>
      %c0_14 = arith.constant 0 : index
      %c0_15 = arith.constant 0 : index
      %19 = vector.load %arg4[%c0_14, %c0_15] : memref<512x512xbf16, #tpu.memory_space<vmem>>, vector<512x512xbf16>
      %cst_16 = arith.constant dense<0.000000e+00> : vector<2x512xf32>
      %20 = tpu.matmul %18, %19, %cst_16 {dimension_numbers = #tpu.dot_dimension_numbers<[1], [0], [0], [1], [0, 0, 1, 1], [], []>} : vector<2x512xbf16>, vector<512x512xbf16>, vector<2x512xf32> -> vector<2x512xf32>
      %c0_17 = arith.constant 0 : index
      %c0_18 = arith.constant 0 : index
      %21 = vector.load %arg5[%c0_17, %c0_18] : memref<1x512xf32, #tpu.memory_space<vmem>>, vector<1x512xf32>
      %22 = vector.broadcast %21 : vector<1x512xf32> to vector<2x512xf32>
      %23 = arith.addf %20, %22 : vector<2x512xf32>
      %cst_19 = arith.constant 0.000000e+00 : f32
      %24 = vector.broadcast %cst_19 : f32 to vector<2x512xf32>
      %25 = arith.maximumf %23, %24 : vector<2x512xf32>
      %26 = arith.truncf %25 : vector<2x512xf32> to vector<2x512xbf16>
      %c0_20 = arith.constant 0 : index
      %c0_21 = arith.constant 0 : index
      %27 = vector.load %arg6[%c0_20, %c0_21] : memref<512x10xbf16, #tpu.memory_space<vmem>>, vector<512x10xbf16>
      %cst_22 = arith.constant dense<0.000000e+00> : vector<2x10xf32>
      %28 = tpu.matmul %26, %27, %cst_22 {dimension_numbers = #tpu.dot_dimension_numbers<[1], [0], [0], [1], [0, 0, 1, 1], [], []>} : vector<2x512xbf16>, vector<512x10xbf16>, vector<2x10xf32> -> vector<2x10xf32>
      %c0_23 = arith.constant 0 : index
      %c0_24 = arith.constant 0 : index
      %29 = vector.load %arg7[%c0_23, %c0_24] : memref<1x10xf32, #tpu.memory_space<vmem>>, vector<1x10xf32>
      %30 = vector.broadcast %29 : vector<1x10xf32> to vector<2x10xf32>
      %31 = arith.addf %28, %30 : vector<2x10xf32>
      %cst_25 = arith.constant dense<0xFF800000> : vector<2xf32>
      %32 = vector.multi_reduction <maximumf>, %31, %cst_25 [1] : vector<2x10xf32> to vector<2xf32>
      %33 = vector.shape_cast %32 : vector<2xf32> to vector<2x1xf32>
      %34 = vector.broadcast %33 : vector<2x1xf32> to vector<2x10xf32>
      %35 = arith.subf %31, %34 : vector<2x10xf32>
      %36 = math.exp %35 : vector<2x10xf32>
      %cst_26 = arith.constant dense<0.000000e+00> : vector<2xf32>
      %37 = vector.multi_reduction <add>, %36, %cst_26 [1] : vector<2x10xf32> to vector<2xf32>
      %38 = vector.shape_cast %37 : vector<2xf32> to vector<2x1xf32>
      %39 = math.log %38 : vector<2x1xf32>
      %40 = vector.broadcast %39 : vector<2x1xf32> to vector<2x10xf32>
      %41 = arith.subf %35, %40 : vector<2x10xf32>
      %c0_27 = arith.constant 0 : index
      %c0_28 = arith.constant 0 : index
      %42 = vector.load %arg8[%c0_27, %c0_28] : memref<2x10xf32, #tpu.memory_space<vmem>>, vector<2x10xf32>
      tpu.vector_store %arg8[%c0_27, %c0_28], %41 {strides = array<i32>} : memref<2x10xf32, #tpu.memory_space<vmem>>, vector<2x10xf32>,
    } else {
    }
    return
  }
  func.func @transform_0(%arg0: i32) -> (i32, i32) {
    %c0_i32 = arith.constant 0 : i32
    %c0_i32_0 = arith.constant 0 : i32
    return %c0_i32, %arg0 : i32, i32
  }
  func.func @transform_1(%arg0: i32) -> (i32, i32) {
    %c0_i32 = arith.constant 0 : i32
    %c0_i32_0 = arith.constant 0 : i32
    return %arg0, %c0_i32 : i32, i32
  }
  func.func @transform_2(%arg0: i32) -> (i32, i32) {
    %c0_i32 = arith.constant 0 : i32
    %c0_i32_0 = arith.constant 0 : i32
    %c0_i32_1 = arith.constant 0 : i32
    return %c0_i32, %c0_i32_0 : i32, i32
  }
  func.func @transform_3(%arg0: i32) -> (i32, i32) {
    %c0_i32 = arith.constant 0 : i32
    %c0_i32_0 = arith.constant 0 : i32
    %c0_i32_1 = arith.constant 0 : i32
    return %c0_i32, %c0_i32_0 : i32, i32
  }
  func.func @transform_4(%arg0: i32) -> (i32, i32) {
    %c0_i32 = arith.constant 0 : i32
    %c0_i32_0 = arith.constant 0 : i32
    %c0_i32_1 = arith.constant 0 : i32
    return %c0_i32, %c0_i32_0 : i32, i32
  }
  func.func @transform_5(%arg0: i32) -> (i32, i32) {
    %c0_i32 = arith.constant 0 : i32
    %c0_i32_0 = arith.constant 0 : i32
    %c0_i32_1 = arith.constant 0 : i32
    return %c0_i32, %c0_i32_0 : i32, i32
  }
  func.func @transform_6(%arg0: i32) -> (i32, i32) {
    %c0_i32 = arith.constant 0 : i32
    %c0_i32_0 = arith.constant 0 : i32
    %c0_i32_1 = arith.constant 0 : i32
    return %c0_i32, %c0_i32_0 : i32, i32
  }
  func.func @transform_7(%arg0: i32) -> (i32, i32) {
    %c0_i32 = arith.constant 0 : i32
    %c0_i32_0 = arith.constant 0 : i32
    %c0_i32_1 = arith.constant 0 : i32
    return %c0_i32, %c0_i32_0 : i32, i32
  }
}

</mosaic_0001>

<bundles_post_ra>
// kernel: _lambda_.1
= control target key start
LH: loop header
LB: loop body
LE: loop exit
PB: predicated region body
PF: predicated region fallthrough
CT: control target
= control target key end

     0   :  { %12 = vsyncpa [#allocation4], 0  ;;  %s8788_s0 = inlined_call_operand.vmem [shape: bf16[2,8192], index: 0, kind: input, shape index: {}]   ;;  %s8789_s1 = inlined_call_operand.hbm [shape: bf16[8192,512], index: 1, kind: input, shape index: {}]   ;;  %s8790_s2 = inlined_call_operand.hbm [shape: f32[1,512], index: 2, kind: input, shape index: {}]   ;;  %s8791_s3 = inlined_call_operand.hbm [shape: bf16[512,512], index: 3, kind: input, shape index: {}]   ;;  %s8792_s4 = inlined_call_operand.hbm [shape: f32[1,512], index: 4, kind: input, shape index: {}]   ;;  %s8793_s5 = inlined_call_operand.hbm [shape: bf16[512,10], index: 5, kind: input, shape index: {}]   ;;  %s8794_s6 = inlined_call_operand.hbm [shape: f32[1,10], index: 6, kind: input, shape index: {}]   ;;  %s8795_s7 = inlined_call_operand.hbm [shape: f32[2,10], index: 7, kind: output, shape index: {}]  }
   0x1   :  { %14 = vsyncpa [#allocation4 + $0x1], 0 }
   0x2   :  { %15 = vsyncpa [#allocation7], 0 }
   0x3   :  { %16 = vsyncpa [#allocation10], 0 }
   0x4   :  { %17 = vsyncpa [#allocation13], 0 }
   0x5   :  { %18 = vsyncpa [#allocation5], 0  ;;  %s7887_s24 = smov 0   ;;  %s7889_s25 = smov 0  }
   0x6   :  { %s7891_s26 = smov 0   ;;  %s7893_s27 = smov 0  }
   0x7 LB: > { %s7833_s28 = smov [#allocation6]   ;;  %s7908_s30 = sadd.s32 4294967295, %s7831_s27   ;;  %s7831_s27 = sphi %s7893_s27, %s8817_s27   ;;  %s7827_s26 = sphi %s7891_s26, %s8816_s26   ;;  %s7823_s25 = sphi %s7889_s25, %s8815_s25   ;;  %s7819_s24 = sphi %s7887_s24, %s8814_s24  }
   0x8   : > { %s220_s29 = sshll.u32 %s7833_s28, 4  ;;  %p5753_p0 = scmp.ge.s32.totalorder %s7831_s27, 1  ;;  %s221_s29 = int_to_ptr.vmem [resolvable:$true] %s220_s29 }
   0x9   : > { %p8796_p1 = scmp.eq.s32.totalorder %s7908_s30, 0  ;;  %p207_p2 = scmp.lt.s32.totalorder %s7831_s27, 5 }
   0xa   : > { %s7834_s9 = smov [#allocation9]   ;;  %s7835_s11 = smov [#allocation8]  }
   0xb   : > { %p7914_p4 = pnand %p5753_p0, %p207_p2  ;;  %s244_s10 = sshll.u32 %s7834_s9, 4  ;;  %s245_s10 = int_to_ptr.vmem [resolvable:$true] %s244_s10 }
   0xc   : > { %s230_s12 = sshll.u32 %s7835_s11, 4  ;;  %s7610_s15 = scalar_lea.vmem %s221_s29, 64  ;;  %s7926_s12 = int_to_ptr.vmem [resolvable:$true] %s230_s12 }
   0xd   : > { %s8799_s8 = scalar_select %p7914_p4, 1, 0 }
   0xe   : > { %p6523_p5 = pneg %p7914_p4  ;;  %p7611_p8 = scmp.ne.s32.totalorder %s221_s29, %s7610_s15 }
   0xf   : > { %p7618_p11 = scmp.lt.s32.totalorder %s221_s29, %s221_s29  ;;  %p7619_p12 = scmp.lt.s32.totalorder %s7610_s15, %s7610_s15 }
  0x10   : > { %p7922_p6 = pnand %p6523_p5, %p8796_p1 }
  0x11   : > { %p7620_p13 = por %p7619_p12, %p7618_p11 }
  0x12   : > { %p7930_p7 = pneg %p7922_p6 }
  0x14   : > { %p7613_p9 = pnand %p7611_p8, %p7930_p7 }
  0x16   : > { %p7614_p10 = pneg %p7613_p9 }
  0x18   : > { %p7621_p0 = pnand %p7620_p13, %p7614_p10 }
  0x1a   : > { %7624 = shalt.err (!%p7621_p0)
}
  0x1b   : > { %6526 = dma.hbm_to_vmem [thread:$0]  (!%p7922_p6), %s8790_s2, 64, %s221_s29, [#allocation7]  }
  0x1c   : > { %s7636_s18 = scalar_lea.vmem %s245_s10, 64  ;;  %p7644_p1 = scmp.lt.s32.totalorder %s245_s10, %s245_s10 }
  0x1d   : > { %p7637_p2 = scmp.ne.s32.totalorder %s245_s10, %s7636_s18  ;;  %p7645_p8 = scmp.lt.s32.totalorder %s7636_s18, %s7636_s18 }
  0x1f   : > { %p7639_p5 = pnand %p7637_p2, %p7930_p7  ;;  %p7646_p9 = por %p7645_p8, %p7644_p1 }
  0x21   : > { %p7640_p3 = pneg %p7639_p5 }
  0x23   : > { %p7647_p4 = pnand %p7646_p9, %p7640_p3 }
  0x25   : > { %7650 = shalt.err (!%p7647_p4)
}
  0x26   : > { %6532 = dma.hbm_to_vmem [thread:$0]  (!%p7922_p6), %s8792_s4, 64, %s245_s10, [#allocation10]  }
  0x27   : > { %s7662_s21 = scalar_lea.vmem %s7926_s12, 16384  ;;  %p7670_p13 = scmp.lt.s32.totalorder %s7926_s12, %s7926_s12 }
  0x28   : > { %p7663_p10 = scmp.ne.s32.totalorder %s7926_s12, %s7662_s21  ;;  %p7671_p1 = scmp.lt.s32.totalorder %s7662_s21, %s7662_s21 }
  0x2a   : > { %p7665_p11 = pnand %p7663_p10, %p7930_p7  ;;  %p7672_p3 = por %p7671_p1, %p7670_p13 }
  0x2c   : > { %p7666_p12 = pneg %p7665_p11 }
  0x2e   : > { %p7673_p4 = pnand %p7672_p3, %p7666_p12 }
  0x30   : > { %7676 = shalt.err (!%p7673_p4)
}
  0x31   : > { %s7836_s22 = smov 256   ;;  %s7837_s23 = smov 16  }
  0x32   : > { %6529 = dma.hbm_to_vmem [thread:$0]  (!%p7922_p6), %s8791_s3, 16384, %s7926_s12, [#allocation7], %s7836_s22, %s7836_s22, %s7837_s23  }
  0x33   : > { %s7838_s9 = smov [#allocation11]  }
  0x34   : > { %s254_s10 = sshll.u32 %s7838_s9, 4  ;;  %s255_s10 = int_to_ptr.vmem [resolvable:$true] %s254_s10 }
  0x35   : > { %s7688_s11 = scalar_lea.vmem %s255_s10, 4096  ;;  %p7696_p8 = scmp.lt.s32.totalorder %s255_s10, %s255_s10 }
  0x36   : > { %p7689_p0 = scmp.ne.s32.totalorder %s255_s10, %s7688_s11  ;;  %p7697_p9 = scmp.lt.s32.totalorder %s7688_s11, %s7688_s11 }
  0x38   : > { %p7691_p2 = pnand %p7689_p0, %p7930_p7  ;;  %p7698_p10 = por %p7697_p9, %p7696_p8 }
  0x3a   : > { %p7692_p5 = pneg %p7691_p2 }
  0x3c   : > { %p7699_p11 = pnand %p7698_p10, %p7692_p5 }
  0x3e   : > { %7702 = shalt.err (!%p7699_p11)
}
  0x3f   : > { %s7839_s15 = smov 64   ;;  %s7840_s16 = smov 4  }
  0x40   : > { %6535 = dma.hbm_to_vmem [thread:$0]  (!%p7922_p6), %s8793_s5, 4096, %s255_s10, [#allocation10], %s7839_s15, %s7839_s15, %s7840_s16  }
  0x41   : > { %s7841_s18 = smov [#allocation12]  }
  0x42   : > { %s268_s19 = sshll.u32 %s7841_s18, 4  ;;  %s269_s19 = int_to_ptr.vmem [resolvable:$true] %s268_s19 }
  0x43   : > { %s7714_s20 = scalar_lea.vmem %s269_s19, 16  ;;  %s7721_s21 = scalar_lea.vmem %s269_s19, 32 }
  0x44   : > { %p7715_p12 = scmp.ne.s32.totalorder %s269_s19, %s7714_s20  ;;  %p7722_p3 = scmp.lt.s32.totalorder %s269_s19, %s269_s19 }
  0x45   : > { %p7723_p4 = scmp.lt.s32.totalorder %s7721_s21, %s7714_s20 }
  0x46   : > { %p7717_p13 = pnand %p7715_p12, %p7930_p7 }
  0x47   : > { %p7724_p0 = por %p7723_p4, %p7722_p3 }
  0x48   : > { %p7718_p1 = pneg %p7717_p13 }
  0x4a   : > { %p7725_p2 = pnand %p7724_p0, %p7718_p1 }
  0x4c   : > { %7728 = shalt.err (!%p7725_p2)
}
  0x4d   : > { %6538 = dma.hbm_to_vmem [thread:$0]  (!%p7922_p6), %s8794_s6, 16, %s269_s19, [#allocation13]  }
  0x4e   : > { %s7978_s14 = sadd.s32 1, %s7831_s27   ;;  %s57_s9 = sadd.s32 1, %s7827_s26 }
  0x4f   : > { %s54_s13 = ssub.s32 %s7831_s27, %s7978_s14  ;;  %p64_p5 = scmp.ne.s32.totalorder %s7827_s26, %s7823_s25 }
  0x50   : > { %p55_p7 = scmp.eq.s32.totalorder %s54_s13, 0  ;;  %p65_p8 = scmp.eq.s32.totalorder %s7831_s27, 0 }
  0x51   : > { %p70_p9 = scmp.ne.s32.totalorder %s7823_s25, %s7819_s24  ;;  %p8802_p11 = scmp.eq.s32.totalorder %s7908_s30, 0 }
  0x52   : > { %s7989_s10 = scalar_select %p55_p7, %s7827_s26, %s57_s9  }
  0x53   : > { %p66_p10 = por %p65_p8, %p64_p5  ;;  %p7993_p12 = por %p8802_p11, %p70_p9 }
  0x54   : > { %p6548_p13 = scmp.lt.s32.totalorder %s7831_s27, 4  ;;  %s287_s15 = sand.u32 1, %s7827_s26  }
  0x55   : > { %s8803_s11 = scalar_select %p7993_p12, 1, 0 }
  0x56   : > { %s5760_s16 = sshll.u32 %s287_s15, 12  ;;  %s6452_s17 = sshll.u32 %s7831_s27, 16 }
  0x57   : > { %s8003_s19 = scalar_lea.hbm %s8789_s1, %s6452_s17  ;;  %s291_s24 = scalar_lea.vmem [#allocation3], %s5760_s16 }
  0x58   : > { %s299_s20 = sshll.u32 %s291_s24, 4  ;;  %p8007_p6 = pnand %p6548_p13, %p66_p10  ;;  %s8005_s20 = int_to_ptr.vmem [resolvable:$true] %s299_s20 }
  0x59   : > { %s8011_s28 = scalar_lea.sflag [#allocation4], %s287_s15  ;;  %s7729_s27 = scalar_lea.hbm %s8003_s19, 65536 }
  0x5a   : > { %p7730_p1 = scmp.ne.s32.totalorder %s8003_s19, %s7729_s27  ;;  %p7731_p3 = pneg %p8007_p6 }
  0x5b   : > { %s7734_s9 = scalar_lea.hbm %s8789_s1, 262144  ;;  %p7735_p2 = scmp.lt.s32.totalorder %s8003_s19, %s8789_s1 }
  0x5c   : > { %p7732_p4 = pnand %p7731_p3, %p7730_p1  ;;  %p7736_p7 = scmp.lt.s32.totalorder %s7734_s9, %s7729_s27 }
  0x5e   : > { %p7733_p0 = pneg %p7732_p4  ;;  %p7737_p5 = por %p7736_p7, %p7735_p2 }
  0x60   : > { %p7738_p8 = pnand %p7737_p5, %p7733_p0 }
  0x62   : > { %7741 = shalt.err (!%p7738_p8)
}
  0x63   : > { %s7742_s15 = scalar_lea.vmem %s8005_s20, 65536  ;;  %s7842_s12 = smov [#allocation3]  }
  0x64   : > { %p7743_p9 = scmp.ne.s32.totalorder %s8005_s20, %s7742_s15  ;;  %s7747_s18 = sshll.u32 %s7842_s12, 4  ;;  %s7748_s18 = int_to_ptr.vmem [resolvable:$false] %s7747_s18 }
  0x65   : > { %s7749_s24 = scalar_lea.vmem %s7748_s18, 131072  ;;  %p7750_p13 = scmp.lt.s32.totalorder %s8005_s20, %s7748_s18 }
  0x66   : > { %p7745_p10 = pnand %p7743_p9, %p7731_p3  ;;  %p7751_p1 = scmp.lt.s32.totalorder %s7749_s24, %s7742_s15 }
  0x68   : > { %p7746_p11 = pneg %p7745_p10  ;;  %p7752_p4 = por %p7751_p1, %p7750_p13 }
  0x6a   : > { %p7753_p12 = pnand %p7752_p4, %p7746_p11 }
  0x6c   : > { %7756 = shalt.err (!%p7753_p12)
}
  0x6d   : > { %6542 = dma.hbm_to_vmem [thread:$0]  (!%p8007_p6), %s8003_s19, 65536, %s8005_s20, %s8011_s28, %s7836_s22, %s7836_s22, %s7837_s23  }
  0x6e   : > { %p8805_p3 = scmp.ne.s32.totalorder %s8799_s8, 0 }
  0x6f   : > { %s313_s27 = sand.u32 (!%p8805_p3), 1, %s7823_s25   ;;  %p8806_p12 = scmp.ne.s32.totalorder (!%p8805_p3), %s8803_s11, 0 }
  0x70   : > { %311 = sbr.rel (%p8805_p3) target bundleno = 1719 (0x6b7), region = 48  ;;  %s5765_s29 = sshll.u32 (!%p8805_p3), %s313_s27, 12 }
  0x71   : > { %s314_s13 = scalar_lea.sflag (!%p8805_p3), [#allocation4], %s313_s27  ;;  %s8038_s9 = scalar_lea.vmem (!%p8805_p3), [#allocation3], %s5765_s29 }
  0x75   : > { %7798 = dma.done.wait (%p8806_p12), %s314_s13, 65536  }
  0x76   : > { %7800 = vsyncadd (%p8806_p12), %s314_s13, 4294901760  ;;  %p8807_p0 = scmp.eq.s32.totalorder %s7908_s30, 0 }
  0x78   : > { %7802 = dma.done.wait (%p8807_p0), [#allocation7], 16448   ;;  %p8808_p6 = pmov %p8807_p0 }
  0x79   : > { %p8809_p2 = pmov %p8807_p0 }
  0x7a   : > { %7804 = vsyncadd (%p8808_p6), [#allocation7], 4294950848 }
  0x7b   : > { %7806 = dma.done.wait (%p8809_p2), [#allocation10], 4160   ;;  %p8810_p7 = pmov %p8807_p0 }
  0x7c   : > { %p8811_p5 = pmov %p8807_p0 }
  0x7d   : > { %7808 = vsyncadd (%p8810_p7), [#allocation10], 4294963136 }
  0x7e   : > { %7810 = dma.done.wait (%p8811_p5), [#allocation13], 16   ;;  %p8812_p8 = pmov %p8807_p0 }
  0x7f   : > { %s5771_s8 = sshll.u32 %s7908_s30, 4  ;;  %p8813_p10 = scmp.ne.s32.totalorder %s7908_s30, 0 }
  0x80   : > { %7812 = vsyncadd (%p8812_p8), [#allocation13], 4294967280  ;;  %p368_p9 = scmp.lt.s32.totalorder %s5771_s8, 63 }
  0x81   : > { %377 = sbr.rel (%p8813_p10) target bundleno = 136 (0x88), region = 76 }
  0x82   : > { %s8819_s8 = smov (!%p368_p9, %s5771_s8), 63 }
  0x83   : > { %s8060_s11 = scalar_lea.vmem %s8788_s0, %s8819_s8 }
  0x86   : > { %v7843_v0 = vmov 0.0  }
  0x87   : > { %378 = vst [vmem:[#allocation2] sm:$0xff] %v7843_v0 }
  0x88 PF: > { %v6601_v1 = vld [vmem:[%s8038_s9 + $0xe4] ss:$16 sps:$4 sm:$0xff]   ;;  %v6605_v3 = vld [vmem:[%s8038_s9 + $0xe0] ss:$16 sps:$4 sm:$0xff]   ;;  %v7844_v37 = vmov 1966171168   ;;  %v900_v39 = vlaneseq }
  0x89   : > { %v6603_v2 = vld [vmem:[%s8038_s9 + $0x2e4] ss:$16 sps:$4 sm:$0xff]   ;;  %3570 = vmatprep.subr.bf16.mxu0 %v6601_v1  ;;  %v6606_v4 = vld [vmem:[%s8038_s9 + $0x2e0] ss:$16 sps:$4 sm:$0xff]   ;;  %v898_v38 = vunpack.c.l.s4 %v7844_v37  ;;  %v380_v53 = vld [vmem:[%s8060_s11] sm:$0xff]  ;;  %p6285_p11 = scmp.ne.s32.totalorder %s7908_s30, 3 }
  0x8a   : > { %3611 = vmatprep.subr.bf16.mxu1 %v6603_v2  ;;  %v6607_v5 = vld [vmem:[%s8038_s9 + $0xc4] ss:$16 sps:$4 sm:$0xff]   ;;  %3571 = vmatpush1.bf16.msra.mxu0 %v6605_v3  ;;  %v6611_v7 = vld [vmem:[%s8038_s9 + $0xc0] ss:$16 sps:$4 sm:$0xff]   ;;  %v8103_v44 = vshrl.u32 %v900_v39, 7  ;;  %v896_v2 = vcombine.high %v380_v53, %v380_v53 }
  0x8b   : > { %3612 = vmatpush1.bf16.msra.mxu1 %v6606_v4  ;;  %v6609_v6 = vld [vmem:[%s8038_s9 + $0x2c4] ss:$16 sps:$4 sm:$0xff]   ;;  %3572 = vmatprep.subr.bf16.mxu0 %v6607_v5  ;;  %v6612_v8 = vld [vmem:[%s8038_s9 + $0x2c0] ss:$16 sps:$4 sm:$0xff]   ;;  %v899_v43 = vunpack.c.0.s8 %v898_v38 }
  0x8c   : > { %3613 = vmatprep.subr.bf16.mxu1 %v6609_v6  ;;  %v6613_v9 = vld [vmem:[%s8038_s9 + $0xa4] ss:$16 sps:$4 sm:$0xff]   ;;  %v6617_v11 = vld [vmem:[%s8038_s9 + $0xa0] ss:$16 sps:$4 sm:$0xff]  }
  0x8d   : > { %v6615_v10 = vld [vmem:[%s8038_s9 + $0x2a4] ss:$16 sps:$4 sm:$0xff]   ;;  %v6618_v12 = vld [vmem:[%s8038_s9 + $0x2a0] ss:$16 sps:$4 sm:$0xff]   ;;  %v8111_v50 = vsub.s32 %v899_v43, %v8103_v44 }
  0x8e   : > { %3573 = vmatpush1.bf16.msra.mxu0 %v6611_v7  ;;  %v6619_v13 = vld [vmem:[%s8038_s9 + $0x84] ss:$16 sps:$4 sm:$0xff]   ;;  %v6623_v15 = vld [vmem:[%s8038_s9 + $0x80] ss:$16 sps:$4 sm:$0xff]  }
  0x8f   : > { %3614 = vmatpush1.bf16.msra.mxu1 %v6612_v8  ;;  %3574 = vmatprep.subr.bf16.mxu0 %v6613_v9  ;;  %v6621_v14 = vld [vmem:[%s8038_s9 + $0x284] ss:$16 sps:$4 sm:$0xff]   ;;  %v6624_v16 = vld [vmem:[%s8038_s9 + $0x280] ss:$16 sps:$4 sm:$0xff]   ;;  %v903_v55 = vrot.slane %v380_v53, %v8111_v50  ;;  %v8139_v7 = vrot.slane %v896_v2, %v8111_v50 }
  0x90   : > { %3615 = vmatprep.subr.bf16.mxu1 %v6615_v10  ;;  %v6625_v17 = vld [vmem:[%s8038_s9 + $0x64] ss:$16 sps:$4 sm:$0xff]   ;;  %v6629_v19 = vld [vmem:[%s8038_s9 + $0x60] ss:$16 sps:$4 sm:$0xff]  }
  0x91   : > { %v6627_v18 = vld [vmem:[%s8038_s9 + $0x264] ss:$16 sps:$4 sm:$0xff]   ;;  %v6630_v20 = vld [vmem:[%s8038_s9 + $0x260] ss:$16 sps:$4 sm:$0xff]   ;;  %v911_v59 = vcombine.high %v903_v55, %v903_v55 }
  0x92   : > { %3575 = vmatpush1.bf16.msra.mxu0 %v6617_v11  ;;  %v6631_v21 = vld [vmem:[%s8038_s9 + $0x44] ss:$16 sps:$4 sm:$0xff]   ;;  %v6635_v23 = vld [vmem:[%s8038_s9 + $0x40] ss:$16 sps:$4 sm:$0xff]  }
  0x93   : > { %3616 = vmatpush1.bf16.msra.mxu1 %v6618_v12  ;;  %3576 = vmatprep.subr.bf16.mxu0 %v6619_v13  ;;  %v6633_v22 = vld [vmem:[%s8038_s9 + $0x244] ss:$16 sps:$4 sm:$0xff]   ;;  %v6636_v24 = vld [vmem:[%s8038_s9 + $0x240] ss:$16 sps:$4 sm:$0xff]   ;;  %v8123_v61 = vrot.slane %v911_v59, %v8111_v50  ;;  %v912_v12 = vcombine.high %v8139_v7, %v8139_v7 }
  0x94   : > { %3617 = vmatprep.subr.bf16.mxu1 %v6621_v14  ;;  %v6637_v25 = vld [vmem:[%s8038_s9 + $0x24] ss:$16 sps:$4 sm:$0xff]   ;;  %v6641_v27 = vld [vmem:[%s8038_s9 + $0x20] ss:$16 sps:$4 sm:$0xff]   ;;  %v8149_v14 = vrot.slane %v903_v55, %v8111_v50 }
  0x95   : > { %v6639_v26 = vld [vmem:[%s8038_s9 + $0x224] ss:$16 sps:$4 sm:$0xff]   ;;  %v6642_v28 = vld [vmem:[%s8038_s9 + $0x220] ss:$16 sps:$4 sm:$0xff]   ;;  %v8130_v1 = vcombine.high %v8123_v61, %v8123_v61  ;;  %3602 = vmatprep.mubr.bf16.mxu0 %v8123_v61 }
  0x96   : > { %3577 = vmatpush1.bf16.msra.mxu0 %v6623_v15  ;;  %v6643_v29 = vld [vmem:[%s8038_s9 + $0x4] ss:$16 sps:$4 sm:$0xff]   ;;  %v6647_v31 = vld [vmem:[%s8038_s9] ss:$16 sps:$4 sm:$0xff]  }
  0x97   : > { %3618 = vmatpush1.bf16.msra.mxu1 %v6624_v16  ;;  %3578 = vmatprep.subr.bf16.mxu0 %v6625_v17  ;;  %v6645_v30 = vld [vmem:[%s8038_s9 + $0x204] ss:$16 sps:$4 sm:$0xff]   ;;  %v6648_v32 = vld [vmem:[%s8038_s9 + $0x200] ss:$16 sps:$4 sm:$0xff]  }
  0x98   : > { %3619 = vmatprep.subr.bf16.mxu1 %v6627_v18  ;;  %v6649_v33 = vld [vmem:[%s8038_s9 + $0x1e4] ss:$16 sps:$4 sm:$0xff]   ;;  %v6653_v35 = vld [vmem:[%s8038_s9 + $0x1e0] ss:$16 sps:$4 sm:$0xff]   ;;  %3643 = vmatprep.mubr.bf16.mxu1 %v8130_v1  ;;  %v8155_v18 = vrot.slane %v912_v12, %v8111_v50 }
  0x99   : > { %v6651_v34 = vld [vmem:[%s8038_s9 + $0x3e4] ss:$16 sps:$4 sm:$0xff]   ;;  %v6654_v36 = vld [vmem:[%s8038_s9 + $0x3e0] ss:$16 sps:$4 sm:$0xff]  }
  0x9a   : > { %3579 = vmatpush1.bf16.msra.mxu0 %v6629_v19  ;;  %v6655_v40 = vld [vmem:[%s8038_s9 + $0x1c4] ss:$16 sps:$4 sm:$0xff]   ;;  %v6659_v42 = vld [vmem:[%s8038_s9 + $0x1c0] ss:$16 sps:$4 sm:$0xff]   ;;  %v8159_v19 = vcombine.high %v8149_v14, %v8149_v14 }
  0x9b   : > { %3620 = vmatpush1.bf16.msra.mxu1 %v6630_v20  ;;  %3580 = vmatprep.subr.bf16.mxu0 %v6631_v21  ;;  %v6657_v41 = vld [vmem:[%s8038_s9 + $0x3c4] ss:$16 sps:$4 sm:$0xff]   ;;  %v6660_v45 = vld [vmem:[%s8038_s9 + $0x3c0] ss:$16 sps:$4 sm:$0xff]  }
  0x9c   : > { %3621 = vmatprep.subr.bf16.mxu1 %v6633_v22  ;;  %v6661_v46 = vld [vmem:[%s8038_s9 + $0x1a4] ss:$16 sps:$4 sm:$0xff]   ;;  %v6665_v48 = vld [vmem:[%s8038_s9 + $0x1a0] ss:$16 sps:$4 sm:$0xff]  }
  0x9d   : > { %v6663_v47 = vld [vmem:[%s8038_s9 + $0x3a4] ss:$16 sps:$4 sm:$0xff]   ;;  %v6666_v49 = vld [vmem:[%s8038_s9 + $0x3a0] ss:$16 sps:$4 sm:$0xff]  }
  0x9e   : > { %3581 = vmatpush1.bf16.msra.mxu0 %v6635_v23  ;;  %v6667_v51 = vld [vmem:[%s8038_s9 + $0x184] ss:$16 sps:$4 sm:$0xff]   ;;  %v6671_v54 = vld [vmem:[%s8038_s9 + $0x180] ss:$16 sps:$4 sm:$0xff]  }
  0x9f   : > { %3622 = vmatpush1.bf16.msra.mxu1 %v6636_v24  ;;  %3582 = vmatprep.subr.bf16.mxu0 %v6637_v25  ;;  %v6669_v52 = vld [vmem:[%s8038_s9 + $0x384] ss:$16 sps:$4 sm:$0xff]   ;;  %v6672_v56 = vld [vmem:[%s8038_s9 + $0x380] ss:$16 sps:$4 sm:$0xff]   ;;  %v8167_v24 = vcombine.high %v8155_v18, %v8155_v18 }
  0xa0   : > { %3623 = vmatprep.subr.bf16.mxu1 %v6639_v26  ;;  %v6673_v57 = vld [vmem:[%s8038_s9 + $0x164] ss:$16 sps:$4 sm:$0xff]   ;;  %v6677_v60 = vld [vmem:[%s8038_s9 + $0x160] ss:$16 sps:$4 sm:$0xff]  }
  0xa1   : > { %v6675_v58 = vld [vmem:[%s8038_s9 + $0x364] ss:$16 sps:$4 sm:$0xff]   ;;  %v6678_v62 = vld [vmem:[%s8038_s9 + $0x360] ss:$16 sps:$4 sm:$0xff]  }
  0xa2   : > { %3583 = vmatpush1.bf16.msra.mxu0 %v6641_v27  ;;  %v6679_v63 = vld [vmem:[%s8038_s9 + $0x144] ss:$16 sps:$4 sm:$0xff]   ;;  %v6683_v3 = vld [vmem:[%s8038_s9 + $0x140] ss:$16 sps:$4 sm:$0xff]  }
  0xa3   : > { %3624 = vmatpush1.bf16.msra.mxu1 %v6642_v28  ;;  %3584 = vmatprep.subr.bf16.mxu0 %v6643_v29  ;;  %v6681_v0 = vld [vmem:[%s8038_s9 + $0x344] ss:$16 sps:$4 sm:$0xff]   ;;  %v6684_v4 = vld [vmem:[%s8038_s9 + $0x340] ss:$16 sps:$4 sm:$0xff]  }
  0xa4   : > { %3625 = vmatprep.subr.bf16.mxu1 %v6645_v30  ;;  %v6685_v5 = vld [vmem:[%s8038_s9 + $0x124] ss:$16 sps:$4 sm:$0xff]   ;;  %v6689_v8 = vld [vmem:[%s8038_s9 + $0x120] ss:$16 sps:$4 sm:$0xff]  }
  0xa5   : > { %v6687_v6 = vld [vmem:[%s8038_s9 + $0x324] ss:$16 sps:$4 sm:$0xff]   ;;  %v6690_v9 = vld [vmem:[%s8038_s9 + $0x320] ss:$16 sps:$4 sm:$0xff]  }
  0xa6   : > { %3585 = vmatpush1.bf16.msra.mxu0 %v6647_v31  ;;  %v6691_v10 = vld [vmem:[%s8038_s9 + $0x104] ss:$16 sps:$4 sm:$0xff]   ;;  %v6695_v13 = vld [vmem:[%s8038_s9 + $0x100] ss:$16 sps:$4 sm:$0xff]  }
  0xa7   : > { %3626 = vmatpush1.bf16.msra.mxu1 %v6648_v32  ;;  %3586 = vmatprep.subr.bf16.mxu0 %v6649_v33  ;;  %v6693_v11 = vld [vmem:[%s8038_s9 + $0x304] ss:$16 sps:$4 sm:$0xff]   ;;  %v6696_v15 = vld [vmem:[%s8038_s9 + $0x300] ss:$16 sps:$4 sm:$0xff]  }
  0xa8   : > { %3627 = vmatprep.subr.bf16.mxu1 %v6651_v34  ;;  %v6699_v16 = vld [vmem:[%s8038_s9 + $0x4e4] ss:$16 sps:$4 sm:$0xff]   ;;  %v6697_v20 = vld [vmem:[%s8038_s9 + $0x4e0] ss:$16 sps:$4 sm:$0xff]  }
  0xa9   : > { %v6702_v17 = vld [vmem:[%s8038_s9 + $0x6e4] ss:$16 sps:$4 sm:$0xff]   ;;  %v6700_v21 = vld [vmem:[%s8038_s9 + $0x6e0] ss:$16 sps:$4 sm:$0xff]  }
  0xaa   : > { %3587 = vmatpush2.bf16.msra.mxu0 %v6653_v35  ;;  %v6705_v22 = vld [vmem:[%s8038_s9 + $0x4c4] ss:$16 sps:$4 sm:$0xff]   ;;  %v6703_v25 = vld [vmem:[%s8038_s9 + $0x4c0] ss:$16 sps:$4 sm:$0xff]  }
  0xab   : > { %3628 = vmatpush2.bf16.msra.mxu1 %v6654_v36  ;;  %3588 = vmatprep.subr.bf16.mxu0 %v6655_v40  ;;  %v6708_v23 = vld [vmem:[%s8038_s9 + $0x6c4] ss:$16 sps:$4 sm:$0xff]   ;;  %v6706_v26 = vld [vmem:[%s8038_s9 + $0x6c0] ss:$16 sps:$4 sm:$0xff]  }
  0xac   : > { %3629 = vmatprep.subr.bf16.mxu1 %v6657_v41  ;;  %v6711_v27 = vld [vmem:[%s8038_s9 + $0x4a4] ss:$16 sps:$4 sm:$0xff]   ;;  %v6709_v29 = vld [vmem:[%s8038_s9 + $0x4a0] ss:$16 sps:$4 sm:$0xff]  }
  0xad   : > { %v6714_v28 = vld [vmem:[%s8038_s9 + $0x6a4] ss:$16 sps:$4 sm:$0xff]   ;;  %v6712_v30 = vld [vmem:[%s8038_s9 + $0x6a0] ss:$16 sps:$4 sm:$0xff]  }
  0xae   : > { %3589 = vmatpush2.bf16.msra.mxu0 %v6659_v42  ;;  %v6717_v31 = vld [vmem:[%s8038_s9 + $0x484] ss:$16 sps:$4 sm:$0xff]   ;;  %v6715_v33 = vld [vmem:[%s8038_s9 + $0x480] ss:$16 sps:$4 sm:$0xff]  }
  0xaf   : > { %3630 = vmatpush2.bf16.msra.mxu1 %v6660_v45  ;;  %3590 = vmatprep.subr.bf16.mxu0 %v6661_v46  ;;  %v6720_v32 = vld [vmem:[%s8038_s9 + $0x684] ss:$16 sps:$4 sm:$0xff]   ;;  %v6718_v34 = vld [vmem:[%s8038_s9 + $0x680] ss:$16 sps:$4 sm:$0xff]  }
  0xb0   : > { %3631 = vmatprep.subr.bf16.mxu1 %v6663_v47  ;;  %v6723_v35 = vld [vmem:[%s8038_s9 + $0x464] ss:$16 sps:$4 sm:$0xff]   ;;  %v6721_v37 = vld [vmem:[%s8038_s9 + $0x460] ss:$16 sps:$4 sm:$0xff]  }
  0xb1   : > { %v6726_v36 = vld [vmem:[%s8038_s9 + $0x664] ss:$16 sps:$4 sm:$0xff]   ;;  %v6724_v38 = vld [vmem:[%s8038_s9 + $0x660] ss:$16 sps:$4 sm:$0xff]  }
  0xb2   : > { %3591 = vmatpush2.bf16.msra.mxu0 %v6665_v48  ;;  %v6729_v39 = vld [vmem:[%s8038_s9 + $0x444] ss:$16 sps:$4 sm:$0xff]   ;;  %v6727_v41 = vld [vmem:[%s8038_s9 + $0x440] ss:$16 sps:$4 sm:$0xff]  }
  0xb3   : > { %3632 = vmatpush2.bf16.msra.mxu1 %v6666_v49  ;;  %3592 = vmatprep.subr.bf16.mxu0 %v6667_v51  ;;  %v6732_v40 = vld [vmem:[%s8038_s9 + $0x644] ss:$16 sps:$4 sm:$0xff]   ;;  %v6730_v42 = vld [vmem:[%s8038_s9 + $0x640] ss:$16 sps:$4 sm:$0xff]  }
  0xb4   : > { %3633 = vmatprep.subr.bf16.mxu1 %v6669_v52  ;;  %v6735_v43 = vld [vmem:[%s8038_s9 + $0x424] ss:$16 sps:$4 sm:$0xff]   ;;  %v6733_v46 = vld [vmem:[%s8038_s9 + $0x420] ss:$16 sps:$4 sm:$0xff]  }
  0xb5   : > { %v6738_v45 = vld [vmem:[%s8038_s9 + $0x624] ss:$16 sps:$4 sm:$0xff]   ;;  %v6736_v47 = vld [vmem:[%s8038_s9 + $0x620] ss:$16 sps:$4 sm:$0xff]  }
  0xb6   : > { %3593 = vmatpush2.bf16.msra.mxu0 %v6671_v54  ;;  %v6741_v48 = vld [vmem:[%s8038_s9 + $0x404] ss:$16 sps:$4 sm:$0xff]   ;;  %v6739_v51 = vld [vmem:[%s8038_s9 + $0x400] ss:$16 sps:$4 sm:$0xff]  }
  0xb7   : > { %3634 = vmatpush2.bf16.msra.mxu1 %v6672_v56  ;;  %3594 = vmatprep.subr.bf16.mxu0 %v6673_v57  ;;  %v6744_v49 = vld [vmem:[%s8038_s9 + $0x604] ss:$16 sps:$4 sm:$0xff]   ;;  %v6742_v52 = vld [vmem:[%s8038_s9 + $0x600] ss:$16 sps:$4 sm:$0xff]  }
  0xb8   : > { %3635 = vmatprep.subr.bf16.mxu1 %v6675_v58  ;;  %v6747_v53 = vld [vmem:[%s8038_s9 + $0x5e4] ss:$16 sps:$4 sm:$0xff]   ;;  %v6745_v55 = vld [vmem:[%s8038_s9 + $0x5e0] ss:$16 sps:$4 sm:$0xff]  }
  0xb9   : > { %v6750_v54 = vld [vmem:[%s8038_s9 + $0x7e4] ss:$16 sps:$4 sm:$0xff]   ;;  %v6748_v56 = vld [vmem:[%s8038_s9 + $0x7e0] ss:$16 sps:$4 sm:$0xff]  }
  0xba   : > { %3595 = vmatpush2.bf16.msra.mxu0 %v6677_v60  ;;  %v6753_v57 = vld [vmem:[%s8038_s9 + $0x5c4] ss:$16 sps:$4 sm:$0xff]   ;;  %v6751_v59 = vld [vmem:[%s8038_s9 + $0x5c0] ss:$16 sps:$4 sm:$0xff]  }
  0xbb   : > { %3636 = vmatpush2.bf16.msra.mxu1 %v6678_v62  ;;  %3596 = vmatprep.subr.bf16.mxu0 %v6679_v63  ;;  %v6756_v58 = vld [vmem:[%s8038_s9 + $0x7c4] ss:$16 sps:$4 sm:$0xff]   ;;  %v6754_v60 = vld [vmem:[%s8038_s9 + $0x7c0] ss:$16 sps:$4 sm:$0xff]  }
  0xbc   : > { %3637 = vmatprep.subr.bf16.mxu1 %v6681_v0  ;;  %v6759_v62 = vld [vmem:[%s8038_s9 + $0x5a4] ss:$16 sps:$4 sm:$0xff]   ;;  %v6757_v0 = vld [vmem:[%s8038_s9 + $0x5a0] ss:$16 sps:$4 sm:$0xff]  }
  0xbd   : > { %v6762_v63 = vld [vmem:[%s8038_s9 + $0x7a4] ss:$16 sps:$4 sm:$0xff]   ;;  %v6760_v2 = vld [vmem:[%s8038_s9 + $0x7a0] ss:$16 sps:$4 sm:$0xff]  }
  0xbe   : > { %3597 = vmatpush2.bf16.msra.mxu0 %v6683_v3  ;;  %v6765_v3 = vld [vmem:[%s8038_s9 + $0x584] ss:$16 sps:$4 sm:$0xff]  }
  0xbf   : > { %3638 = vmatpush2.bf16.msra.mxu1 %v6684_v4  ;;  %3598 = vmatprep.subr.bf16.mxu0 %v6685_v5  ;;  %v6768_v4 = vld [vmem:[%s8038_s9 + $0x784] ss:$16 sps:$4 sm:$0xff]   ;;  %v6763_v5 = vld [vmem:[%s8038_s9 + $0x580] ss:$16 sps:$4 sm:$0xff]  }
  0xc0   : > { %3639 = vmatprep.subr.bf16.mxu1 %v6687_v6  ;;  %v6766_v6 = vld [vmem:[%s8038_s9 + $0x780] ss:$16 sps:$4 sm:$0xff]   ;;  %v6777_v12 = vld [vmem:[%s8038_s9 + $0x544] ss:$16 sps:$4 sm:$0xff]  }
  0xc2   : > { %3599 = vmatpush2.bf16.msra.mxu0 %v6689_v8  ;;  %v6771_v8 = vld [vmem:[%s8038_s9 + $0x564] ss:$16 sps:$4 sm:$0xff]  }
  0xc3   : > { %3640 = vmatpush2.bf16.msra.mxu1 %v6690_v9  ;;  %3600 = vmatprep.subr.bf16.mxu0 %v6691_v10  ;;  %v6774_v9 = vld [vmem:[%s8038_s9 + $0x764] ss:$16 sps:$4 sm:$0xff]   ;;  %v6769_v10 = vld [vmem:[%s8038_s9 + $0x560] ss:$16 sps:$4 sm:$0xff]  }
  0xc4   : > { %3641 = vmatprep.subr.bf16.mxu1 %v6693_v11  ;;  %v6772_v11 = vld [vmem:[%s8038_s9 + $0x760] ss:$16 sps:$4 sm:$0xff]  }
  0xc6   : > { %3601 = vmatpush2.bf16.msra.mxu0 %v6695_v13  ;;  %v6780_v13 = vld [vmem:[%s8038_s9 + $0x744] ss:$16 sps:$4 sm:$0xff]  }
  0xc7   : > { %3642 = vmatpush2.bf16.msra.mxu1 %v6696_v15  ;;  %3652 = vmatprep.subr.bf16.mxu0 %v6699_v16  ;;  %v6775_v15 = vld [vmem:[%s8038_s9 + $0x540] ss:$16 sps:$4 sm:$0xff]  }
  0xc8   : > { %3693 = vmatprep.subr.bf16.mxu1 %v6702_v17  ;;  %v6778_v16 = vld [vmem:[%s8038_s9 + $0x740] ss:$16 sps:$4 sm:$0xff]   ;;  %v6783_v17 = vld [vmem:[%s8038_s9 + $0x524] ss:$16 sps:$4 sm:$0xff]  }
  0xc9   : > { %3603 = vmatmul.mubr.bf16.vlgmr.msra.gmra.mxu0 %v8149_v14 }
  0xca   : > { %3644 = vmatmul.mubr.bf16.vlgmr.msra.gmra.mxu1 %v8159_v19  ;;  %3653 = vmatpush1.bf16.msra.mxu0 %v6697_v20  ;;  %v6786_v20 = vld [vmem:[%s8038_s9 + $0x724] ss:$16 sps:$4 sm:$0xff]  }
  0xcb   : > { %3694 = vmatpush1.bf16.msra.mxu1 %v6700_v21  ;;  %3654 = vmatprep.subr.bf16.mxu0 %v6705_v22  ;;  %v6781_v21 = vld [vmem:[%s8038_s9 + $0x520] ss:$16 sps:$4 sm:$0xff]  }
  0xcc   : > { %3695 = vmatprep.subr.bf16.mxu1 %v6708_v23  ;;  %3684 = vmatprep.mubr.bf16.mxu0 %v8155_v18  ;;  %v6784_v22 = vld [vmem:[%s8038_s9 + $0x720] ss:$16 sps:$4 sm:$0xff]   ;;  %v6789_v23 = vld [vmem:[%s8038_s9 + $0x504] ss:$16 sps:$4 sm:$0xff]  }
  0xcd   : > { %3725 = vmatprep.mubr.bf16.mxu1 %v8167_v24 }
  0xce   : > { %3655 = vmatpush1.bf16.msra.mxu0 %v6703_v25  ;;  %v6792_v25 = vld [vmem:[%s8038_s9 + $0x704] ss:$16 sps:$4 sm:$0xff]  }
  0xcf   : > { %3696 = vmatpush1.bf16.msra.mxu1 %v6706_v26  ;;  %3656 = vmatprep.subr.bf16.mxu0 %v6711_v27  ;;  %v6787_v26 = vld [vmem:[%s8038_s9 + $0x500] ss:$16 sps:$4 sm:$0xff]   ;;  %v8232_v27 = vrot.slane %v8139_v7, %v8111_v50 }
  0xd0   : > { %3697 = vmatprep.subr.bf16.mxu1 %v6714_v28  ;;  %v6790_v28 = vld [vmem:[%s8038_s9 + $0x700] ss:$16 sps:$4 sm:$0xff]  }
  0xd1   : > { %v6797_v7 = vld [vmem:[%s8038_s9 + $0xae0] ss:$16 sps:$4 sm:$0xff]  }
  0xd2   : > { %3657 = vmatpush1.bf16.msra.mxu0 %v6709_v29  ;;  %v6796_v29 = vld [vmem:[%s8038_s9 + $0x8e4] ss:$16 sps:$4 sm:$0xff]  }
  0xd3   : > { %3698 = vmatpush1.bf16.msra.mxu1 %v6712_v30  ;;  %3658 = vmatprep.subr.bf16.mxu0 %v6717_v31  ;;  %v6799_v30 = vld [vmem:[%s8038_s9 + $0xae4] ss:$16 sps:$4 sm:$0xff]   ;;  %v8239_v31 = vcombine.high %v8232_v27, %v8232_v27 }
  0xd4   : > { %3699 = vmatprep.subr.bf16.mxu1 %v6720_v32  ;;  %v6794_v32 = vld [vmem:[%s8038_s9 + $0x8e0] ss:$16 sps:$4 sm:$0xff]  }
  0xd6   : > { %3659 = vmatpush1.bf16.msra.mxu0 %v6715_v33  ;;  %v8244_v33 = vld [vmem:[%s8060_s11 + $0x8] sm:$0xff] }
  0xd7   : > { %3700 = vmatpush1.bf16.msra.mxu1 %v6718_v34  ;;  %3660 = vmatprep.subr.bf16.mxu0 %v6723_v35  ;;  %v6802_v34 = vld [vmem:[%s8038_s9 + $0x8c4] ss:$16 sps:$4 sm:$0xff]  }
  0xd8   : > { %3701 = vmatprep.subr.bf16.mxu1 %v6726_v36  ;;  %v6805_v35 = vld [vmem:[%s8038_s9 + $0xac4] ss:$16 sps:$4 sm:$0xff]   ;;  %v8250_v36 = vrot.slane %v8244_v33, %v8111_v50 }
  0xda   : > { %3661 = vmatpush1.bf16.msra.mxu0 %v6721_v37  ;;  %v960_v37 = vcombine.high %v8250_v36, %v8250_v36 }
  0xdb   : > { %3702 = vmatpush1.bf16.msra.mxu1 %v6724_v38  ;;  %3662 = vmatprep.subr.bf16.mxu0 %v6729_v39  ;;  %v6800_v38 = vld [vmem:[%s8038_s9 + $0x8c0] ss:$16 sps:$4 sm:$0xff]  }
  0xdc   : > { %3703 = vmatprep.subr.bf16.mxu1 %v6732_v40  ;;  %v6803_v39 = vld [vmem:[%s8038_s9 + $0xac0] ss:$16 sps:$4 sm:$0xff]   ;;  %v6808_v40 = vld [vmem:[%s8038_s9 + $0x8a4] ss:$16 sps:$4 sm:$0xff]  }
  0xde   : > { %3663 = vmatpush1.bf16.msra.mxu0 %v6727_v41  ;;  %v6811_v41 = vld [vmem:[%s8038_s9 + $0xaa4] ss:$16 sps:$4 sm:$0xff]  }
  0xdf   : > { %3704 = vmatpush1.bf16.msra.mxu1 %v6730_v42  ;;  %3664 = vmatprep.subr.bf16.mxu0 %v6735_v43  ;;  %v8261_v42 = vrot.slane %v960_v37, %v8111_v50  ;;  %v6872_v37 = vld [vmem:[%s8038_s9 + $0x940] ss:$16 sps:$4 sm:$0xff]  }
  0xe0   : > { %3705 = vmatprep.subr.bf16.mxu1 %v6738_v45  ;;  %v6806_v45 = vld [vmem:[%s8038_s9 + $0x8a0] ss:$16 sps:$4 sm:$0xff]  }
  0xe1   : > { %v8266_v43 = vcombine.high %v8261_v42, %v8261_v42 }
  0xe2   : > { %3665 = vmatpush1.bf16.msra.mxu0 %v6733_v46  ;;  %v6809_v46 = vld [vmem:[%s8038_s9 + $0xaa0] ss:$16 sps:$4 sm:$0xff]  }
  0xe3   : > { %3706 = vmatpush1.bf16.msra.mxu1 %v6736_v47  ;;  %3666 = vmatprep.subr.bf16.mxu0 %v6741_v48  ;;  %v6814_v47 = vld [vmem:[%s8038_s9 + $0x884] ss:$16 sps:$4 sm:$0xff]  }
  0xe4   : > { %3707 = vmatprep.subr.bf16.mxu1 %v6744_v49  ;;  %v6817_v48 = vld [vmem:[%s8038_s9 + $0xa84] ss:$16 sps:$4 sm:$0xff]   ;;  %v6812_v49 = vld [vmem:[%s8038_s9 + $0x880] ss:$16 sps:$4 sm:$0xff]  }
  0xe6   : > { %3667 = vmatpush1.bf16.msra.mxu0 %v6739_v51  ;;  %v6815_v51 = vld [vmem:[%s8038_s9 + $0xa80] ss:$16 sps:$4 sm:$0xff]  }
  0xe7   : > { %3708 = vmatpush1.bf16.msra.mxu1 %v6742_v52  ;;  %3668 = vmatprep.subr.bf16.mxu0 %v6747_v53  ;;  %v6820_v52 = vld [vmem:[%s8038_s9 + $0x864] ss:$16 sps:$4 sm:$0xff]  }
  0xe8   : > { %3709 = vmatprep.subr.bf16.mxu1 %v6750_v54  ;;  %v6823_v53 = vld [vmem:[%s8038_s9 + $0xa64] ss:$16 sps:$4 sm:$0xff]   ;;  %v6818_v54 = vld [vmem:[%s8038_s9 + $0x860] ss:$16 sps:$4 sm:$0xff]  }
  0xea   : > { %3669 = vmatpush2.bf16.msra.mxu0 %v6745_v55  ;;  %v6821_v55 = vld [vmem:[%s8038_s9 + $0xa60] ss:$16 sps:$4 sm:$0xff]  }
  0xeb   : > { %3710 = vmatpush2.bf16.msra.mxu1 %v6748_v56  ;;  %3670 = vmatprep.subr.bf16.mxu0 %v6753_v57  ;;  %v6826_v56 = vld [vmem:[%s8038_s9 + $0x844] ss:$16 sps:$4 sm:$0xff]  }
  0xec   : > { %3711 = vmatprep.subr.bf16.mxu1 %v6756_v58  ;;  %v6829_v57 = vld [vmem:[%s8038_s9 + $0xa44] ss:$16 sps:$4 sm:$0xff]   ;;  %v6824_v58 = vld [vmem:[%s8038_s9 + $0x840] ss:$16 sps:$4 sm:$0xff]  }
  0xee   : > { %3671 = vmatpush2.bf16.msra.mxu0 %v6751_v59  ;;  %v6827_v59 = vld [vmem:[%s8038_s9 + $0xa40] ss:$16 sps:$4 sm:$0xff]  }
  0xef   : > { %3712 = vmatpush2.bf16.msra.mxu1 %v6754_v60  ;;  %3672 = vmatprep.subr.bf16.mxu0 %v6759_v62  ;;  %v6832_v60 = vld [vmem:[%s8038_s9 + $0x824] ss:$16 sps:$4 sm:$0xff]  }
  0xf0   : > { %3713 = vmatprep.subr.bf16.mxu1 %v6762_v63  ;;  %v6835_v62 = vld [vmem:[%s8038_s9 + $0xa24] ss:$16 sps:$4 sm:$0xff]   ;;  %v6830_v63 = vld [vmem:[%s8038_s9 + $0x820] ss:$16 sps:$4 sm:$0xff]  }
  0xf2   : > { %3673 = vmatpush2.bf16.msra.mxu0 %v6757_v0  ;;  %v6833_v0 = vld [vmem:[%s8038_s9 + $0xa20] ss:$16 sps:$4 sm:$0xff]  }
  0xf3   : > { %3714 = vmatpush2.bf16.msra.mxu1 %v6760_v2  ;;  %3674 = vmatprep.subr.bf16.mxu0 %v6765_v3  ;;  %v6838_v2 = vld [vmem:[%s8038_s9 + $0x804] ss:$16 sps:$4 sm:$0xff]  }
  0xf4   : > { %3715 = vmatprep.subr.bf16.mxu1 %v6768_v4  ;;  %v6841_v3 = vld [vmem:[%s8038_s9 + $0xa04] ss:$16 sps:$4 sm:$0xff]   ;;  %v6836_v4 = vld [vmem:[%s8038_s9 + $0x800] ss:$16 sps:$4 sm:$0xff]  }
  0xf6   : > { %3675 = vmatpush2.bf16.msra.mxu0 %v6763_v5  ;;  %v6839_v5 = vld [vmem:[%s8038_s9 + $0xa00] ss:$16 sps:$4 sm:$0xff]  }
  0xf7   : > { %3716 = vmatpush2.bf16.msra.mxu1 %v6766_v6  ;;  %3676 = vmatprep.subr.bf16.mxu0 %v6771_v8  ;;  %v6844_v6 = vld [vmem:[%s8038_s9 + $0x9e4] ss:$16 sps:$4 sm:$0xff]  }
  0xf8   : > { %3717 = vmatprep.subr.bf16.mxu1 %v6774_v9  ;;  %v6847_v8 = vld [vmem:[%s8038_s9 + $0xbe4] ss:$16 sps:$4 sm:$0xff]   ;;  %v6842_v9 = vld [vmem:[%s8038_s9 + $0x9e0] ss:$16 sps:$4 sm:$0xff]  }
  0xfa   : > { %3677 = vmatpush2.bf16.msra.mxu0 %v6769_v10  ;;  %v6845_v10 = vld [vmem:[%s8038_s9 + $0xbe0] ss:$16 sps:$4 sm:$0xff]  }
  0xfb   : > { %3718 = vmatpush2.bf16.msra.mxu1 %v6772_v11  ;;  %3678 = vmatprep.subr.bf16.mxu0 %v6777_v12  ;;  %v6850_v11 = vld [vmem:[%s8038_s9 + $0x9c4] ss:$16 sps:$4 sm:$0xff]  }
  0xfc   : > { %3719 = vmatprep.subr.bf16.mxu1 %v6780_v13  ;;  %v6853_v12 = vld [vmem:[%s8038_s9 + $0xbc4] ss:$16 sps:$4 sm:$0xff]   ;;  %v6848_v13 = vld [vmem:[%s8038_s9 + $0x9c0] ss:$16 sps:$4 sm:$0xff]  }
  0xfe   : > { %3679 = vmatpush2.bf16.msra.mxu0 %v6775_v15  ;;  %v6851_v15 = vld [vmem:[%s8038_s9 + $0xbc0] ss:$16 sps:$4 sm:$0xff]  }
  0xff   : > { %3720 = vmatpush2.bf16.msra.mxu1 %v6778_v16  ;;  %3680 = vmatprep.subr.bf16.mxu0 %v6783_v17  ;;  %v6856_v16 = vld [vmem:[%s8038_s9 + $0x9a4] ss:$16 sps:$4 sm:$0xff]  }
 0x100   : > { %3721 = vmatprep.subr.bf16.mxu1 %v6786_v20  ;;  %v6859_v17 = vld [vmem:[%s8038_s9 + $0xba4] ss:$16 sps:$4 sm:$0xff]   ;;  %v6854_v20 = vld [vmem:[%s8038_s9 + $0x9a0] ss:$16 sps:$4 sm:$0xff]  }
 0x102   : > { %3681 = vmatpush2.bf16.msra.mxu0 %v6781_v21  ;;  %v6857_v21 = vld [vmem:[%s8038_s9 + $0xba0] ss:$16 sps:$4 sm:$0xff]  }
 0x103   : > { %3722 = vmatpush2.bf16.msra.mxu1 %v6784_v22  ;;  %3682 = vmatprep.subr.bf16.mxu0 %v6789_v23  ;;  %v6862_v22 = vld [vmem:[%s8038_s9 + $0x984] ss:$16 sps:$4 sm:$0xff]  }
 0x104   : > { %3723 = vmatprep.subr.bf16.mxu1 %v6792_v25  ;;  %v6865_v23 = vld [vmem:[%s8038_s9 + $0xb84] ss:$16 sps:$4 sm:$0xff]   ;;  %v6860_v25 = vld [vmem:[%s8038_s9 + $0x980] ss:$16 sps:$4 sm:$0xff]  }
 0x106   : > { %3683 = vmatpush2.bf16.msra.mxu0 %v6787_v26  ;;  %v6863_v26 = vld [vmem:[%s8038_s9 + $0xb80] ss:$16 sps:$4 sm:$0xff]  }
 0x107   : > { %3724 = vmatpush2.bf16.msra.mxu1 %v6790_v28  ;;  %3734 = vmatprep.subr.bf16.mxu0 %v6796_v29  ;;  %v6868_v28 = vld [vmem:[%s8038_s9 + $0x964] ss:$16 sps:$4 sm:$0xff]  }
 0x108   : > { %3775 = vmatprep.subr.bf16.mxu1 %v6799_v30  ;;  %v6871_v29 = vld [vmem:[%s8038_s9 + $0xb64] ss:$16 sps:$4 sm:$0xff]   ;;  %v6866_v30 = vld [vmem:[%s8038_s9 + $0x960] ss:$16 sps:$4 sm:$0xff]  }
 0x109   : > { %3685 = vmatmul.mubr.bf16.vlgmr.msra.gmra.mxu0 %v8232_v27 }
 0x10a   : > { %3726 = vmatmul.mubr.bf16.vlgmr.msra.gmra.mxu1 %v8239_v31  ;;  %3735 = vmatpush1.bf16.msra.mxu0 %v6794_v32  ;;  %v6869_v32 = vld [vmem:[%s8038_s9 + $0xb60] ss:$16 sps:$4 sm:$0xff]  }
 0x10b   : > { %3776 = vmatpush1.bf16.msra.mxu1 %v6797_v7  ;;  %3736 = vmatprep.subr.bf16.mxu0 %v6802_v34  ;;  %v6874_v7 = vld [vmem:[%s8038_s9 + $0x944] ss:$16 sps:$4 sm:$0xff]  }
 0x10c   : > { %3777 = vmatprep.subr.bf16.mxu1 %v6805_v35  ;;  %3766 = vmatprep.mubr.bf16.mxu0 %v8261_v42  ;;  %v6877_v34 = vld [vmem:[%s8038_s9 + $0xb44] ss:$16 sps:$4 sm:$0xff]   ;;  %v945_v35 = vcombine.high %v8244_v33, %v8244_v33  ;;  %v6878_v33 = vld [vmem:[%s8038_s9 + $0x920] ss:$16 sps:$4 sm:$0xff]  }
 0x10d   : > { %3807 = vmatprep.mubr.bf16.mxu1 %v8266_v43 }
 0x10e   : > { %3737 = vmatpush1.bf16.msra.mxu0 %v6800_v38  ;;  %v6875_v38 = vld [vmem:[%s8038_s9 + $0xb40] ss:$16 sps:$4 sm:$0xff]  }
 0x10f   : > { %3778 = vmatpush1.bf16.msra.mxu1 %v6803_v39  ;;  %3738 = vmatprep.subr.bf16.mxu0 %v6808_v40  ;;  %v6880_v39 = vld [vmem:[%s8038_s9 + $0x924] ss:$16 sps:$4 sm:$0xff]  }
 0x110   : > { %3779 = vmatprep.subr.bf16.mxu1 %v6811_v41  ;;  %v6883_v40 = vld [vmem:[%s8038_s9 + $0xb24] ss:$16 sps:$4 sm:$0xff]   ;;  %v8320_v41 = vrot.slane %v945_v35, %v8111_v50  ;;  %v6941_v35 = vld [vmem:[%s8038_s9 + $0xfe0] ss:$16 sps:$4 sm:$0xff]  }
 0x112   : > { %3739 = vmatpush1.bf16.msra.mxu0 %v6806_v45  ;;  %v6881_v45 = vld [vmem:[%s8038_s9 + $0xb20] ss:$16 sps:$4 sm:$0xff]  }
 0x113   : > { %3780 = vmatpush1.bf16.msra.mxu1 %v6809_v46  ;;  %3740 = vmatprep.subr.bf16.mxu0 %v6814_v47  ;;  %v6886_v46 = vld [vmem:[%s8038_s9 + $0x904] ss:$16 sps:$4 sm:$0xff]  }
 0x114   : > { %3781 = vmatprep.subr.bf16.mxu1 %v6817_v48  ;;  %v6889_v47 = vld [vmem:[%s8038_s9 + $0xb04] ss:$16 sps:$4 sm:$0xff]   ;;  %v961_v48 = vcombine.high %v8320_v41, %v8320_v41 }
 0x116   : > { %3741 = vmatpush1.bf16.msra.mxu0 %v6812_v49  ;;  %v8330_v49 = vrot.slane %v8250_v36, %v8111_v50  ;;  %v6890_v36 = vld [vmem:[%s8038_s9 + $0xce0] ss:$16 sps:$4 sm:$0xff]  }
 0x117   : > { %3782 = vmatpush1.bf16.msra.mxu1 %v6815_v51  ;;  %3742 = vmatprep.subr.bf16.mxu0 %v6820_v52  ;;  %v6884_v51 = vld [vmem:[%s8038_s9 + $0x900] ss:$16 sps:$4 sm:$0xff]  }
 0x118   : > { %3783 = vmatprep.subr.bf16.mxu1 %v6823_v53  ;;  %v6887_v52 = vld [vmem:[%s8038_s9 + $0xb00] ss:$16 sps:$4 sm:$0xff]   ;;  %v6892_v53 = vld [vmem:[%s8038_s9 + $0xce4] ss:$16 sps:$4 sm:$0xff]  }
 0x11a   : > { %3743 = vmatpush1.bf16.msra.mxu0 %v6818_v54  ;;  %v6895_v54 = vld [vmem:[%s8038_s9 + $0xee4] ss:$16 sps:$4 sm:$0xff]  }
 0x11b   : > { %3784 = vmatpush1.bf16.msra.mxu1 %v6821_v55  ;;  %3744 = vmatprep.subr.bf16.mxu0 %v6826_v56  ;;  %v8337_v55 = vrot.slane %v961_v48, %v8111_v50  ;;  %v8341_v56 = vcombine.high %v8330_v49, %v8330_v49  ;;  %v6958_v48 = vld [vmem:[%s8038_s9 + $0xd84] ss:$16 sps:$4 sm:$0xff]  }
 0x11c   : > { %3785 = vmatprep.subr.bf16.mxu1 %v6829_v57  ;;  %v6893_v57 = vld [vmem:[%s8038_s9 + $0xee0] ss:$16 sps:$4 sm:$0xff]  }
 0x11e   : > { %3745 = vmatpush1.bf16.msra.mxu0 %v6824_v58  ;;  %v6898_v58 = vld [vmem:[%s8038_s9 + $0xcc4] ss:$16 sps:$4 sm:$0xff]  }
 0x11f   : > { %3786 = vmatpush1.bf16.msra.mxu1 %v6827_v59  ;;  %3746 = vmatprep.subr.bf16.mxu0 %v6832_v60  ;;  %v6901_v59 = vld [vmem:[%s8038_s9 + $0xec4] ss:$16 sps:$4 sm:$0xff]   ;;  %v8349_v60 = vcombine.high %v8337_v55, %v8337_v55 }
 0x120   : > { %3787 = vmatprep.subr.bf16.mxu1 %v6835_v62  ;;  %v6896_v62 = vld [vmem:[%s8038_s9 + $0xcc0] ss:$16 sps:$4 sm:$0xff]  }
 0x122   : > { %3747 = vmatpush1.bf16.msra.mxu0 %v6830_v63  ;;  %v6899_v63 = vld [vmem:[%s8038_s9 + $0xec0] ss:$16 sps:$4 sm:$0xff]  }
 0x123   : > { %3788 = vmatpush1.bf16.msra.mxu1 %v6833_v0  ;;  %3748 = vmatprep.subr.bf16.mxu0 %v6838_v2  ;;  %v6904_v0 = vld [vmem:[%s8038_s9 + $0xca4] ss:$16 sps:$4 sm:$0xff]  }
 0x124   : > { %3789 = vmatprep.subr.bf16.mxu1 %v6841_v3  ;;  %v6907_v2 = vld [vmem:[%s8038_s9 + $0xea4] ss:$16 sps:$4 sm:$0xff]   ;;  %v6902_v3 = vld [vmem:[%s8038_s9 + $0xca0] ss:$16 sps:$4 sm:$0xff]  }
 0x126   : > { %3749 = vmatpush1.bf16.msra.mxu0 %v6836_v4  ;;  %v6905_v4 = vld [vmem:[%s8038_s9 + $0xea0] ss:$16 sps:$4 sm:$0xff]  }
 0x127   : > { %3790 = vmatpush1.bf16.msra.mxu1 %v6839_v5  ;;  %3750 = vmatprep.subr.bf16.mxu0 %v6844_v6  ;;  %v6910_v5 = vld [vmem:[%s8038_s9 + $0xc84] ss:$16 sps:$4 sm:$0xff]  }
 0x128   : > { %3791 = vmatprep.subr.bf16.mxu1 %v6847_v8  ;;  %v6913_v6 = vld [vmem:[%s8038_s9 + $0xe84] ss:$16 sps:$4 sm:$0xff]   ;;  %v6908_v8 = vld [vmem:[%s8038_s9 + $0xc80] ss:$16 sps:$4 sm:$0xff]  }
 0x12a   : > { %3751 = vmatpush2.bf16.msra.mxu0 %v6842_v9  ;;  %v6911_v9 = vld [vmem:[%s8038_s9 + $0xe80] ss:$16 sps:$4 sm:$0xff]  }
 0x12b   : > { %3792 = vmatpush2.bf16.msra.mxu1 %v6845_v10  ;;  %3752 = vmatprep.subr.bf16.mxu0 %v6850_v11  ;;  %v6916_v10 = vld [vmem:[%s8038_s9 + $0xc64] ss:$16 sps:$4 sm:$0xff]  }
 0x12c   : > { %3793 = vmatprep.subr.bf16.mxu1 %v6853_v12  ;;  %v6919_v11 = vld [vmem:[%s8038_s9 + $0xe64] ss:$16 sps:$4 sm:$0xff]   ;;  %v6914_v12 = vld [vmem:[%s8038_s9 + $0xc60] ss:$16 sps:$4 sm:$0xff]  }
 0x12e   : > { %3753 = vmatpush2.bf16.msra.mxu0 %v6848_v13  ;;  %v6917_v13 = vld [vmem:[%s8038_s9 + $0xe60] ss:$16 sps:$4 sm:$0xff]  }
 0x12f   : > { %3794 = vmatpush2.bf16.msra.mxu1 %v6851_v15  ;;  %3754 = vmatprep.subr.bf16.mxu0 %v6856_v16  ;;  %v6922_v15 = vld [vmem:[%s8038_s9 + $0xc44] ss:$16 sps:$4 sm:$0xff]  }
 0x130   : > { %3795 = vmatprep.subr.bf16.mxu1 %v6859_v17  ;;  %v6925_v16 = vld [vmem:[%s8038_s9 + $0xe44] ss:$16 sps:$4 sm:$0xff]   ;;  %v6920_v17 = vld [vmem:[%s8038_s9 + $0xc40] ss:$16 sps:$4 sm:$0xff]  }
 0x132   : > { %3755 = vmatpush2.bf16.msra.mxu0 %v6854_v20  ;;  %v6923_v20 = vld [vmem:[%s8038_s9 + $0xe40] ss:$16 sps:$4 sm:$0xff]  }
 0x133   : > { %3796 = vmatpush2.bf16.msra.mxu1 %v6857_v21  ;;  %3756 = vmatprep.subr.bf16.mxu0 %v6862_v22  ;;  %v6928_v21 = vld [vmem:[%s8038_s9 + $0xc24] ss:$16 sps:$4 sm:$0xff]  }
 0x134   : > { %3797 = vmatprep.subr.bf16.mxu1 %v6865_v23  ;;  %v6931_v22 = vld [vmem:[%s8038_s9 + $0xe24] ss:$16 sps:$4 sm:$0xff]   ;;  %v6926_v23 = vld [vmem:[%s8038_s9 + $0xc20] ss:$16 sps:$4 sm:$0xff]  }
 0x136   : > { %3757 = vmatpush2.bf16.msra.mxu0 %v6860_v25  ;;  %v6929_v25 = vld [vmem:[%s8038_s9 + $0xe20] ss:$16 sps:$4 sm:$0xff]  }
 0x137   : > { %3798 = vmatpush2.bf16.msra.mxu1 %v6863_v26  ;;  %3758 = vmatprep.subr.bf16.mxu0 %v6868_v28  ;;  %v6934_v26 = vld [vmem:[%s8038_s9 + $0xc04] ss:$16 sps:$4 sm:$0xff]  }
 0x138   : > { %3799 = vmatprep.subr.bf16.mxu1 %v6871_v29  ;;  %v6937_v28 = vld [vmem:[%s8038_s9 + $0xe04] ss:$16 sps:$4 sm:$0xff]   ;;  %v6932_v29 = vld [vmem:[%s8038_s9 + $0xc00] ss:$16 sps:$4 sm:$0xff]  }
 0x13a   : > { %3759 = vmatpush2.bf16.msra.mxu0 %v6866_v30  ;;  %v6935_v30 = vld [vmem:[%s8038_s9 + $0xe00] ss:$16 sps:$4 sm:$0xff]  }
 0x13b   : > { %3800 = vmatpush2.bf16.msra.mxu1 %v6869_v32  ;;  %3760 = vmatprep.subr.bf16.mxu0 %v6874_v7  ;;  %v6940_v32 = vld [vmem:[%s8038_s9 + $0xde4] ss:$16 sps:$4 sm:$0xff]  }
 0x13c   : > { %3801 = vmatprep.subr.bf16.mxu1 %v6877_v34  ;;  %v6943_v7 = vld [vmem:[%s8038_s9 + $0xfe4] ss:$16 sps:$4 sm:$0xff]   ;;  %v6938_v34 = vld [vmem:[%s8038_s9 + $0xde0] ss:$16 sps:$4 sm:$0xff]  }
 0x13e   : > { %3761 = vmatpush2.bf16.msra.mxu0 %v6872_v37  ;;  %v6946_v37 = vld [vmem:[%s8038_s9 + $0xdc4] ss:$16 sps:$4 sm:$0xff]  }
 0x13f   : > { %3802 = vmatpush2.bf16.msra.mxu1 %v6875_v38  ;;  %3762 = vmatprep.subr.bf16.mxu0 %v6880_v39  ;;  %v6949_v38 = vld [vmem:[%s8038_s9 + $0xfc4] ss:$16 sps:$4 sm:$0xff]   ;;  %v6944_v39 = vld [vmem:[%s8038_s9 + $0xdc0] ss:$16 sps:$4 sm:$0xff]  }
 0x140   : > { %3803 = vmatprep.subr.bf16.mxu1 %v6883_v40  ;;  %v6947_v40 = vld [vmem:[%s8038_s9 + $0xfc0] ss:$16 sps:$4 sm:$0xff]  }
 0x142   : > { %3763 = vmatpush2.bf16.msra.mxu0 %v6878_v33  ;;  %v6952_v33 = vld [vmem:[%s8038_s9 + $0xda4] ss:$16 sps:$4 sm:$0xff]  }
 0x143   : > { %3804 = vmatpush2.bf16.msra.mxu1 %v6881_v45  ;;  %3764 = vmatprep.subr.bf16.mxu0 %v6886_v46  ;;  %v6955_v45 = vld [vmem:[%s8038_s9 + $0xfa4] ss:$16 sps:$4 sm:$0xff]   ;;  %v6950_v46 = vld [vmem:[%s8038_s9 + $0xda0] ss:$16 sps:$4 sm:$0xff]  }
 0x144   : > { %3805 = vmatprep.subr.bf16.mxu1 %v6889_v47  ;;  %v6953_v47 = vld [vmem:[%s8038_s9 + $0xfa0] ss:$16 sps:$4 sm:$0xff]  }
 0x146   : > { %3765 = vmatpush2.bf16.msra.mxu0 %v6884_v51  ;;  %v6961_v51 = vld [vmem:[%s8038_s9 + $0xf84] ss:$16 sps:$4 sm:$0xff]  }
 0x147   : > { %3806 = vmatpush2.bf16.msra.mxu1 %v6887_v52  ;;  %3816 = vmatprep.subr.bf16.mxu0 %v6892_v53  ;;  %v6956_v52 = vld [vmem:[%s8038_s9 + $0xd80] ss:$16 sps:$4 sm:$0xff]  }
 0x148   : > { %3857 = vmatprep.subr.bf16.mxu1 %v6895_v54  ;;  %v6959_v53 = vld [vmem:[%s8038_s9 + $0xf80] ss:$16 sps:$4 sm:$0xff]   ;;  %v6964_v54 = vld [vmem:[%s8038_s9 + $0xd64] ss:$16 sps:$4 sm:$0xff]  }
 0x149   : > { %3767 = vmatmul.mubr.bf16.vlgmr.msra.gmra.mxu0 %v8330_v49 }
 0x14a   : > { %3808 = vmatmul.mubr.bf16.vlgmr.msra.gmra.mxu1 %v8341_v56  ;;  %3817 = vmatpush1.bf16.msra.mxu0 %v6890_v36  ;;  %v6967_v36 = vld [vmem:[%s8038_s9 + $0xf64] ss:$16 sps:$4 sm:$0xff]  }
 0x14b   : > { %3858 = vmatpush1.bf16.msra.mxu1 %v6893_v57  ;;  %3818 = vmatprep.subr.bf16.mxu0 %v6898_v58  ;;  %v6962_v57 = vld [vmem:[%s8038_s9 + $0xd60] ss:$16 sps:$4 sm:$0xff]  }
 0x14c   : > { %3859 = vmatprep.subr.bf16.mxu1 %v6901_v59  ;;  %3848 = vmatprep.mubr.bf16.mxu0 %v8337_v55  ;;  %v6965_v58 = vld [vmem:[%s8038_s9 + $0xf60] ss:$16 sps:$4 sm:$0xff]   ;;  %v6970_v59 = vld [vmem:[%s8038_s9 + $0xd44] ss:$16 sps:$4 sm:$0xff]  }
 0x14d   : > { %3889 = vmatprep.mubr.bf16.mxu1 %v8349_v60 }
 0x14e   : > { %3819 = vmatpush1.bf16.msra.mxu0 %v6896_v62  ;;  %v6973_v62 = vld [vmem:[%s8038_s9 + $0xf44] ss:$16 sps:$4 sm:$0xff]  }
 0x14f   : > { %3860 = vmatpush1.bf16.msra.mxu1 %v6899_v63  ;;  %3820 = vmatprep.subr.bf16.mxu0 %v6904_v0  ;;  %v6968_v63 = vld [vmem:[%s8038_s9 + $0xd40] ss:$16 sps:$4 sm:$0xff]  }
 0x150   : > { %3861 = vmatprep.subr.bf16.mxu1 %v6907_v2  ;;  %v6971_v0 = vld [vmem:[%s8038_s9 + $0xf40] ss:$16 sps:$4 sm:$0xff]   ;;  %v6976_v2 = vld [vmem:[%s8038_s9 + $0xd24] ss:$16 sps:$4 sm:$0xff]  }
 0x152   : > { %3821 = vmatpush1.bf16.msra.mxu0 %v6902_v3  ;;  %v6979_v3 = vld [vmem:[%s8038_s9 + $0xf24] ss:$16 sps:$4 sm:$0xff]  }
 0x153   : > { %3862 = vmatpush1.bf16.msra.mxu1 %v6905_v4  ;;  %3822 = vmatprep.subr.bf16.mxu0 %v6910_v5  ;;  %v6974_v4 = vld [vmem:[%s8038_s9 + $0xd20] ss:$16 sps:$4 sm:$0xff]  }
 0x154   : > { %3863 = vmatprep.subr.bf16.mxu1 %v6913_v6  ;;  %v6977_v5 = vld [vmem:[%s8038_s9 + $0xf20] ss:$16 sps:$4 sm:$0xff]   ;;  %v6982_v6 = vld [vmem:[%s8038_s9 + $0xd04] ss:$16 sps:$4 sm:$0xff]  }
 0x156   : > { %3823 = vmatpush1.bf16.msra.mxu0 %v6908_v8  ;;  %v6985_v8 = vld [vmem:[%s8038_s9 + $0xf04] ss:$16 sps:$4 sm:$0xff]  }
 0x157   : > { %3864 = vmatpush1.bf16.msra.mxu1 %v6911_v9  ;;  %3824 = vmatprep.subr.bf16.mxu0 %v6916_v10  ;;  %v8413_v9 = vrot.slane %v8320_v41, %v8111_v50  ;;  %v6980_v10 = vld [vmem:[%s8038_s9 + $0xd00] ss:$16 sps:$4 sm:$0xff]   ;;  %v6990_v50 = vld [vmem:[%s8038_s9 + $0x2e8] ss:$16 sps:$4 sm:$0xff]   ;;  %v6995_v41 = vld [vmem:[%s8038_s9 + $0xcc] ss:$16 sps:$4 sm:$0xff]  }
 0x158   : > { %3865 = vmatprep.subr.bf16.mxu1 %v6919_v11  ;;  %v6983_v11 = vld [vmem:[%s8038_s9 + $0xf00] ss:$16 sps:$4 sm:$0xff]  }
 0x15a   : > { %3825 = vmatpush1.bf16.msra.mxu0 %v6914_v12  ;;  %v6989_v12 = vld [vmem:[%s8038_s9 + $0xec] ss:$16 sps:$4 sm:$0xff]  }
 0x15b   : > { %3866 = vmatpush1.bf16.msra.mxu1 %v6917_v13  ;;  %3826 = vmatprep.subr.bf16.mxu0 %v6922_v15  ;;  %v6992_v13 = vld [vmem:[%s8038_s9 + $0x2ec] ss:$16 sps:$4 sm:$0xff]   ;;  %v8421_v15 = vcombine.high %v8413_v9, %v8413_v9 }
 0x15c   : > { %3867 = vmatprep.subr.bf16.mxu1 %v6925_v16  ;;  %v6987_v16 = vld [vmem:[%s8038_s9 + $0xe8] ss:$16 sps:$4 sm:$0xff]  }
 0x15e   : > { %3827 = vmatpush1.bf16.msra.mxu0 %v6920_v17  ;;  %v6998_v17 = vld [vmem:[%s8038_s9 + $0x2cc] ss:$16 sps:$4 sm:$0xff]  }
 0x15f   : > { %3868 = vmatpush1.bf16.msra.mxu1 %v6923_v20  ;;  %3828 = vmatprep.subr.bf16.mxu0 %v6928_v21  ;;  %v6993_v20 = vld [vmem:[%s8038_s9 + $0xc8] ss:$16 sps:$4 sm:$0xff]  }
 0x160   : > { %3869 = vmatprep.subr.bf16.mxu1 %v6931_v22 }
 0x162   : > { %3829 = vmatpush1.bf16.msra.mxu0 %v6926_v23  ;;  %v6996_v23 = vld [vmem:[%s8038_s9 + $0x2c8] ss:$16 sps:$4 sm:$0xff]  }
 0x163   : > { %3870 = vmatpush1.bf16.msra.mxu1 %v6929_v25  ;;  %3830 = vmatprep.subr.bf16.mxu0 %v6934_v26 }
 0x164   : > { %3871 = vmatprep.subr.bf16.mxu1 %v6937_v28 }
 0x166   : > { %3831 = vmatpush1.bf16.msra.mxu0 %v6932_v29  ;;  %v7001_v29 = vld [vmem:[%s8038_s9 + $0xac] ss:$16 sps:$4 sm:$0xff]  }
 0x167   : > { %3872 = vmatpush1.bf16.msra.mxu1 %v6935_v30  ;;  %3832 = vmatprep.subr.bf16.mxu0 %v6940_v32  ;;  %v7004_v30 = vld [vmem:[%s8038_s9 + $0x2ac] ss:$16 sps:$4 sm:$0xff]  }
 0x168   : > { %3873 = vmatprep.subr.bf16.mxu1 %v6943_v7  ;;  %v6999_v7 = vld [vmem:[%s8038_s9 + $0xa8] ss:$16 sps:$4 sm:$0xff]  }
 0x16a   : > { %3833 = vmatpush2.bf16.msra.mxu0 %v6938_v34  ;;  %v7002_v34 = vld [vmem:[%s8038_s9 + $0x2a8] ss:$16 sps:$4 sm:$0xff]  }
 0x16b   : > { %3874 = vmatpush2.bf16.msra.mxu1 %v6941_v35  ;;  %3834 = vmatprep.subr.bf16.mxu0 %v6946_v37 }
 0x16c   : > { %3875 = vmatprep.subr.bf16.mxu1 %v6949_v38 }
 0x16e   : > { %3835 = vmatpush2.bf16.msra.mxu0 %v6944_v39 }
 0x16f   : > { %3876 = vmatpush2.bf16.msra.mxu1 %v6947_v40  ;;  %3836 = vmatprep.subr.bf16.mxu0 %v6952_v33  ;;  %v7007_v40 = vld [vmem:[%s8038_s9 + $0x8c] ss:$16 sps:$4 sm:$0xff]  }
 0x170   : > { %3877 = vmatprep.subr.bf16.mxu1 %v6955_v45  ;;  %v7010_v33 = vld [vmem:[%s8038_s9 + $0x28c] ss:$16 sps:$4 sm:$0xff]  }
 0x171   : > { %v7013_v45 = vld [vmem:[%s8038_s9 + $0x6c] ss:$16 sps:$4 sm:$0xff]  }
 0x172   : > { %3837 = vmatpush2.bf16.msra.mxu0 %v6950_v46  ;;  %v7016_v46 = vld [vmem:[%s8038_s9 + $0x26c] ss:$16 sps:$4 sm:$0xff]  }
 0x173   : > { %3878 = vmatpush2.bf16.msra.mxu1 %v6953_v47  ;;  %3838 = vmatprep.subr.bf16.mxu0 %v6958_v48  ;;  %v7011_v47 = vld [vmem:[%s8038_s9 + $0x68] ss:$16 sps:$4 sm:$0xff]  }
 0x174   : > { %3879 = vmatprep.subr.bf16.mxu1 %v6961_v51  ;;  %v7014_v48 = vld [vmem:[%s8038_s9 + $0x268] ss:$16 sps:$4 sm:$0xff]   ;;  %v7019_v51 = vld [vmem:[%s8038_s9 + $0x4c] ss:$16 sps:$4 sm:$0xff]  }
 0x176   : > { %3839 = vmatpush2.bf16.msra.mxu0 %v6956_v52  ;;  %v7022_v52 = vld [vmem:[%s8038_s9 + $0x24c] ss:$16 sps:$4 sm:$0xff]  }
 0x177   : > { %3880 = vmatpush2.bf16.msra.mxu1 %v6959_v53  ;;  %3840 = vmatprep.subr.bf16.mxu0 %v6964_v54  ;;  %v7017_v53 = vld [vmem:[%s8038_s9 + $0x48] ss:$16 sps:$4 sm:$0xff]  }
 0x178   : > { %3881 = vmatprep.subr.bf16.mxu1 %v6967_v36  ;;  %v7020_v54 = vld [vmem:[%s8038_s9 + $0x248] ss:$16 sps:$4 sm:$0xff]   ;;  %v7025_v36 = vld [vmem:[%s8038_s9 + $0x2c] ss:$16 sps:$4 sm:$0xff]  }
 0x17a   : > { %3841 = vmatpush2.bf16.msra.mxu0 %v6962_v57  ;;  %v7028_v57 = vld [vmem:[%s8038_s9 + $0x22c] ss:$16 sps:$4 sm:$0xff]  }
 0x17b   : > { %3882 = vmatpush2.bf16.msra.mxu1 %v6965_v58  ;;  %3842 = vmatprep.subr.bf16.mxu0 %v6970_v59  ;;  %v7023_v58 = vld [vmem:[%s8038_s9 + $0x28] ss:$16 sps:$4 sm:$0xff]  }
 0x17c   : > { %3883 = vmatprep.subr.bf16.mxu1 %v6973_v62  ;;  %v7026_v59 = vld [vmem:[%s8038_s9 + $0x228] ss:$16 sps:$4 sm:$0xff]   ;;  %v7031_v62 = vld [vmem:[%s8038_s9 + $0xc] ss:$16 sps:$4 sm:$0xff]  }
 0x17e   : > { %3843 = vmatpush2.bf16.msra.mxu0 %v6968_v63  ;;  %v7034_v63 = vld [vmem:[%s8038_s9 + $0x20c] ss:$16 sps:$4 sm:$0xff]  }
 0x17f   : > { %3884 = vmatpush2.bf16.msra.mxu1 %v6971_v0  ;;  %3844 = vmatprep.subr.bf16.mxu0 %v6976_v2  ;;  %v7029_v0 = vld [vmem:[%s8038_s9 + $0x8] ss:$16 sps:$4 sm:$0xff]  }
 0x180   : > { %3885 = vmatprep.subr.bf16.mxu1 %v6979_v3  ;;  %v7032_v2 = vld [vmem:[%s8038_s9 + $0x208] ss:$16 sps:$4 sm:$0xff]   ;;  %v7037_v3 = vld [vmem:[%s8038_s9 + $0x1ec] ss:$16 sps:$4 sm:$0xff]  }
 0x182   : > { %3845 = vmatpush2.bf16.msra.mxu0 %v6974_v4  ;;  %v7040_v4 = vld [vmem:[%s8038_s9 + $0x3ec] ss:$16 sps:$4 sm:$0xff]  }
 0x183   : > { %3886 = vmatpush2.bf16.msra.mxu1 %v6977_v5  ;;  %3846 = vmatprep.subr.bf16.mxu0 %v6982_v6  ;;  %v7035_v5 = vld [vmem:[%s8038_s9 + $0x1e8] ss:$16 sps:$4 sm:$0xff]  }
 0x184   : > { %3887 = vmatprep.subr.bf16.mxu1 %v6985_v8  ;;  %v7038_v6 = vld [vmem:[%s8038_s9 + $0x3e8] ss:$16 sps:$4 sm:$0xff]   ;;  %v7043_v8 = vld [vmem:[%s8038_s9 + $0x1cc] ss:$16 sps:$4 sm:$0xff]  }
 0x186   : > { %3847 = vmatpush2.bf16.msra.mxu0 %v6980_v10  ;;  %v7046_v10 = vld [vmem:[%s8038_s9 + $0x3cc] ss:$16 sps:$4 sm:$0xff]  }
 0x187   : > { %3888 = vmatpush2.bf16.msra.mxu1 %v6983_v11  ;;  %3898 = vmatprep.subr.bf16.mxu0 %v6989_v12  ;;  %v7041_v11 = vld [vmem:[%s8038_s9 + $0x1c8] ss:$16 sps:$4 sm:$0xff]  }
 0x188   : > { %3939 = vmatprep.subr.bf16.mxu1 %v6992_v13  ;;  %v7044_v12 = vld [vmem:[%s8038_s9 + $0x3c8] ss:$16 sps:$4 sm:$0xff]   ;;  %v7049_v13 = vld [vmem:[%s8038_s9 + $0x1ac] ss:$16 sps:$4 sm:$0xff]  }
 0x189   : > { %v3604_v21 = vpop.f32.mrf.mxu0  ;;  %3849 = vmatmul.mubr.bf16.vlgmr.msra.gmra.mxu0 %v8413_v9 }
 0x18a   : > { %v3645_v22 = vpop.f32.mrf.mxu1  ;;  %3890 = vmatmul.mubr.bf16.vlgmr.msra.gmra.mxu1 %v8421_v15  ;;  %3899 = vmatpush1.bf16.msra.mxu0 %v6987_v16  ;;  %v7052_v16 = vld [vmem:[%s8038_s9 + $0x3ac] ss:$16 sps:$4 sm:$0xff]  }
 0x18b   : > { %v8431_v25 = vadd.f32 %v3645_v22, %v3604_v21  ;;  %3940 = vmatpush1.bf16.msra.mxu1 %v6990_v50  ;;  %v3606_v26 = vpop.f32.mrf.mxu0  ;;  %3900 = vmatprep.subr.bf16.mxu0 %v6995_v41  ;;  %v7047_v50 = vld [vmem:[%s8038_s9 + $0x1a8] ss:$16 sps:$4 sm:$0xff]  }
 0x18c   : > { %v3647_v28 = vpop.f32.mrf.mxu1  ;;  %3941 = vmatprep.subr.bf16.mxu1 %v6998_v17  ;;  %3930 = vmatprep.mubr.bf16.mxu0 %v8123_v61  ;;  %v7005_v61 = vld [vmem:[%s8038_s9 + $0x88] ss:$16 sps:$4 sm:$0xff]   ;;  %v7055_v17 = vld [vmem:[%s8038_s9 + $0x18c] ss:$16 sps:$4 sm:$0xff]  }
 0x18d   : > { %v8435_v32 = vadd.f32 %v3647_v28, %v3606_v26  ;;  %3971 = vmatprep.mubr.bf16.mxu1 %v8130_v1  ;;  %v3608_v35 = vpop.f32.mrf.mxu0  ;;  %v7008_v1 = vld [vmem:[%s8038_s9 + $0x288] ss:$16 sps:$4 sm:$0xff]   ;;  %v7064_v26 = vld [vmem:[%s8038_s9 + $0x36c] ss:$16 sps:$4 sm:$0xff]  }
 0x18e   : > { %v3649_v37 = vpop.f32.mrf.mxu1  ;;  %3901 = vmatpush1.bf16.msra.mxu0 %v6993_v20  ;;  %v7050_v41 = vld [vmem:[%s8038_s9 + $0x3a8] ss:$16 sps:$4 sm:$0xff]   ;;  %v7058_v20 = vld [vmem:[%s8038_s9 + $0x38c] ss:$16 sps:$4 sm:$0xff]  }
 0x18f   : > { %3942 = vmatpush1.bf16.msra.mxu1 %v6996_v23  ;;  %v3609_v38 = vpop.f32.mrf.mxu0  ;;  %3902 = vmatprep.subr.bf16.mxu0 %v7001_v29  ;;  %v7053_v21 = vld [vmem:[%s8038_s9 + $0x188] ss:$16 sps:$4 sm:$0xff]   ;;  %v7061_v23 = vld [vmem:[%s8038_s9 + $0x16c] ss:$16 sps:$4 sm:$0xff]  }
 0x190   : > { %v3650_v39 = vpop.f32.mrf.mxu1  ;;  %3943 = vmatprep.subr.bf16.mxu1 %v7004_v30  ;;  %v7056_v22 = vld [vmem:[%s8038_s9 + $0x388] ss:$16 sps:$4 sm:$0xff]   ;;  %v7067_v30 = vld [vmem:[%s8038_s9 + $0x14c] ss:$16 sps:$4 sm:$0xff]  }
 0x191   : > { %v7059_v28 = vld [vmem:[%s8038_s9 + $0x168] ss:$16 sps:$4 sm:$0xff]   ;;  %v7073_v37 = vld [vmem:[%s8038_s9 + $0x12c] ss:$16 sps:$4 sm:$0xff]  }
 0x192   : > { %3903 = vmatpush1.bf16.msra.mxu0 %v6999_v7  ;;  %v7062_v29 = vld [vmem:[%s8038_s9 + $0x368] ss:$16 sps:$4 sm:$0xff]   ;;  %v7070_v7 = vld [vmem:[%s8038_s9 + $0x34c] ss:$16 sps:$4 sm:$0xff]  }
 0x193   : > { %3944 = vmatpush1.bf16.msra.mxu1 %v7002_v34  ;;  %3904 = vmatprep.subr.bf16.mxu0 %v7007_v40  ;;  %v7065_v34 = vld [vmem:[%s8038_s9 + $0x148] ss:$16 sps:$4 sm:$0xff]   ;;  %v7076_v38 = vld [vmem:[%s8038_s9 + $0x32c] ss:$16 sps:$4 sm:$0xff]  }
 0x194   : > { %3945 = vmatprep.subr.bf16.mxu1 %v7010_v33  ;;  %v7068_v35 = vld [vmem:[%s8038_s9 + $0x348] ss:$16 sps:$4 sm:$0xff]   ;;  %v7079_v33 = vld [vmem:[%s8038_s9 + $0x10c] ss:$16 sps:$4 sm:$0xff]  }
 0x195   : > { %v7071_v39 = vld [vmem:[%s8038_s9 + $0x128] ss:$16 sps:$4 sm:$0xff]  }
 0x196   : > { %3905 = vmatpush1.bf16.msra.mxu0 %v7005_v61  ;;  %v7074_v40 = vld [vmem:[%s8038_s9 + $0x328] ss:$16 sps:$4 sm:$0xff]   ;;  %v7082_v61 = vld [vmem:[%s8038_s9 + $0x30c] ss:$16 sps:$4 sm:$0xff]  }
 0x197   : > { %3946 = vmatpush1.bf16.msra.mxu1 %v7008_v1  ;;  %3906 = vmatprep.subr.bf16.mxu0 %v7013_v45  ;;  %v7077_v1 = vld [vmem:[%s8038_s9 + $0x108] ss:$16 sps:$4 sm:$0xff]  }
 0x198   : > { %3947 = vmatprep.subr.bf16.mxu1 %v7016_v46  ;;  %v7080_v45 = vld [vmem:[%s8038_s9 + $0x308] ss:$16 sps:$4 sm:$0xff]   ;;  %v7085_v46 = vld [vmem:[%s8038_s9 + $0x4ec] ss:$16 sps:$4 sm:$0xff]  }
 0x19a   : > { %3907 = vmatpush1.bf16.msra.mxu0 %v7011_v47  ;;  %v7088_v47 = vld [vmem:[%s8038_s9 + $0x6ec] ss:$16 sps:$4 sm:$0xff]  }
 0x19b   : > { %3948 = vmatpush1.bf16.msra.mxu1 %v7014_v48  ;;  %3908 = vmatprep.subr.bf16.mxu0 %v7019_v51  ;;  %v7083_v48 = vld [vmem:[%s8038_s9 + $0x4e8] ss:$16 sps:$4 sm:$0xff]  }
 0x19c   : > { %3949 = vmatprep.subr.bf16.mxu1 %v7022_v52  ;;  %v7086_v51 = vld [vmem:[%s8038_s9 + $0x6e8] ss:$16 sps:$4 sm:$0xff]   ;;  %v7091_v52 = vld [vmem:[%s8038_s9 + $0x4cc] ss:$16 sps:$4 sm:$0xff]  }
 0x19e   : > { %3909 = vmatpush1.bf16.msra.mxu0 %v7017_v53  ;;  %v7094_v53 = vld [vmem:[%s8038_s9 + $0x6cc] ss:$16 sps:$4 sm:$0xff]  }
 0x19f   : > { %3950 = vmatpush1.bf16.msra.mxu1 %v7020_v54  ;;  %3910 = vmatprep.subr.bf16.mxu0 %v7025_v36 }
 0x1a0   : > { %3951 = vmatprep.subr.bf16.mxu1 %v7028_v57 }
 0x1a2   : > { %3911 = vmatpush1.bf16.msra.mxu0 %v7023_v58  ;;  %v7089_v58 = vld [vmem:[%s8038_s9 + $0x4c8] ss:$16 sps:$4 sm:$0xff]  }
 0x1a3   : > { %3952 = vmatpush1.bf16.msra.mxu1 %v7026_v59  ;;  %3912 = vmatprep.subr.bf16.mxu0 %v7031_v62  ;;  %v7092_v59 = vld [vmem:[%s8038_s9 + $0x6c8] ss:$16 sps:$4 sm:$0xff]  }
 0x1a4   : > { %3953 = vmatprep.subr.bf16.mxu1 %v7034_v63 }
 0x1a6   : > { %3913 = vmatpush1.bf16.msra.mxu0 %v7029_v0  ;;  %v7097_v0 = vld [vmem:[%s8038_s9 + $0x4ac] ss:$16 sps:$4 sm:$0xff]  }
 0x1a7   : > { %3954 = vmatpush1.bf16.msra.mxu1 %v7032_v2  ;;  %3914 = vmatprep.subr.bf16.mxu0 %v7037_v3  ;;  %v7100_v2 = vld [vmem:[%s8038_s9 + $0x6ac] ss:$16 sps:$4 sm:$0xff]  }
 0x1a8   : > { %3955 = vmatprep.subr.bf16.mxu1 %v7040_v4 }
 0x1aa   : > { %3915 = vmatpush2.bf16.msra.mxu0 %v7035_v5  ;;  %v7095_v5 = vld [vmem:[%s8038_s9 + $0x4a8] ss:$16 sps:$4 sm:$0xff]  }
 0x1ab   : > { %3956 = vmatpush2.bf16.msra.mxu1 %v7038_v6  ;;  %3916 = vmatprep.subr.bf16.mxu0 %v7043_v8  ;;  %v7098_v6 = vld [vmem:[%s8038_s9 + $0x6a8] ss:$16 sps:$4 sm:$0xff]  }
 0x1ac   : > { %3957 = vmatprep.subr.bf16.mxu1 %v7046_v10 }
 0x1ae   : > { %3917 = vmatpush2.bf16.msra.mxu0 %v7041_v11  ;;  %v7104_v11 = vld [vmem:[%s8038_s9 + $0x688] ss:$16 sps:$4 sm:$0xff]  }
 0x1af   : > { %3958 = vmatpush2.bf16.msra.mxu1 %v7044_v12  ;;  %3918 = vmatprep.subr.bf16.mxu0 %v7049_v13  ;;  %v7109_v12 = vld [vmem:[%s8038_s9 + $0x46c] ss:$16 sps:$4 sm:$0xff]  }
 0x1b0   : > { %3959 = vmatprep.subr.bf16.mxu1 %v7052_v16  ;;  %v7112_v13 = vld [vmem:[%s8038_s9 + $0x66c] ss:$16 sps:$4 sm:$0xff]   ;;  %v7107_v16 = vld [vmem:[%s8038_s9 + $0x468] ss:$16 sps:$4 sm:$0xff]  }
 0x1b2   : > { %3919 = vmatpush2.bf16.msra.mxu0 %v7047_v50  ;;  %v7110_v50 = vld [vmem:[%s8038_s9 + $0x668] ss:$16 sps:$4 sm:$0xff]  }
 0x1b3   : > { %3960 = vmatpush2.bf16.msra.mxu1 %v7050_v41  ;;  %3920 = vmatprep.subr.bf16.mxu0 %v7055_v17  ;;  %v7115_v41 = vld [vmem:[%s8038_s9 + $0x44c] ss:$16 sps:$4 sm:$0xff]  }
 0x1b4   : > { %3961 = vmatprep.subr.bf16.mxu1 %v7058_v20  ;;  %v7118_v17 = vld [vmem:[%s8038_s9 + $0x64c] ss:$16 sps:$4 sm:$0xff]   ;;  %v7113_v20 = vld [vmem:[%s8038_s9 + $0x448] ss:$16 sps:$4 sm:$0xff]  }
 0x1b6   : > { %3921 = vmatpush2.bf16.msra.mxu0 %v7053_v21  ;;  %v7116_v21 = vld [vmem:[%s8038_s9 + $0x648] ss:$16 sps:$4 sm:$0xff]  }
 0x1b7   : > { %3962 = vmatpush2.bf16.msra.mxu1 %v7056_v22  ;;  %3922 = vmatprep.subr.bf16.mxu0 %v7061_v23  ;;  %v7121_v22 = vld [vmem:[%s8038_s9 + $0x42c] ss:$16 sps:$4 sm:$0xff]  }
 0x1b8   : > { %3963 = vmatprep.subr.bf16.mxu1 %v7064_v26  ;;  %v7124_v23 = vld [vmem:[%s8038_s9 + $0x62c] ss:$16 sps:$4 sm:$0xff]   ;;  %v7119_v26 = vld [vmem:[%s8038_s9 + $0x428] ss:$16 sps:$4 sm:$0xff]  }
 0x1ba   : > { %3923 = vmatpush2.bf16.msra.mxu0 %v7059_v28  ;;  %v7122_v28 = vld [vmem:[%s8038_s9 + $0x628] ss:$16 sps:$4 sm:$0xff]  }
 0x1bb   : > { %3964 = vmatpush2.bf16.msra.mxu1 %v7062_v29  ;;  %3924 = vmatprep.subr.bf16.mxu0 %v7067_v30  ;;  %v7127_v29 = vld [vmem:[%s8038_s9 + $0x40c] ss:$16 sps:$4 sm:$0xff]  }
 0x1bc   : > { %3965 = vmatprep.subr.bf16.mxu1 %v7070_v7  ;;  %v7130_v30 = vld [vmem:[%s8038_s9 + $0x60c] ss:$16 sps:$4 sm:$0xff]   ;;  %v7125_v7 = vld [vmem:[%s8038_s9 + $0x408] ss:$16 sps:$4 sm:$0xff]  }
 0x1be   : > { %3925 = vmatpush2.bf16.msra.mxu0 %v7065_v34  ;;  %v7128_v34 = vld [vmem:[%s8038_s9 + $0x608] ss:$16 sps:$4 sm:$0xff]  }
 0x1bf   : > { %3966 = vmatpush2.bf16.msra.mxu1 %v7068_v35  ;;  %3926 = vmatprep.subr.bf16.mxu0 %v7073_v37  ;;  %v7133_v35 = vld [vmem:[%s8038_s9 + $0x5ec] ss:$16 sps:$4 sm:$0xff]  }
 0x1c0   : > { %3967 = vmatprep.subr.bf16.mxu1 %v7076_v38  ;;  %v7136_v37 = vld [vmem:[%s8038_s9 + $0x7ec] ss:$16 sps:$4 sm:$0xff]   ;;  %v7131_v38 = vld [vmem:[%s8038_s9 + $0x5e8] ss:$16 sps:$4 sm:$0xff]  }
 0x1c2   : > { %3927 = vmatpush2.bf16.msra.mxu0 %v7071_v39  ;;  %v7134_v39 = vld [vmem:[%s8038_s9 + $0x7e8] ss:$16 sps:$4 sm:$0xff]  }
 0x1c3   : > { %3968 = vmatpush2.bf16.msra.mxu1 %v7074_v40  ;;  %3928 = vmatprep.subr.bf16.mxu0 %v7079_v33  ;;  %v7139_v40 = vld [vmem:[%s8038_s9 + $0x5cc] ss:$16 sps:$4 sm:$0xff]  }
 0x1c4   : > { %3969 = vmatprep.subr.bf16.mxu1 %v7082_v61  ;;  %v7142_v33 = vld [vmem:[%s8038_s9 + $0x7cc] ss:$16 sps:$4 sm:$0xff]   ;;  %v7137_v61 = vld [vmem:[%s8038_s9 + $0x5c8] ss:$16 sps:$4 sm:$0xff]  }
 0x1c6   : > { %3929 = vmatpush2.bf16.msra.mxu0 %v7077_v1  ;;  %v7140_v1 = vld [vmem:[%s8038_s9 + $0x7c8] ss:$16 sps:$4 sm:$0xff]  }
 0x1c7   : > { %3970 = vmatpush2.bf16.msra.mxu1 %v7080_v45  ;;  %3980 = vmatprep.subr.bf16.mxu0 %v7085_v46  ;;  %v7145_v45 = vld [vmem:[%s8038_s9 + $0x5ac] ss:$16 sps:$4 sm:$0xff]  }
 0x1c8   : > { %4021 = vmatprep.subr.bf16.mxu1 %v7088_v47  ;;  %v7148_v46 = vld [vmem:[%s8038_s9 + $0x7ac] ss:$16 sps:$4 sm:$0xff]   ;;  %v7143_v47 = vld [vmem:[%s8038_s9 + $0x5a8] ss:$16 sps:$4 sm:$0xff]  }
 0x1c9   : > { %v3686_v54 = vpop.f32.mrf.mxu0  ;;  %3931 = vmatmul.mubr.bf16.vlgmr.msra.gmra.mxu0 %v8149_v14 }
 0x1ca   : > { %v3727_v36 = vpop.f32.mrf.mxu1  ;;  %3972 = vmatmul.mubr.bf16.vlgmr.msra.gmra.mxu1 %v8159_v19  ;;  %v3687_v57 = vadd.f32 %v3686_v54, %v8431_v25  ;;  %3981 = vmatpush1.bf16.msra.mxu0 %v7083_v48  ;;  %v7146_v48 = vld [vmem:[%s8038_s9 + $0x7a8] ss:$16 sps:$4 sm:$0xff]  }
 0x1cb   : > { %4022 = vmatpush1.bf16.msra.mxu1 %v7086_v51  ;;  %v3688_v62 = vpop.f32.mrf.mxu0  ;;  %3982 = vmatprep.subr.bf16.mxu0 %v7091_v52  ;;  %v7151_v51 = vld [vmem:[%s8038_s9 + $0x58c] ss:$16 sps:$4 sm:$0xff]   ;;  %v7152_v54 = vld [vmem:[%s8038_s9 + $0x788] ss:$16 sps:$4 sm:$0xff]  }
 0x1cc   : > { %v3729_v63 = vpop.f32.mrf.mxu1  ;;  %4023 = vmatprep.subr.bf16.mxu1 %v7094_v53  ;;  %v8506_v3 = vadd.f32 %v3727_v36, %v3687_v57  ;;  %v3689_v14 = vadd.f32 %v3688_v62, %v8435_v32  ;;  %4012 = vmatprep.mubr.bf16.mxu0 %v8155_v18  ;;  %v7103_v18 = vld [vmem:[%s8038_s9 + $0x48c] ss:$16 sps:$4 sm:$0xff]   ;;  %v7101_v32 = vld [vmem:[%s8038_s9 + $0x488] ss:$16 sps:$4 sm:$0xff]  }
 0x1cd   : > { %4053 = vmatprep.mubr.bf16.mxu1 %v8167_v24  ;;  %v3690_v19 = vpop.f32.mrf.mxu0  ;;  %v7106_v24 = vld [vmem:[%s8038_s9 + $0x68c] ss:$16 sps:$4 sm:$0xff]   ;;  %v7149_v53 = vld [vmem:[%s8038_s9 + $0x588] ss:$16 sps:$4 sm:$0xff]  }
 0x1ce   : > { %v3731_v25 = vpop.f32.mrf.mxu1  ;;  %v8511_v4 = vadd.f32 %v3729_v63, %v3689_v14  ;;  %3983 = vmatpush1.bf16.msra.mxu0 %v7089_v58  ;;  %v7154_v52 = vld [vmem:[%s8038_s9 + $0x78c] ss:$16 sps:$4 sm:$0xff]   ;;  %v7155_v58 = vld [vmem:[%s8038_s9 + $0x568] ss:$16 sps:$4 sm:$0xff]  }
 0x1cf   : > { %4024 = vmatpush1.bf16.msra.mxu1 %v7092_v59  ;;  %v3691_v8 = vpop.f32.mrf.mxu0  ;;  %3984 = vmatprep.subr.bf16.mxu0 %v7097_v0  ;;  %v7157_v36 = vld [vmem:[%s8038_s9 + $0x56c] ss:$16 sps:$4 sm:$0xff]   ;;  %v7158_v59 = vld [vmem:[%s8038_s9 + $0x768] ss:$16 sps:$4 sm:$0xff]  }
 0x1d0   : > { %v3732_v10 = vpop.f32.mrf.mxu1  ;;  %4025 = vmatprep.subr.bf16.mxu1 %v7100_v2  ;;  %v7160_v57 = vld [vmem:[%s8038_s9 + $0x76c] ss:$16 sps:$4 sm:$0xff]   ;;  %v7161_v0 = vld [vmem:[%s8038_s9 + $0x548] ss:$16 sps:$4 sm:$0xff]  }
 0x1d1   : > { %v7163_v62 = vld [vmem:[%s8038_s9 + $0x54c] ss:$16 sps:$4 sm:$0xff]   ;;  %v7164_v2 = vld [vmem:[%s8038_s9 + $0x748] ss:$16 sps:$4 sm:$0xff]  }
 0x1d2   : > { %3985 = vmatpush1.bf16.msra.mxu0 %v7095_v5  ;;  %v7166_v63 = vld [vmem:[%s8038_s9 + $0x74c] ss:$16 sps:$4 sm:$0xff]   ;;  %v7167_v25 = vld [vmem:[%s8038_s9 + $0x528] ss:$16 sps:$4 sm:$0xff]  }
 0x1d3   : > { %4026 = vmatpush1.bf16.msra.mxu1 %v7098_v6  ;;  %3986 = vmatprep.subr.bf16.mxu0 %v7103_v18  ;;  %v7169_v14 = vld [vmem:[%s8038_s9 + $0x52c] ss:$16 sps:$4 sm:$0xff]   ;;  %v7170_v5 = vld [vmem:[%s8038_s9 + $0x728] ss:$16 sps:$4 sm:$0xff]  }
 0x1d4   : > { %4027 = vmatprep.subr.bf16.mxu1 %v7106_v24  ;;  %v7172_v19 = vld [vmem:[%s8038_s9 + $0x72c] ss:$16 sps:$4 sm:$0xff]   ;;  %v7173_v10 = vld [vmem:[%s8038_s9 + $0x508] ss:$16 sps:$4 sm:$0xff]  }
 0x1d5   : > { %v7175_v6 = vld [vmem:[%s8038_s9 + $0x50c] ss:$16 sps:$4 sm:$0xff]   ;;  %v7176_v18 = vld [vmem:[%s8038_s9 + $0x708] ss:$16 sps:$4 sm:$0xff]  }
 0x1d6   : > { %3987 = vmatpush1.bf16.msra.mxu0 %v7101_v32  ;;  %v7178_v8 = vld [vmem:[%s8038_s9 + $0x70c] ss:$16 sps:$4 sm:$0xff]  }
 0x1d7   : > { %4028 = vmatpush1.bf16.msra.mxu1 %v7104_v11  ;;  %3988 = vmatprep.subr.bf16.mxu0 %v7109_v12  ;;  %v7181_v24 = vld [vmem:[%s8038_s9 + $0x8ec] ss:$16 sps:$4 sm:$0xff]   ;;  %v7179_v11 = vld [vmem:[%s8038_s9 + $0x8e8] ss:$16 sps:$4 sm:$0xff]  }
 0x1d8   : > { %4029 = vmatprep.subr.bf16.mxu1 %v7112_v13  ;;  %v7184_v32 = vld [vmem:[%s8038_s9 + $0xaec] ss:$16 sps:$4 sm:$0xff]   ;;  %v7182_v12 = vld [vmem:[%s8038_s9 + $0xae8] ss:$16 sps:$4 sm:$0xff]  }
 0x1d9   : > { %v7187_v13 = vld [vmem:[%s8038_s9 + $0x8cc] ss:$16 sps:$4 sm:$0xff]  }
 0x1da   : > { %3989 = vmatpush1.bf16.msra.mxu0 %v7107_v16  ;;  %v7190_v16 = vld [vmem:[%s8038_s9 + $0xacc] ss:$16 sps:$4 sm:$0xff]  }
 0x1db   : > { %4030 = vmatpush1.bf16.msra.mxu1 %v7110_v50  ;;  %3990 = vmatprep.subr.bf16.mxu0 %v7115_v41 }
 0x1dc   : > { %4031 = vmatprep.subr.bf16.mxu1 %v7118_v17 }
 0x1de   : > { %3991 = vmatpush1.bf16.msra.mxu0 %v7113_v20  ;;  %v7185_v20 = vld [vmem:[%s8038_s9 + $0x8c8] ss:$16 sps:$4 sm:$0xff]  }
 0x1df   : > { %4032 = vmatpush1.bf16.msra.mxu1 %v7116_v21  ;;  %3992 = vmatprep.subr.bf16.mxu0 %v7121_v22  ;;  %v7188_v21 = vld [vmem:[%s8038_s9 + $0xac8] ss:$16 sps:$4 sm:$0xff]  }
 0x1e0   : > { %4033 = vmatprep.subr.bf16.mxu1 %v7124_v23 }
 0x1e2   : > { %3993 = vmatpush1.bf16.msra.mxu0 %v7119_v26  ;;  %v7193_v26 = vld [vmem:[%s8038_s9 + $0x8ac] ss:$16 sps:$4 sm:$0xff]  }
 0x1e3   : > { %4034 = vmatpush1.bf16.msra.mxu1 %v7122_v28  ;;  %3994 = vmatprep.subr.bf16.mxu0 %v7127_v29  ;;  %v7196_v28 = vld [vmem:[%s8038_s9 + $0xaac] ss:$16 sps:$4 sm:$0xff]  }
 0x1e4   : > { %4035 = vmatprep.subr.bf16.mxu1 %v7130_v30 }
 0x1e6   : > { %3995 = vmatpush1.bf16.msra.mxu0 %v7125_v7  ;;  %v7191_v7 = vld [vmem:[%s8038_s9 + $0x8a8] ss:$16 sps:$4 sm:$0xff]  }
 0x1e7   : > { %4036 = vmatpush1.bf16.msra.mxu1 %v7128_v34  ;;  %3996 = vmatprep.subr.bf16.mxu0 %v7133_v35  ;;  %v7194_v34 = vld [vmem:[%s8038_s9 + $0xaa8] ss:$16 sps:$4 sm:$0xff]  }
 0x1e8   : > { %4037 = vmatprep.subr.bf16.mxu1 %v7136_v37 }
 0x1ea   : > { %3997 = vmatpush2.bf16.msra.mxu0 %v7131_v38  ;;  %v7200_v38 = vld [vmem:[%s8038_s9 + $0xa88] ss:$16 sps:$4 sm:$0xff]  }
 0x1eb   : > { %4038 = vmatpush2.bf16.msra.mxu1 %v7134_v39  ;;  %3998 = vmatprep.subr.bf16.mxu0 %v7139_v40  ;;  %v7205_v39 = vld [vmem:[%s8038_s9 + $0x86c] ss:$16 sps:$4 sm:$0xff]  }
 0x1ec   : > { %4039 = vmatprep.subr.bf16.mxu1 %v7142_v33  ;;  %v7208_v40 = vld [vmem:[%s8038_s9 + $0xa6c] ss:$16 sps:$4 sm:$0xff]   ;;  %v7203_v33 = vld [vmem:[%s8038_s9 + $0x868] ss:$16 sps:$4 sm:$0xff]  }
 0x1ee   : > { %3999 = vmatpush2.bf16.msra.mxu0 %v7137_v61  ;;  %v7206_v61 = vld [vmem:[%s8038_s9 + $0xa68] ss:$16 sps:$4 sm:$0xff]  }
 0x1ef   : > { %4040 = vmatpush2.bf16.msra.mxu1 %v7140_v1  ;;  %4000 = vmatprep.subr.bf16.mxu0 %v7145_v45  ;;  %v7211_v1 = vld [vmem:[%s8038_s9 + $0x84c] ss:$16 sps:$4 sm:$0xff]  }
 0x1f0   : > { %4041 = vmatprep.subr.bf16.mxu1 %v7148_v46  ;;  %v7214_v45 = vld [vmem:[%s8038_s9 + $0xa4c] ss:$16 sps:$4 sm:$0xff]   ;;  %v7209_v46 = vld [vmem:[%s8038_s9 + $0x848] ss:$16 sps:$4 sm:$0xff]  }
 0x1f2   : > { %4001 = vmatpush2.bf16.msra.mxu0 %v7143_v47  ;;  %v7212_v47 = vld [vmem:[%s8038_s9 + $0xa48] ss:$16 sps:$4 sm:$0xff]  }
 0x1f3   : > { %4042 = vmatpush2.bf16.msra.mxu1 %v7146_v48  ;;  %4002 = vmatprep.subr.bf16.mxu0 %v7151_v51  ;;  %v7217_v48 = vld [vmem:[%s8038_s9 + $0x82c] ss:$16 sps:$4 sm:$0xff]  }
 0x1f4   : > { %4043 = vmatprep.subr.bf16.mxu1 %v7154_v52  ;;  %v7220_v51 = vld [vmem:[%s8038_s9 + $0xa2c] ss:$16 sps:$4 sm:$0xff]   ;;  %v7215_v52 = vld [vmem:[%s8038_s9 + $0x828] ss:$16 sps:$4 sm:$0xff]  }
 0x1f6   : > { %4003 = vmatpush2.bf16.msra.mxu0 %v7149_v53  ;;  %v7218_v53 = vld [vmem:[%s8038_s9 + $0xa28] ss:$16 sps:$4 sm:$0xff]  }
 0x1f7   : > { %4044 = vmatpush2.bf16.msra.mxu1 %v7152_v54  ;;  %4004 = vmatprep.subr.bf16.mxu0 %v7157_v36  ;;  %v7223_v54 = vld [vmem:[%s8038_s9 + $0x80c] ss:$16 sps:$4 sm:$0xff]  }
 0x1f8   : > { %4045 = vmatprep.subr.bf16.mxu1 %v7160_v57  ;;  %v7226_v36 = vld [vmem:[%s8038_s9 + $0xa0c] ss:$16 sps:$4 sm:$0xff]   ;;  %v7221_v57 = vld [vmem:[%s8038_s9 + $0x808] ss:$16 sps:$4 sm:$0xff]  }
 0x1fa   : > { %4005 = vmatpush2.bf16.msra.mxu0 %v7155_v58  ;;  %v7224_v58 = vld [vmem:[%s8038_s9 + $0xa08] ss:$16 sps:$4 sm:$0xff]  }
 0x1fb   : > { %4046 = vmatpush2.bf16.msra.mxu1 %v7158_v59  ;;  %4006 = vmatprep.subr.bf16.mxu0 %v7163_v62  ;;  %v7229_v59 = vld [vmem:[%s8038_s9 + $0x9ec] ss:$16 sps:$4 sm:$0xff]  }
 0x1fc   : > { %4047 = vmatprep.subr.bf16.mxu1 %v7166_v63  ;;  %v7232_v62 = vld [vmem:[%s8038_s9 + $0xbec] ss:$16 sps:$4 sm:$0xff]   ;;  %v7227_v63 = vld [vmem:[%s8038_s9 + $0x9e8] ss:$16 sps:$4 sm:$0xff]  }
 0x1fe   : > { %4007 = vmatpush2.bf16.msra.mxu0 %v7161_v0  ;;  %v7230_v0 = vld [vmem:[%s8038_s9 + $0xbe8] ss:$16 sps:$4 sm:$0xff]  }
 0x1ff   : > { %4048 = vmatpush2.bf16.msra.mxu1 %v7164_v2  ;;  %4008 = vmatprep.subr.bf16.mxu0 %v7169_v14  ;;  %v7235_v2 = vld [vmem:[%s8038_s9 + $0x9cc] ss:$16 sps:$4 sm:$0xff]  }
 0x200   : > { %4049 = vmatprep.subr.bf16.mxu1 %v7172_v19  ;;  %v7238_v14 = vld [vmem:[%s8038_s9 + $0xbcc] ss:$16 sps:$4 sm:$0xff]   ;;  %v7233_v19 = vld [vmem:[%s8038_s9 + $0x9c8] ss:$16 sps:$4 sm:$0xff]  }
 0x202   : > { %4009 = vmatpush2.bf16.msra.mxu0 %v7167_v25  ;;  %v7236_v25 = vld [vmem:[%s8038_s9 + $0xbc8] ss:$16 sps:$4 sm:$0xff]  }
 0x203   : > { %4050 = vmatpush2.bf16.msra.mxu1 %v7170_v5  ;;  %4010 = vmatprep.subr.bf16.mxu0 %v7175_v6  ;;  %v7241_v5 = vld [vmem:[%s8038_s9 + $0x9ac] ss:$16 sps:$4 sm:$0xff]  }
 0x204   : > { %4051 = vmatprep.subr.bf16.mxu1 %v7178_v8  ;;  %v7244_v6 = vld [vmem:[%s8038_s9 + $0xbac] ss:$16 sps:$4 sm:$0xff]   ;;  %v7239_v8 = vld [vmem:[%s8038_s9 + $0x9a8] ss:$16 sps:$4 sm:$0xff]  }
 0x206   : > { %4011 = vmatpush2.bf16.msra.mxu0 %v7173_v10  ;;  %v7242_v10 = vld [vmem:[%s8038_s9 + $0xba8] ss:$16 sps:$4 sm:$0xff]  }
 0x207   : > { %4052 = vmatpush2.bf16.msra.mxu1 %v7176_v18  ;;  %4062 = vmatprep.subr.bf16.mxu0 %v7181_v24  ;;  %v7247_v18 = vld [vmem:[%s8038_s9 + $0x98c] ss:$16 sps:$4 sm:$0xff]  }
 0x208   : > { %4103 = vmatprep.subr.bf16.mxu1 %v7184_v32  ;;  %v7250_v24 = vld [vmem:[%s8038_s9 + $0xb8c] ss:$16 sps:$4 sm:$0xff]   ;;  %v7245_v32 = vld [vmem:[%s8038_s9 + $0x988] ss:$16 sps:$4 sm:$0xff]  }
 0x209   : > { %v3768_v50 = vpop.f32.mrf.mxu0  ;;  %4013 = vmatmul.mubr.bf16.vlgmr.msra.gmra.mxu0 %v8232_v27 }
 0x20a   : > { %v3809_v41 = vpop.f32.mrf.mxu1  ;;  %4054 = vmatmul.mubr.bf16.vlgmr.msra.gmra.mxu1 %v8239_v31  ;;  %v3769_v17 = vadd.f32 %v3768_v50, %v8506_v3  ;;  %4063 = vmatpush1.bf16.msra.mxu0 %v7179_v11  ;;  %v7248_v11 = vld [vmem:[%s8038_s9 + $0xb88] ss:$16 sps:$4 sm:$0xff]  }
 0x20b   : > { %4104 = vmatpush1.bf16.msra.mxu1 %v7182_v12  ;;  %v3770_v22 = vpop.f32.mrf.mxu0  ;;  %4064 = vmatprep.subr.bf16.mxu0 %v7187_v13  ;;  %v7253_v12 = vld [vmem:[%s8038_s9 + $0x96c] ss:$16 sps:$4 sm:$0xff]   ;;  %v7254_v50 = vld [vmem:[%s8038_s9 + $0xb68] ss:$16 sps:$4 sm:$0xff]  }
 0x20c   : > { %v3811_v23 = vpop.f32.mrf.mxu1  ;;  %4105 = vmatprep.subr.bf16.mxu1 %v7190_v16  ;;  %v8580_v29 = vadd.f32 %v3809_v41, %v3769_v17  ;;  %v3771_v27 = vadd.f32 %v3770_v22, %v8511_v4  ;;  %4094 = vmatprep.mubr.bf16.mxu0 %v8261_v42  ;;  %v7199_v42 = vld [vmem:[%s8038_s9 + $0x88c] ss:$16 sps:$4 sm:$0xff]   ;;  %v7197_v4 = vld [vmem:[%s8038_s9 + $0x888] ss:$16 sps:$4 sm:$0xff]  }
 0x20d   : > { %4135 = vmatprep.mubr.bf16.mxu1 %v8266_v43  ;;  %v3772_v31 = vpop.f32.mrf.mxu0  ;;  %v7202_v43 = vld [vmem:[%s8038_s9 + $0xa8c] ss:$16 sps:$4 sm:$0xff]   ;;  %v7251_v16 = vld [vmem:[%s8038_s9 + $0x968] ss:$16 sps:$4 sm:$0xff]  }
 0x20e   : > { %v3813_v3 = vpop.f32.mrf.mxu1  ;;  %v8585_v30 = vadd.f32 %v3811_v23, %v3771_v27  ;;  %4065 = vmatpush1.bf16.msra.mxu0 %v7185_v20  ;;  %v7256_v13 = vld [vmem:[%s8038_s9 + $0xb6c] ss:$16 sps:$4 sm:$0xff]   ;;  %v7257_v20 = vld [vmem:[%s8038_s9 + $0x948] ss:$16 sps:$4 sm:$0xff]  }
 0x20f   : > { %4106 = vmatpush1.bf16.msra.mxu1 %v7188_v21  ;;  %v3773_v35 = vpop.f32.mrf.mxu0  ;;  %4066 = vmatprep.subr.bf16.mxu0 %v7193_v26  ;;  %v7259_v41 = vld [vmem:[%s8038_s9 + $0x94c] ss:$16 sps:$4 sm:$0xff]   ;;  %v7260_v21 = vld [vmem:[%s8038_s9 + $0xb48] ss:$16 sps:$4 sm:$0xff]  }
 0x210   : > { %v3814_v37 = vpop.f32.mrf.mxu1  ;;  %4107 = vmatprep.subr.bf16.mxu1 %v7196_v28  ;;  %v7262_v17 = vld [vmem:[%s8038_s9 + $0xb4c] ss:$16 sps:$4 sm:$0xff]   ;;  %v7263_v26 = vld [vmem:[%s8038_s9 + $0x928] ss:$16 sps:$4 sm:$0xff]  }
 0x211   : > { %v7265_v22 = vld [vmem:[%s8038_s9 + $0x92c] ss:$16 sps:$4 sm:$0xff]   ;;  %v7266_v28 = vld [vmem:[%s8038_s9 + $0xb28] ss:$16 sps:$4 sm:$0xff]  }
 0x212   : > { %4067 = vmatpush1.bf16.msra.mxu0 %v7191_v7  ;;  %v7268_v23 = vld [vmem:[%s8038_s9 + $0xb2c] ss:$16 sps:$4 sm:$0xff]   ;;  %v7269_v3 = vld [vmem:[%s8038_s9 + $0x908] ss:$16 sps:$4 sm:$0xff]  }
 0x213   : > { %4108 = vmatpush1.bf16.msra.mxu1 %v7194_v34  ;;  %4068 = vmatprep.subr.bf16.mxu0 %v7199_v42  ;;  %v7271_v27 = vld [vmem:[%s8038_s9 + $0x90c] ss:$16 sps:$4 sm:$0xff]   ;;  %v7272_v7 = vld [vmem:[%s8038_s9 + $0xb08] ss:$16 sps:$4 sm:$0xff]  }
 0x214   : > { %4109 = vmatprep.subr.bf16.mxu1 %v7202_v43  ;;  %v7274_v31 = vld [vmem:[%s8038_s9 + $0xb0c] ss:$16 sps:$4 sm:$0xff]   ;;  %v7275_v37 = vld [vmem:[%s8038_s9 + $0xce8] ss:$16 sps:$4 sm:$0xff]  }
 0x215   : > { %v7277_v34 = vld [vmem:[%s8038_s9 + $0xcec] ss:$16 sps:$4 sm:$0xff]   ;;  %v7278_v42 = vld [vmem:[%s8038_s9 + $0xee8] ss:$16 sps:$4 sm:$0xff]  }
 0x216   : > { %4069 = vmatpush1.bf16.msra.mxu0 %v7197_v4  ;;  %v7280_v35 = vld [vmem:[%s8038_s9 + $0xeec] ss:$16 sps:$4 sm:$0xff]  }
 0x217   : > { %4110 = vmatpush1.bf16.msra.mxu1 %v7200_v38  ;;  %4070 = vmatprep.subr.bf16.mxu0 %v7205_v39  ;;  %v7283_v43 = vld [vmem:[%s8038_s9 + $0xccc] ss:$16 sps:$4 sm:$0xff]  }
 0x218   : > { %4111 = vmatprep.subr.bf16.mxu1 %v7208_v40  ;;  %v7286_v4 = vld [vmem:[%s8038_s9 + $0xecc] ss:$16 sps:$4 sm:$0xff]  }
 0x21a   : > { %4071 = vmatpush1.bf16.msra.mxu0 %v7203_v33  ;;  %v7281_v33 = vld [vmem:[%s8038_s9 + $0xcc8] ss:$16 sps:$4 sm:$0xff]  }
 0x21b   : > { %4112 = vmatpush1.bf16.msra.mxu1 %v7206_v61  ;;  %4072 = vmatprep.subr.bf16.mxu0 %v7211_v1  ;;  %v7284_v61 = vld [vmem:[%s8038_s9 + $0xec8] ss:$16 sps:$4 sm:$0xff]  }
 0x21c   : > { %4113 = vmatprep.subr.bf16.mxu1 %v7214_v45 }
 0x21e   : > { %4073 = vmatpush1.bf16.msra.mxu0 %v7209_v46  ;;  %v7289_v46 = vld [vmem:[%s8038_s9 + $0xcac] ss:$16 sps:$4 sm:$0xff]  }
 0x21f   : > { %4114 = vmatpush1.bf16.msra.mxu1 %v7212_v47  ;;  %4074 = vmatprep.subr.bf16.mxu0 %v7217_v48  ;;  %v7292_v47 = vld [vmem:[%s8038_s9 + $0xeac] ss:$16 sps:$4 sm:$0xff]  }
 0x220   : > { %4115 = vmatprep.subr.bf16.mxu1 %v7220_v51 }
 0x222   : > { %4075 = vmatpush1.bf16.msra.mxu0 %v7215_v52  ;;  %v7287_v52 = vld [vmem:[%s8038_s9 + $0xca8] ss:$16 sps:$4 sm:$0xff]  }
 0x223   : > { %4116 = vmatpush1.bf16.msra.mxu1 %v7218_v53  ;;  %4076 = vmatprep.subr.bf16.mxu0 %v7223_v54  ;;  %v7290_v53 = vld [vmem:[%s8038_s9 + $0xea8] ss:$16 sps:$4 sm:$0xff]  }
 0x224   : > { %4117 = vmatprep.subr.bf16.mxu1 %v7226_v36 }
 0x226   : > { %4077 = vmatpush1.bf16.msra.mxu0 %v7221_v57  ;;  %v7293_v57 = vld [vmem:[%s8038_s9 + $0xc88] ss:$16 sps:$4 sm:$0xff]  }
 0x227   : > { %4118 = vmatpush1.bf16.msra.mxu1 %v7224_v58  ;;  %4078 = vmatprep.subr.bf16.mxu0 %v7229_v59  ;;  %v7296_v58 = vld [vmem:[%s8038_s9 + $0xe88] ss:$16 sps:$4 sm:$0xff]   ;;  %v7301_v59 = vld [vmem:[%s8038_s9 + $0xc6c] ss:$16 sps:$4 sm:$0xff]  }
 0x228   : > { %4119 = vmatprep.subr.bf16.mxu1 %v7232_v62  ;;  %v7304_v62 = vld [vmem:[%s8038_s9 + $0xe6c] ss:$16 sps:$4 sm:$0xff]  }
 0x22a   : > { %4079 = vmatpush2.bf16.msra.mxu0 %v7227_v63  ;;  %v7299_v63 = vld [vmem:[%s8038_s9 + $0xc68] ss:$16 sps:$4 sm:$0xff]  }
 0x22b   : > { %4120 = vmatpush2.bf16.msra.mxu1 %v7230_v0  ;;  %4080 = vmatprep.subr.bf16.mxu0 %v7235_v2  ;;  %v7302_v0 = vld [vmem:[%s8038_s9 + $0xe68] ss:$16 sps:$4 sm:$0xff]   ;;  %v7307_v2 = vld [vmem:[%s8038_s9 + $0xc4c] ss:$16 sps:$4 sm:$0xff]  }
 0x22c   : > { %4121 = vmatprep.subr.bf16.mxu1 %v7238_v14  ;;  %v7310_v14 = vld [vmem:[%s8038_s9 + $0xe4c] ss:$16 sps:$4 sm:$0xff]  }
 0x22e   : > { %4081 = vmatpush2.bf16.msra.mxu0 %v7233_v19  ;;  %v7305_v19 = vld [vmem:[%s8038_s9 + $0xc48] ss:$16 sps:$4 sm:$0xff]  }
 0x22f   : > { %4122 = vmatpush2.bf16.msra.mxu1 %v7236_v25  ;;  %4082 = vmatprep.subr.bf16.mxu0 %v7241_v5  ;;  %v7308_v25 = vld [vmem:[%s8038_s9 + $0xe48] ss:$16 sps:$4 sm:$0xff]   ;;  %v7313_v5 = vld [vmem:[%s8038_s9 + $0xc2c] ss:$16 sps:$4 sm:$0xff]  }
 0x230   : > { %4123 = vmatprep.subr.bf16.mxu1 %v7244_v6  ;;  %v7316_v6 = vld [vmem:[%s8038_s9 + $0xe2c] ss:$16 sps:$4 sm:$0xff]  }
 0x232   : > { %4083 = vmatpush2.bf16.msra.mxu0 %v7239_v8  ;;  %v7311_v8 = vld [vmem:[%s8038_s9 + $0xc28] ss:$16 sps:$4 sm:$0xff]  }
 0x233   : > { %4124 = vmatpush2.bf16.msra.mxu1 %v7242_v10  ;;  %4084 = vmatprep.subr.bf16.mxu0 %v7247_v18  ;;  %v7314_v10 = vld [vmem:[%s8038_s9 + $0xe28] ss:$16 sps:$4 sm:$0xff]   ;;  %v7319_v18 = vld [vmem:[%s8038_s9 + $0xc0c] ss:$16 sps:$4 sm:$0xff]  }
 0x234   : > { %4125 = vmatprep.subr.bf16.mxu1 %v7250_v24  ;;  %v7322_v24 = vld [vmem:[%s8038_s9 + $0xe0c] ss:$16 sps:$4 sm:$0xff]  }
 0x236   : > { %4085 = vmatpush2.bf16.msra.mxu0 %v7245_v32  ;;  %v7317_v32 = vld [vmem:[%s8038_s9 + $0xc08] ss:$16 sps:$4 sm:$0xff]  }
 0x237   : > { %4126 = vmatpush2.bf16.msra.mxu1 %v7248_v11  ;;  %4086 = vmatprep.subr.bf16.mxu0 %v7253_v12  ;;  %v7320_v11 = vld [vmem:[%s8038_s9 + $0xe08] ss:$16 sps:$4 sm:$0xff]   ;;  %v7325_v12 = vld [vmem:[%s8038_s9 + $0xdec] ss:$16 sps:$4 sm:$0xff]  }
 0x238   : > { %4127 = vmatprep.subr.bf16.mxu1 %v7256_v13  ;;  %v7328_v13 = vld [vmem:[%s8038_s9 + $0xfec] ss:$16 sps:$4 sm:$0xff]  }
 0x23a   : > { %4087 = vmatpush2.bf16.msra.mxu0 %v7251_v16  ;;  %v7323_v16 = vld [vmem:[%s8038_s9 + $0xde8] ss:$16 sps:$4 sm:$0xff]  }
 0x23b   : > { %4128 = vmatpush2.bf16.msra.mxu1 %v7254_v50  ;;  %4088 = vmatprep.subr.bf16.mxu0 %v7259_v41  ;;  %v7326_v50 = vld [vmem:[%s8038_s9 + $0xfe8] ss:$16 sps:$4 sm:$0xff]   ;;  %v7331_v41 = vld [vmem:[%s8038_s9 + $0xdcc] ss:$16 sps:$4 sm:$0xff]  }
 0x23c   : > { %4129 = vmatprep.subr.bf16.mxu1 %v7262_v17  ;;  %v7334_v17 = vld [vmem:[%s8038_s9 + $0xfcc] ss:$16 sps:$4 sm:$0xff]  }
 0x23e   : > { %4089 = vmatpush2.bf16.msra.mxu0 %v7257_v20  ;;  %v7329_v20 = vld [vmem:[%s8038_s9 + $0xdc8] ss:$16 sps:$4 sm:$0xff]  }
 0x23f   : > { %4130 = vmatpush2.bf16.msra.mxu1 %v7260_v21  ;;  %4090 = vmatprep.subr.bf16.mxu0 %v7265_v22  ;;  %v7332_v21 = vld [vmem:[%s8038_s9 + $0xfc8] ss:$16 sps:$4 sm:$0xff]   ;;  %v7337_v22 = vld [vmem:[%s8038_s9 + $0xdac] ss:$16 sps:$4 sm:$0xff]  }
 0x240   : > { %4131 = vmatprep.subr.bf16.mxu1 %v7268_v23  ;;  %v7340_v23 = vld [vmem:[%s8038_s9 + $0xfac] ss:$16 sps:$4 sm:$0xff]  }
 0x242   : > { %4091 = vmatpush2.bf16.msra.mxu0 %v7263_v26  ;;  %v7335_v26 = vld [vmem:[%s8038_s9 + $0xda8] ss:$16 sps:$4 sm:$0xff]  }
 0x243   : > { %4132 = vmatpush2.bf16.msra.mxu1 %v7266_v28  ;;  %4092 = vmatprep.subr.bf16.mxu0 %v7271_v27  ;;  %v7338_v28 = vld [vmem:[%s8038_s9 + $0xfa8] ss:$16 sps:$4 sm:$0xff]   ;;  %v7343_v27 = vld [vmem:[%s8038_s9 + $0xd8c] ss:$16 sps:$4 sm:$0xff]  }
 0x244   : > { %4133 = vmatprep.subr.bf16.mxu1 %v7274_v31  ;;  %v7346_v31 = vld [vmem:[%s8038_s9 + $0xf8c] ss:$16 sps:$4 sm:$0xff]  }
 0x246   : > { %4093 = vmatpush2.bf16.msra.mxu0 %v7269_v3  ;;  %v7341_v3 = vld [vmem:[%s8038_s9 + $0xd88] ss:$16 sps:$4 sm:$0xff]  }
 0x247   : > { %4134 = vmatpush2.bf16.msra.mxu1 %v7272_v7  ;;  %4144 = vmatprep.subr.bf16.mxu0 %v7277_v34  ;;  %v7344_v7 = vld [vmem:[%s8038_s9 + $0xf88] ss:$16 sps:$4 sm:$0xff]   ;;  %v7349_v34 = vld [vmem:[%s8038_s9 + $0xd6c] ss:$16 sps:$4 sm:$0xff]  }
 0x248   : > { %4185 = vmatprep.subr.bf16.mxu1 %v7280_v35  ;;  %v7352_v35 = vld [vmem:[%s8038_s9 + $0xf6c] ss:$16 sps:$4 sm:$0xff]  }
 0x249   : > { %v3850_v38 = vpop.f32.mrf.mxu0  ;;  %4095 = vmatmul.mubr.bf16.vlgmr.msra.gmra.mxu0 %v8330_v49 }
 0x24a   : > { %v3891_v39 = vpop.f32.mrf.mxu1  ;;  %4136 = vmatmul.mubr.bf16.vlgmr.msra.gmra.mxu1 %v8341_v56  ;;  %v3851_v40 = vadd.f32 %v3850_v38, %v8580_v29  ;;  %4145 = vmatpush1.bf16.msra.mxu0 %v7275_v37  ;;  %v7347_v37 = vld [vmem:[%s8038_s9 + $0xd68] ss:$16 sps:$4 sm:$0xff]  }
 0x24b   : > { %4186 = vmatpush1.bf16.msra.mxu1 %v7278_v42  ;;  %v3852_v1 = vpop.f32.mrf.mxu0  ;;  %4146 = vmatprep.subr.bf16.mxu0 %v7283_v43  ;;  %v7350_v42 = vld [vmem:[%s8038_s9 + $0xf68] ss:$16 sps:$4 sm:$0xff]   ;;  %v7355_v43 = vld [vmem:[%s8038_s9 + $0xd4c] ss:$16 sps:$4 sm:$0xff]  }
 0x24c   : > { %v3893_v45 = vpop.f32.mrf.mxu1  ;;  %4187 = vmatprep.subr.bf16.mxu1 %v7286_v4  ;;  %v8654_v48 = vadd.f32 %v3891_v39, %v3851_v40  ;;  %v3853_v49 = vadd.f32 %v3852_v1, %v8585_v30  ;;  %4176 = vmatprep.mubr.bf16.mxu0 %v8337_v55  ;;  %v7295_v55 = vld [vmem:[%s8038_s9 + $0xc8c] ss:$16 sps:$4 sm:$0xff]   ;;  %v7353_v38 = vld [vmem:[%s8038_s9 + $0xd48] ss:$16 sps:$4 sm:$0xff]  }
 0x24d   : > { %4217 = vmatprep.mubr.bf16.mxu1 %v8349_v60  ;;  %v3854_v56 = vpop.f32.mrf.mxu0  ;;  %v7298_v60 = vld [vmem:[%s8038_s9 + $0xe8c] ss:$16 sps:$4 sm:$0xff]   ;;  %v7356_v39 = vld [vmem:[%s8038_s9 + $0xf48] ss:$16 sps:$4 sm:$0xff]  }
 0x24e   : > { %v3895_v29 = vpop.f32.mrf.mxu1  ;;  %v8659_v51 = vadd.f32 %v3893_v45, %v3853_v49  ;;  %4147 = vmatpush1.bf16.msra.mxu0 %v7281_v33  ;;  %v7358_v4 = vld [vmem:[%s8038_s9 + $0xf4c] ss:$16 sps:$4 sm:$0xff]   ;;  %v7362_v1 = vld [vmem:[%s8038_s9 + $0xf28] ss:$16 sps:$4 sm:$0xff]  }
 0x24f   : > { %4188 = vmatpush1.bf16.msra.mxu1 %v7284_v61  ;;  %v3855_v54 = vpop.f32.mrf.mxu0  ;;  %4148 = vmatprep.subr.bf16.mxu0 %v7289_v46  ;;  %v7361_v40 = vld [vmem:[%s8038_s9 + $0xd2c] ss:$16 sps:$4 sm:$0xff]   ;;  %v7359_v61 = vld [vmem:[%s8038_s9 + $0xd28] ss:$16 sps:$4 sm:$0xff]  }
 0x250   : > { %v3896_v36 = vpop.f32.mrf.mxu1  ;;  %4189 = vmatprep.subr.bf16.mxu1 %v7292_v47  ;;  %v4230_v30 = vcombine.low %v8654_v48, %v8659_v51  ;;  %v7364_v33 = vld [vmem:[%s8038_s9 + $0xf2c] ss:$16 sps:$4 sm:$0xff]   ;;  %v7365_v47 = vld [vmem:[%s8038_s9 + $0xd08] ss:$16 sps:$4 sm:$0xff]  }
 0x251   : > { %v7367_v45 = vld [vmem:[%s8038_s9 + $0xd0c] ss:$16 sps:$4 sm:$0xff]   ;;  %v7368_v49 = vld [vmem:[%s8038_s9 + $0xf08] ss:$16 sps:$4 sm:$0xff]  }
 0x252   : > { %4149 = vmatpush1.bf16.msra.mxu0 %v7287_v52  ;;  %v7370_v46 = vld [vmem:[%s8038_s9 + $0xf0c] ss:$16 sps:$4 sm:$0xff]  }
 0x253   : > { %4190 = vmatpush1.bf16.msra.mxu1 %v7290_v53  ;;  %4150 = vmatprep.subr.bf16.mxu0 %v7295_v55 }
 0x254   : > { %4191 = vmatprep.subr.bf16.mxu1 %v7298_v60 }
 0x256   : > { %4151 = vmatpush1.bf16.msra.mxu0 %v7293_v57 }
 0x257   : > { %4192 = vmatpush1.bf16.msra.mxu1 %v7296_v58  ;;  %4152 = vmatprep.subr.bf16.mxu0 %v7301_v59 }
 0x258   : > { %4193 = vmatprep.subr.bf16.mxu1 %v7304_v62 }
 0x25a   : > { %4153 = vmatpush1.bf16.msra.mxu0 %v7299_v63 }
 0x25b   : > { %4194 = vmatpush1.bf16.msra.mxu1 %v7302_v0  ;;  %4154 = vmatprep.subr.bf16.mxu0 %v7307_v2 }
 0x25c   : > { %4195 = vmatprep.subr.bf16.mxu1 %v7310_v14 }
 0x25e   : > { %4155 = vmatpush1.bf16.msra.mxu0 %v7305_v19 }
 0x25f   : > { %4196 = vmatpush1.bf16.msra.mxu1 %v7308_v25  ;;  %4156 = vmatprep.subr.bf16.mxu0 %v7313_v5 }
 0x260   : > { %4197 = vmatprep.subr.bf16.mxu1 %v7316_v6 }
 0x262   : > { %4157 = vmatpush1.bf16.msra.mxu0 %v7311_v8 }
 0x263   : > { %4198 = vmatpush1.bf16.msra.mxu1 %v7314_v10  ;;  %4158 = vmatprep.subr.bf16.mxu0 %v7319_v18 }
 0x264   : > { %4199 = vmatprep.subr.bf16.mxu1 %v7322_v24 }
 0x266   : > { %4159 = vmatpush1.bf16.msra.mxu0 %v7317_v32 }
 0x267   : > { %4200 = vmatpush1.bf16.msra.mxu1 %v7320_v11  ;;  %4160 = vmatprep.subr.bf16.mxu0 %v7325_v12 }
 0x268   : > { %4201 = vmatprep.subr.bf16.mxu1 %v7328_v13 }
 0x26a   : > { %4161 = vmatpush2.bf16.msra.mxu0 %v7323_v16 }
 0x26b   : > { %4202 = vmatpush2.bf16.msra.mxu1 %v7326_v50  ;;  %4162 = vmatprep.subr.bf16.mxu0 %v7331_v41  ;;  %v7845_v41 = vmov 1983009808  }
 0x26c   : > { %4203 = vmatprep.subr.bf16.mxu1 %v7334_v17  ;;  %v4233_v17 = vunpack.c.l.s4 %v7845_v41 }
 0x26e   : > { %4163 = vmatpush2.bf16.msra.mxu0 %v7329_v20 }
 0x26f   : > { %4204 = vmatpush2.bf16.msra.mxu1 %v7332_v21  ;;  %4164 = vmatprep.subr.bf16.mxu0 %v7337_v22 }
 0x270   : > { %4205 = vmatprep.subr.bf16.mxu1 %v7340_v23  ;;  %v4234_v23 = vunpack.c.0.s8 %v4233_v17 }
 0x272   : > { %4165 = vmatpush2.bf16.msra.mxu0 %v7335_v26 }
 0x273   : > { %4206 = vmatpush2.bf16.msra.mxu1 %v7338_v28  ;;  %4166 = vmatprep.subr.bf16.mxu0 %v7343_v27 }
 0x274   : > { %4207 = vmatprep.subr.bf16.mxu1 %v7346_v31 }
 0x276   : > { %4167 = vmatpush2.bf16.msra.mxu0 %v7341_v3 }
 0x277   : > { %4208 = vmatpush2.bf16.msra.mxu1 %v7344_v7  ;;  %4168 = vmatprep.subr.bf16.mxu0 %v7349_v34 }
 0x278   : > { %4209 = vmatprep.subr.bf16.mxu1 %v7352_v35  ;;  %v8720_v35 = vsub.s32 %v4234_v23, %v8103_v44 }
 0x27a   : > { %4169 = vmatpush2.bf16.msra.mxu0 %v7347_v37 }
 0x27b   : > { %4210 = vmatpush2.bf16.msra.mxu1 %v7350_v42  ;;  %4170 = vmatprep.subr.bf16.mxu0 %v7355_v43 }
 0x27c   : > { %4211 = vmatprep.subr.bf16.mxu1 %v7358_v4 }
 0x27e   : > { %4171 = vmatpush2.bf16.msra.mxu0 %v7353_v38 }
 0x27f   : > { %4212 = vmatpush2.bf16.msra.mxu1 %v7356_v39  ;;  %4172 = vmatprep.subr.bf16.mxu0 %v7361_v40  ;;  %v4238_v39 = vrot.slane %v4230_v30, %v8720_v35 }
 0x280   : > { %4213 = vmatprep.subr.bf16.mxu1 %v7364_v33  ;;  %v379_v33 = vld [vmem:[#allocation2] sm:$0xff] }
 0x282   : > { %4173 = vmatpush2.bf16.msra.mxu0 %v7359_v61 }
 0x283   : > { %4214 = vmatpush2.bf16.msra.mxu1 %v7362_v1  ;;  %4174 = vmatprep.subr.bf16.mxu0 %v7367_v45 }
 0x284   : > { %4215 = vmatprep.subr.bf16.mxu1 %v7370_v46 }
 0x286   : > { %4175 = vmatpush2.bf16.msra.mxu0 %v7365_v47 }
 0x287   : > { %4216 = vmatpush2.bf16.msra.mxu1 %v7368_v49 }
 0x289   : > { %v3932_v56 = vpop.f32.mrf.mxu0  ;;  %4177 = vmatmul.mubr.bf16.vlgmr.msra.gmra.mxu0 %v8413_v9 }
 0x28a   : > { %v3973_v29 = vpop.f32.mrf.mxu1  ;;  %4218 = vmatmul.mubr.bf16.vlgmr.msra.gmra.mxu1 %v8421_v15 }
 0x28b   : > { %v3974_v52 = vadd.f32 %v3973_v29, %v3932_v56  ;;  %v3934_v53 = vpop.f32.mrf.mxu0 }
 0x28c   : > { %v3975_v54 = vpop.f32.mrf.mxu1 }
 0x28d   : > { %v3976_v36 = vadd.f32 %v3975_v54, %v3934_v53  ;;  %v3936_v55 = vpop.f32.mrf.mxu0 }
 0x28e   : > { %v3977_v60 = vpop.f32.mrf.mxu1 }
 0x28f   : > { %v3937_v57 = vpop.f32.mrf.mxu0 }
 0x290   : > { %v3978_v58 = vpop.f32.mrf.mxu1 }
 0x2c9   : > { %v4014_v59 = vpop.f32.mrf.mxu0 }
 0x2ca   : > { %v4055_v62 = vpop.f32.mrf.mxu1  ;;  %v4015_v63 = vadd.f32 %v4014_v59, %v3974_v52 }
 0x2cb   : > { %v4016_v0 = vpop.f32.mrf.mxu0 }
 0x2cc   : > { %v4057_v2 = vpop.f32.mrf.mxu1  ;;  %v4056_v14 = vadd.f32 %v4055_v62, %v4015_v63  ;;  %v4017_v19 = vadd.f32 %v4016_v0, %v3976_v36 }
 0x2cd   : > { %v4018_v25 = vpop.f32.mrf.mxu0 }
 0x2ce   : > { %v4059_v5 = vpop.f32.mrf.mxu1  ;;  %v4058_v9 = vadd.f32 %v4057_v2, %v4017_v19 }
 0x2cf   : > { %v4019_v6 = vpop.f32.mrf.mxu0 }
 0x2d0   : > { %v4060_v15 = vpop.f32.mrf.mxu1 }
 0x309   : > { %v4096_v8 = vpop.f32.mrf.mxu0 }
 0x30a   : > { %v4137_v10 = vpop.f32.mrf.mxu1  ;;  %v4097_v18 = vadd.f32 %v4096_v8, %v4056_v14 }
 0x30b   : > { %v4098_v24 = vpop.f32.mrf.mxu0 }
 0x30c   : > { %v4139_v32 = vpop.f32.mrf.mxu1  ;;  %v4138_v11 = vadd.f32 %v4137_v10, %v4097_v18  ;;  %v4099_v20 = vadd.f32 %v4098_v24, %v4058_v9 }
 0x30d   : > { %v4100_v12 = vpop.f32.mrf.mxu0 }
 0x30e   : > { %v4141_v13 = vpop.f32.mrf.mxu1  ;;  %v4140_v26 = vadd.f32 %v4139_v32, %v4099_v20 }
 0x30f   : > { %v4101_v16 = vpop.f32.mrf.mxu0 }
 0x310   : > { %v4142_v50 = vpop.f32.mrf.mxu1 }
 0x349   : > { %v4178_v21 = vpop.f32.mrf.mxu0 }
 0x34a   : > { %v4219_v22 = vpop.f32.mrf.mxu1  ;;  %v4179_v28 = vadd.f32 %v4178_v21, %v4138_v11 }
 0x34b   : > { %v4180_v27 = vpop.f32.mrf.mxu0 }
 0x34c   : > { %v4221_v31 = vpop.f32.mrf.mxu1  ;;  %v4181_v3 = vadd.f32 %v4180_v27, %v4140_v26  ;;  %v4220_v37 = vadd.f32 %v4219_v22, %v4179_v28 }
 0x34d   : > { %v4182_v7 = vpop.f32.mrf.mxu0 }
 0x34e   : > { %v4223_v34 = vpop.f32.mrf.mxu1  ;;  %v4222_v42 = vadd.f32 %v4221_v31, %v4181_v3 }
 0x34f   : > { %v4183_v43 = vpop.f32.mrf.mxu0 }
 0x350   : > { %v4224_v4 = vpop.f32.mrf.mxu1  ;;  %v4231_v38 = vcombine.low %v4220_v37, %v4222_v42 }
 0x352   : > { %v4245_v40 = vrot.slane %v4231_v38, %v8720_v35 }
 0x354   : > { %v4246_v61 = vcombine.low %v4238_v39, %v4245_v40  ;;  %4253 = sbr.rel (%p6285_p11) target bundleno = 1704 (0x6a8), region = 80 }
 0x356   : > { %v4248_v1 = vadd.f32 %v4246_v61, %v379_v33 }
 0x358   : > { %4249 = vst [vmem:[#allocation2] sm:$0xff] %v4248_v1 }
 0x359   : > { %v7371_v45 = vld [vmem:[#allocation8 + $0xe4] ss:$16 sps:$4 sm:$0xff]   ;;  %v7375_v47 = vld [vmem:[#allocation8 + $0xe0] ss:$16 sps:$4 sm:$0xff]   ;;  %v4259_v23 = vsub.s32 0, %v8103_v44  ;;  %v4263_v28 = vsub.s32 1, %v8103_v44 }
 0x35a   : > { %v7373_v46 = vld [vmem:[#allocation8 + $0x2e4] ss:$16 sps:$4 sm:$0xff]   ;;  %5109 = vmatprep.subr.bf16.mxu0 %v7371_v45  ;;  %v7376_v49 = vld [vmem:[#allocation8 + $0x2e0] ss:$16 sps:$4 sm:$0xff]   ;;  %v4267_v27 = vsub.s32 2, %v8103_v44  ;;  %v4271_v3 = vsub.s32 3, %v8103_v44 }
 0x35b   : > { %5150 = vmatprep.subr.bf16.mxu1 %v7373_v46  ;;  %v7377_v56 = vld [vmem:[#allocation8 + $0xc4] ss:$16 sps:$4 sm:$0xff]   ;;  %5110 = vmatpush1.bf16.msra.mxu0 %v7375_v47  ;;  %v7381_v51 = vld [vmem:[#allocation8 + $0xc0] ss:$16 sps:$4 sm:$0xff]   ;;  %v4255_v7 = vld [vmem:[#allocation6] sm:$0xf] }
 0x35c   : > { %5151 = vmatpush1.bf16.msra.mxu1 %v7376_v49  ;;  %v7379_v48 = vld [vmem:[#allocation8 + $0x2c4] ss:$16 sps:$4 sm:$0xff]   ;;  %5111 = vmatprep.subr.bf16.mxu0 %v7377_v56  ;;  %v7382_v30 = vld [vmem:[#allocation8 + $0x2c0] ss:$16 sps:$4 sm:$0xff]   ;;  %v4260_v42 = vrot.slane %v4255_v7, %v4259_v23  ;;  %v4264_v43 = vrot.slane %v4255_v7, %v4263_v28  ;;  %v4268_v4 = vrot.slane %v4255_v7, %v4267_v27  ;;  %vm5624_vm0 = vcmask 74752  }
 0x35d   : > { %5152 = vmatprep.subr.bf16.mxu1 %v7379_v48  ;;  %v7383_v29 = vld [vmem:[#allocation8 + $0xa4] ss:$16 sps:$4 sm:$0xff]   ;;  %v7387_v53 = vld [vmem:[#allocation8 + $0xa0] ss:$16 sps:$4 sm:$0xff]   ;;  %v4272_v40 = vrot.slane %v4255_v7, %v4271_v3  ;;  %v7494_v7 = vld [vmem:[#allocation8 + $0x268] ss:$16 sps:$4 sm:$0xff]  }
 0x35e   : > { %v7385_v52 = vld [vmem:[#allocation8 + $0x2a4] ss:$16 sps:$4 sm:$0xff]   ;;  %v7388_v54 = vld [vmem:[#allocation8 + $0x2a0] ss:$16 sps:$4 sm:$0xff]   ;;  %v4273_v33 = vcombine.low %v4260_v42, %v4264_v43  ;;  %v7497_v42 = vld [vmem:[#allocation8 + $0x48] ss:$16 sps:$4 sm:$0xff]  }
 0x35f   : > { %5112 = vmatpush1.bf16.msra.mxu0 %v7381_v51  ;;  %v7389_v36 = vld [vmem:[#allocation8 + $0x84] ss:$16 sps:$4 sm:$0xff]   ;;  %v7393_v60 = vld [vmem:[#allocation8 + $0x80] ss:$16 sps:$4 sm:$0xff]   ;;  %v4274_v61 = vcombine.low %v4268_v4, %v4272_v40  ;;  %v7500_v43 = vld [vmem:[#allocation8 + $0x248] ss:$16 sps:$4 sm:$0xff]  }
 0x360   : > { %5153 = vmatpush1.bf16.msra.mxu1 %v7382_v30  ;;  %5113 = vmatprep.subr.bf16.mxu0 %v7383_v29  ;;  %v7391_v55 = vld [vmem:[#allocation8 + $0x284] ss:$16 sps:$4 sm:$0xff]   ;;  %v7394_v57 = vld [vmem:[#allocation8 + $0x280] ss:$16 sps:$4 sm:$0xff]   ;;  %v4281_v46 = vrot.slane %v4273_v33, %v8720_v35  ;;  %v7505_v4 = vld [vmem:[#allocation8 + $0x2c] ss:$16 sps:$4 sm:$0xff]  }
 0x361   : > { %5154 = vmatprep.subr.bf16.mxu1 %v7385_v52  ;;  %v7395_v58 = vld [vmem:[#allocation8 + $0x64] ss:$16 sps:$4 sm:$0xff]   ;;  %v7399_v62 = vld [vmem:[#allocation8 + $0x60] ss:$16 sps:$4 sm:$0xff]   ;;  %v4288_v56 = vrot.slane %v4274_v61, %v8720_v35  ;;  %v7506_v40 = vld [vmem:[#allocation8 + $0x228] ss:$16 sps:$4 sm:$0xff]  }
 0x362   : > { %v7397_v59 = vld [vmem:[#allocation8 + $0x264] ss:$16 sps:$4 sm:$0xff]   ;;  %v7400_v63 = vld [vmem:[#allocation8 + $0x260] ss:$16 sps:$4 sm:$0xff]   ;;  %v7511_v33 = vld [vmem:[#allocation8 + $0xc] ss:$16 sps:$4 sm:$0xff]  }
 0x363   : > { %5114 = vmatpush1.bf16.msra.mxu0 %v7387_v53  ;;  %v7401_v0 = vld [vmem:[#allocation8 + $0x44] ss:$16 sps:$4 sm:$0xff]   ;;  %v7405_v14 = vld [vmem:[#allocation8 + $0x40] ss:$16 sps:$4 sm:$0xff]   ;;  %v4289_v51 = vcombine.low %v4281_v46, %v4288_v56  ;;  %v7514_v61 = vld [vmem:[#allocation8 + $0x20c] ss:$16 sps:$4 sm:$0xff]  }
 0x364   : > { %5155 = vmatpush1.bf16.msra.mxu1 %v7388_v54  ;;  %5115 = vmatprep.subr.bf16.mxu0 %v7389_v36  ;;  %v7403_v2 = vld [vmem:[#allocation8 + $0x244] ss:$16 sps:$4 sm:$0xff]   ;;  %v7406_v19 = vld [vmem:[#allocation8 + $0x240] ss:$16 sps:$4 sm:$0xff]   ;;  %v7517_v46 = vld [vmem:[#allocation8 + $0x1ec] ss:$16 sps:$4 sm:$0xff]  }
 0x365   : > { %5156 = vmatprep.subr.bf16.mxu1 %v7391_v55  ;;  %v7407_v25 = vld [vmem:[#allocation8 + $0x24] ss:$16 sps:$4 sm:$0xff]   ;;  %v7411_v9 = vld [vmem:[#allocation8 + $0x20] ss:$16 sps:$4 sm:$0xff]   ;;  %v7518_v56 = vld [vmem:[#allocation8 + $0x3e8] ss:$16 sps:$4 sm:$0xff]  }
 0x366   : > { %v7409_v5 = vld [vmem:[#allocation8 + $0x224] ss:$16 sps:$4 sm:$0xff]   ;;  %v7412_v6 = vld [vmem:[#allocation8 + $0x220] ss:$16 sps:$4 sm:$0xff]  }
 0x367   : > { %5116 = vmatpush1.bf16.msra.mxu0 %v7393_v60  ;;  %v7413_v15 = vld [vmem:[#allocation8 + $0x4] ss:$16 sps:$4 sm:$0xff]   ;;  %v7417_v10 = vld [vmem:[#allocation8] ss:$16 sps:$4 sm:$0xff]  }
 0x368   : > { %5157 = vmatpush1.bf16.msra.mxu1 %v7394_v57  ;;  %5117 = vmatprep.subr.bf16.mxu0 %v7395_v58  ;;  %v7415_v8 = vld [vmem:[#allocation8 + $0x204] ss:$16 sps:$4 sm:$0xff]   ;;  %v7418_v18 = vld [vmem:[#allocation8 + $0x200] ss:$16 sps:$4 sm:$0xff]  }
 0x369   : > { %5158 = vmatprep.subr.bf16.mxu1 %v7397_v59  ;;  %v7419_v24 = vld [vmem:[#allocation8 + $0x1e4] ss:$16 sps:$4 sm:$0xff]   ;;  %v7423_v11 = vld [vmem:[#allocation8 + $0x1e0] ss:$16 sps:$4 sm:$0xff]  }
 0x36a   : > { %v7421_v32 = vld [vmem:[#allocation8 + $0x3e4] ss:$16 sps:$4 sm:$0xff]   ;;  %v7424_v12 = vld [vmem:[#allocation8 + $0x3e0] ss:$16 sps:$4 sm:$0xff]  }
 0x36b   : > { %5118 = vmatpush1.bf16.msra.mxu0 %v7399_v62  ;;  %v7425_v13 = vld [vmem:[#allocation8 + $0x1c4] ss:$16 sps:$4 sm:$0xff]   ;;  %v7429_v50 = vld [vmem:[#allocation8 + $0x1c0] ss:$16 sps:$4 sm:$0xff]  }
 0x36c   : > { %5159 = vmatpush1.bf16.msra.mxu1 %v7400_v63  ;;  %5119 = vmatprep.subr.bf16.mxu0 %v7401_v0  ;;  %v7427_v16 = vld [vmem:[#allocation8 + $0x3c4] ss:$16 sps:$4 sm:$0xff]   ;;  %v7430_v41 = vld [vmem:[#allocation8 + $0x3c0] ss:$16 sps:$4 sm:$0xff]  }
 0x36d   : > { %5160 = vmatprep.subr.bf16.mxu1 %v7403_v2  ;;  %v7431_v17 = vld [vmem:[#allocation8 + $0x1a4] ss:$16 sps:$4 sm:$0xff]   ;;  %v7435_v21 = vld [vmem:[#allocation8 + $0x1a0] ss:$16 sps:$4 sm:$0xff]  }
 0x36e   : > { %v7433_v20 = vld [vmem:[#allocation8 + $0x3a4] ss:$16 sps:$4 sm:$0xff]   ;;  %v7436_v22 = vld [vmem:[#allocation8 + $0x3a0] ss:$16 sps:$4 sm:$0xff]  }
 0x36f   : > { %5120 = vmatpush1.bf16.msra.mxu0 %v7405_v14  ;;  %v7437_v26 = vld [vmem:[#allocation8 + $0x184] ss:$16 sps:$4 sm:$0xff]   ;;  %v7441_v34 = vld [vmem:[#allocation8 + $0x180] ss:$16 sps:$4 sm:$0xff]  }
 0x370   : > { %5161 = vmatpush1.bf16.msra.mxu1 %v7406_v19  ;;  %5121 = vmatprep.subr.bf16.mxu0 %v7407_v25  ;;  %v7439_v31 = vld [vmem:[#allocation8 + $0x384] ss:$16 sps:$4 sm:$0xff]   ;;  %v7442_v37 = vld [vmem:[#allocation8 + $0x380] ss:$16 sps:$4 sm:$0xff]  }
 0x371   : > { %5162 = vmatprep.subr.bf16.mxu1 %v7409_v5  ;;  %v7443_v38 = vld [vmem:[#allocation8 + $0x164] ss:$16 sps:$4 sm:$0xff]   ;;  %v7447_v1 = vld [vmem:[#allocation8 + $0x160] ss:$16 sps:$4 sm:$0xff]   ;;  %v7469_v5 = vld [vmem:[#allocation8 + $0xec] ss:$16 sps:$4 sm:$0xff]  }
 0x372   : > { %v7445_v39 = vld [vmem:[#allocation8 + $0x364] ss:$16 sps:$4 sm:$0xff]   ;;  %v7448_v45 = vld [vmem:[#allocation8 + $0x360] ss:$16 sps:$4 sm:$0xff]  }
 0x373   : > { %5122 = vmatpush1.bf16.msra.mxu0 %v7411_v9  ;;  %v7449_v47 = vld [vmem:[#allocation8 + $0x144] ss:$16 sps:$4 sm:$0xff]   ;;  %v7453_v30 = vld [vmem:[#allocation8 + $0x140] ss:$16 sps:$4 sm:$0xff]   ;;  %v7472_v9 = vld [vmem:[#allocation8 + $0x2ec] ss:$16 sps:$4 sm:$0xff]  }
 0x374   : > { %5163 = vmatpush1.bf16.msra.mxu1 %v7412_v6  ;;  %5123 = vmatprep.subr.bf16.mxu0 %v7413_v15  ;;  %v7451_v49 = vld [vmem:[#allocation8 + $0x344] ss:$16 sps:$4 sm:$0xff]   ;;  %v7454_v29 = vld [vmem:[#allocation8 + $0x340] ss:$16 sps:$4 sm:$0xff]  }
 0x375   : > { %5164 = vmatprep.subr.bf16.mxu1 %v7415_v8  ;;  %v4254_v48 = vld [vmem:[#allocation2] sm:$0xff]  ;;  %v7459_v55 = vld [vmem:[#allocation8 + $0x120] ss:$16 sps:$4 sm:$0xff]  }
 0x376   : > { %v7455_v52 = vld [vmem:[#allocation8 + $0x124] ss:$16 sps:$4 sm:$0xff]   ;;  %v4291_v54 = vadd.f32 %v4289_v51, %v4254_v48  ;;  %v7460_v60 = vld [vmem:[#allocation8 + $0x320] ss:$16 sps:$4 sm:$0xff]   ;;  %v7523_v48 = vld [vmem:[#allocation8 + $0x1cc] ss:$16 sps:$4 sm:$0xff]  }
 0x377   : > { %5124 = vmatpush1.bf16.msra.mxu0 %v7417_v10  ;;  %v7457_v53 = vld [vmem:[#allocation8 + $0x324] ss:$16 sps:$4 sm:$0xff]   ;;  %v7465_v2 = vld [vmem:[#allocation8 + $0x100] ss:$16 sps:$4 sm:$0xff]   ;;  %v7467_v10 = vld [vmem:[#allocation8 + $0xe8] ss:$16 sps:$4 sm:$0xff]  }
 0x378   : > { %5165 = vmatpush1.bf16.msra.mxu1 %v7418_v18  ;;  %5125 = vmatprep.subr.bf16.mxu0 %v7419_v24  ;;  %v4292_v36 = vmax.f32 %v4291_v54, 0.0  ;;  %v7461_v57 = vld [vmem:[#allocation8 + $0x104] ss:$16 sps:$4 sm:$0xff]   ;;  %v7466_v14 = vld [vmem:[#allocation8 + $0x300] ss:$16 sps:$4 sm:$0xff]  }
 0x379   : > { %5166 = vmatprep.subr.bf16.mxu1 %v7421_v32  ;;  %v7463_v58 = vld [vmem:[#allocation8 + $0x304] ss:$16 sps:$4 sm:$0xff]   ;;  %v7475_v18 = vld [vmem:[#allocation8 + $0xcc] ss:$16 sps:$4 sm:$0xff]   ;;  %v7473_v32 = vld [vmem:[#allocation8 + $0xc8] ss:$16 sps:$4 sm:$0xff]  }
 0x37a   : > { %v4301_v59 = vrot.slane %v4292_v36, %v8720_v35  ;;  %v4294_v62 = vcombine.high %v4292_v36, %v4292_v36  ;;  %v7478_v24 = vld [vmem:[#allocation8 + $0x2cc] ss:$16 sps:$4 sm:$0xff]   ;;  %v7527_v54 = vld [vmem:[#allocation8 + $0x1a8] ss:$16 sps:$4 sm:$0xff]  }
 0x37b   : > { %5126 = vmatpush2.bf16.msra.mxu0 %v7423_v11  ;;  %v7476_v11 = vld [vmem:[#allocation8 + $0x2c8] ss:$16 sps:$4 sm:$0xff]   ;;  %v7526_v51 = vld [vmem:[#allocation8 + $0x3cc] ss:$16 sps:$4 sm:$0xff]  }
 0x37c   : > { %5167 = vmatpush2.bf16.msra.mxu1 %v7424_v12  ;;  %5127 = vmatprep.subr.bf16.mxu0 %v7425_v13  ;;  %v4309_v63 = vcombine.high %v4301_v59, %v4301_v59  ;;  %v4308_v0 = vrot.slane %v4294_v62, %v8720_v35  ;;  %v8744_v15 = vpack.c.bf16 %v4301_v59, %v4301_v59  ;;  %v7470_v35 = vld [vmem:[#allocation8 + $0x2e8] ss:$16 sps:$4 sm:$0xff]   ;;  %v7481_v12 = vld [vmem:[#allocation8 + $0xac] ss:$16 sps:$4 sm:$0xff]  }
 0x37d   : > { %5168 = vmatprep.subr.bf16.mxu1 %v7427_v16  ;;  %v7484_v13 = vld [vmem:[#allocation8 + $0x2ac] ss:$16 sps:$4 sm:$0xff]   ;;  %v7479_v16 = vld [vmem:[#allocation8 + $0xa8] ss:$16 sps:$4 sm:$0xff]  }
 0x37e   : > { %v4316_v19 = vpack.c.bf16 %v4309_v63, %v4309_v63  ;;  %v4310_v25 = vcombine.high %v4308_v0, %v4308_v0  ;;  %v8746_v8 = vpack.c.bf16 %v4308_v0, %v4308_v0  ;;  %v7530_v36 = vld [vmem:[#allocation8 + $0x3a8] ss:$16 sps:$4 sm:$0xff]   ;;  %v7541_v59 = vld [vmem:[#allocation8 + $0x16c] ss:$16 sps:$4 sm:$0xff]  }
 0x37f   : > { %5128 = vmatpush2.bf16.msra.mxu0 %v7429_v50  ;;  %v7482_v50 = vld [vmem:[#allocation8 + $0x2a8] ss:$16 sps:$4 sm:$0xff]   ;;  %v7544_v62 = vld [vmem:[#allocation8 + $0x36c] ss:$16 sps:$4 sm:$0xff]  }
 0x380   : > { %5169 = vmatpush2.bf16.msra.mxu1 %v7430_v41  ;;  %5129 = vmatprep.subr.bf16.mxu0 %v7431_v17  ;;  %v4318_v6 = vpack.c.bf16 %v4310_v25, %v4310_v25  ;;  %v7487_v41 = vld [vmem:[#allocation8 + $0x8c] ss:$16 sps:$4 sm:$0xff]   ;;  %v7539_v63 = vld [vmem:[#allocation8 + $0x168] ss:$16 sps:$4 sm:$0xff]  }
 0x381   : > { %5170 = vmatprep.subr.bf16.mxu1 %v7433_v20  ;;  %5141 = vmatprep.mubr.bf16.mxu0 %v4316_v19  ;;  %v7490_v17 = vld [vmem:[#allocation8 + $0x28c] ss:$16 sps:$4 sm:$0xff]   ;;  %v7485_v20 = vld [vmem:[#allocation8 + $0x88] ss:$16 sps:$4 sm:$0xff]  }
 0x382   : > { %5182 = vmatprep.mubr.bf16.mxu1 %v4318_v6  ;;  %v7542_v0 = vld [vmem:[#allocation8 + $0x368] ss:$16 sps:$4 sm:$0xff]  }
 0x383   : > { %5130 = vmatpush2.bf16.msra.mxu0 %v7435_v21  ;;  %v7488_v21 = vld [vmem:[#allocation8 + $0x288] ss:$16 sps:$4 sm:$0xff]  }
 0x384   : > { %5171 = vmatpush2.bf16.msra.mxu1 %v7436_v22  ;;  %5131 = vmatprep.subr.bf16.mxu0 %v7437_v26  ;;  %v7493_v22 = vld [vmem:[#allocation8 + $0x6c] ss:$16 sps:$4 sm:$0xff]   ;;  %v7548_v25 = vld [vmem:[#allocation8 + $0x348] ss:$16 sps:$4 sm:$0xff]  }
 0x385   : > { %5172 = vmatprep.subr.bf16.mxu1 %v7439_v31  ;;  %v7496_v26 = vld [vmem:[#allocation8 + $0x26c] ss:$16 sps:$4 sm:$0xff]   ;;  %v7491_v31 = vld [vmem:[#allocation8 + $0x68] ss:$16 sps:$4 sm:$0xff]  }
 0x387   : > { %5132 = vmatpush2.bf16.msra.mxu0 %v7441_v34  ;;  %v7499_v34 = vld [vmem:[#allocation8 + $0x4c] ss:$16 sps:$4 sm:$0xff]  }
 0x388   : > { %5173 = vmatpush2.bf16.msra.mxu1 %v7442_v37  ;;  %5133 = vmatprep.subr.bf16.mxu0 %v7443_v38  ;;  %v7502_v37 = vld [vmem:[#allocation8 + $0x24c] ss:$16 sps:$4 sm:$0xff]  }
 0x389   : > { %5174 = vmatprep.subr.bf16.mxu1 %v7445_v39  ;;  %v7508_v38 = vld [vmem:[#allocation8 + $0x22c] ss:$16 sps:$4 sm:$0xff]   ;;  %v7503_v39 = vld [vmem:[#allocation8 + $0x28] ss:$16 sps:$4 sm:$0xff]  }
 0x38b   : > { %5134 = vmatpush2.bf16.msra.mxu0 %v7447_v1  ;;  %v7509_v1 = vld [vmem:[#allocation8 + $0x8] ss:$16 sps:$4 sm:$0xff]  }
 0x38c   : > { %5175 = vmatpush2.bf16.msra.mxu1 %v7448_v45  ;;  %5135 = vmatprep.subr.bf16.mxu0 %v7449_v47  ;;  %v7512_v45 = vld [vmem:[#allocation8 + $0x208] ss:$16 sps:$4 sm:$0xff]   ;;  %v7520_v47 = vld [vmem:[#allocation8 + $0x3ec] ss:$16 sps:$4 sm:$0xff]  }
 0x38d   : > { %5176 = vmatprep.subr.bf16.mxu1 %v7451_v49  ;;  %v7515_v49 = vld [vmem:[#allocation8 + $0x1e8] ss:$16 sps:$4 sm:$0xff]  }
 0x38f   : > { %5136 = vmatpush2.bf16.msra.mxu0 %v7453_v30  ;;  %v7521_v30 = vld [vmem:[#allocation8 + $0x1c8] ss:$16 sps:$4 sm:$0xff]  }
 0x390   : > { %5177 = vmatpush2.bf16.msra.mxu1 %v7454_v29  ;;  %5137 = vmatprep.subr.bf16.mxu0 %v7455_v52  ;;  %v7524_v29 = vld [vmem:[#allocation8 + $0x3c8] ss:$16 sps:$4 sm:$0xff]   ;;  %v7529_v52 = vld [vmem:[#allocation8 + $0x1ac] ss:$16 sps:$4 sm:$0xff]  }
 0x391   : > { %5178 = vmatprep.subr.bf16.mxu1 %v7457_v53  ;;  %v7532_v53 = vld [vmem:[#allocation8 + $0x3ac] ss:$16 sps:$4 sm:$0xff]  }
 0x393   : > { %5138 = vmatpush2.bf16.msra.mxu0 %v7459_v55  ;;  %v7535_v55 = vld [vmem:[#allocation8 + $0x18c] ss:$16 sps:$4 sm:$0xff]  }
 0x394   : > { %5179 = vmatpush2.bf16.msra.mxu1 %v7460_v60  ;;  %5139 = vmatprep.subr.bf16.mxu0 %v7461_v57  ;;  %v7538_v60 = vld [vmem:[#allocation8 + $0x38c] ss:$16 sps:$4 sm:$0xff]   ;;  %v7533_v57 = vld [vmem:[#allocation8 + $0x188] ss:$16 sps:$4 sm:$0xff]  }
 0x395   : > { %5180 = vmatprep.subr.bf16.mxu1 %v7463_v58  ;;  %v7536_v58 = vld [vmem:[#allocation8 + $0x388] ss:$16 sps:$4 sm:$0xff]  }
 0x397   : > { %5140 = vmatpush2.bf16.msra.mxu0 %v7465_v2  ;;  %v7547_v2 = vld [vmem:[#allocation8 + $0x14c] ss:$16 sps:$4 sm:$0xff]  }
 0x398   : > { %5181 = vmatpush2.bf16.msra.mxu1 %v7466_v14  ;;  %5191 = vmatprep.subr.bf16.mxu0 %v7469_v5  ;;  %v7550_v14 = vld [vmem:[#allocation8 + $0x34c] ss:$16 sps:$4 sm:$0xff]  }
 0x399   : > { %5232 = vmatprep.subr.bf16.mxu1 %v7472_v9  ;;  %v7553_v5 = vld [vmem:[#allocation8 + $0x12c] ss:$16 sps:$4 sm:$0xff]  }
 0x39a   : > { %5142 = vmatmul.mubr.bf16.vlgmr.msra.gmra.mxu0 %v8744_v15  ;;  %v7556_v9 = vld [vmem:[#allocation8 + $0x32c] ss:$16 sps:$4 sm:$0xff]  }
 0x39b   : > { %5183 = vmatmul.mubr.bf16.vlgmr.msra.gmra.mxu1 %v8746_v8  ;;  %5192 = vmatpush1.bf16.msra.mxu0 %v7467_v10  ;;  %v7554_v10 = vld [vmem:[#allocation8 + $0x328] ss:$16 sps:$4 sm:$0xff]  }
 0x39c   : > { %5233 = vmatpush1.bf16.msra.mxu1 %v7470_v35  ;;  %5193 = vmatprep.subr.bf16.mxu0 %v7475_v18  ;;  %v7559_v35 = vld [vmem:[#allocation8 + $0x10c] ss:$16 sps:$4 sm:$0xff]  }
 0x39d   : > { %5234 = vmatprep.subr.bf16.mxu1 %v7478_v24  ;;  %5223 = vmatprep.mubr.bf16.mxu0 %v4316_v19  ;;  %v7545_v19 = vld [vmem:[#allocation8 + $0x148] ss:$16 sps:$4 sm:$0xff]   ;;  %v7562_v18 = vld [vmem:[#allocation8 + $0x30c] ss:$16 sps:$4 sm:$0xff]  }
 0x39e   : > { %5264 = vmatprep.mubr.bf16.mxu1 %v4318_v6  ;;  %v7551_v6 = vld [vmem:[#allocation8 + $0x128] ss:$16 sps:$4 sm:$0xff]  }
 0x39f   : > { %5194 = vmatpush1.bf16.msra.mxu0 %v7473_v32  ;;  %v7557_v24 = vld [vmem:[#allocation8 + $0x108] ss:$16 sps:$4 sm:$0xff]  }
 0x3a0   : > { %5235 = vmatpush1.bf16.msra.mxu1 %v7476_v11  ;;  %5195 = vmatprep.subr.bf16.mxu0 %v7481_v12  ;;  %v7560_v32 = vld [vmem:[#allocation8 + $0x308] ss:$16 sps:$4 sm:$0xff]   ;;  %v7563_v11 = vld [vmem:[#allocation11 + $0x78] sm:$0xff]  }
 0x3a1   : > { %5236 = vmatprep.subr.bf16.mxu1 %v7484_v13  ;;  %v7564_v12 = vld [vmem:[#allocation11 + $0x38] sm:$0xff]   ;;  %v7565_v13 = vld [vmem:[#allocation11 + $0x70] sm:$0xff]  }
 0x3a3   : > { %5196 = vmatpush1.bf16.msra.mxu0 %v7479_v16  ;;  %v7566_v16 = vld [vmem:[#allocation11 + $0x30] sm:$0xff]  }
 0x3a4   : > { %5237 = vmatpush1.bf16.msra.mxu1 %v7482_v50  ;;  %5197 = vmatprep.subr.bf16.mxu0 %v7487_v41  ;;  %v7567_v50 = vld [vmem:[#allocation11 + $0x68] sm:$0xff]  }
 0x3a5   : > { %5238 = vmatprep.subr.bf16.mxu1 %v7490_v17  ;;  %v7568_v41 = vld [vmem:[#allocation11 + $0x28] sm:$0xff]   ;;  %v7569_v17 = vld [vmem:[#allocation11 + $0x60] sm:$0xff]  }
 0x3a7   : > { %5198 = vmatpush1.bf16.msra.mxu0 %v7485_v20  ;;  %v7570_v20 = vld [vmem:[#allocation11 + $0x20] sm:$0xff]  }
 0x3a8   : > { %5239 = vmatpush1.bf16.msra.mxu1 %v7488_v21  ;;  %5199 = vmatprep.subr.bf16.mxu0 %v7493_v22  ;;  %v7571_v21 = vld [vmem:[#allocation11 + $0x58] sm:$0xff]  }
 0x3a9   : > { %5240 = vmatprep.subr.bf16.mxu1 %v7496_v26  ;;  %v7579_v22 = vld [vmem:[#allocation11 + $0xf8] sm:$0xff]  }
 0x3aa   : > { %v7580_v26 = vld [vmem:[#allocation11 + $0xb8] sm:$0xff]  }
 0x3ab   : > { %5200 = vmatpush1.bf16.msra.mxu0 %v7491_v31  ;;  %v7581_v31 = vld [vmem:[#allocation11 + $0xf0] sm:$0xff]  }
 0x3ac   : > { %5241 = vmatpush1.bf16.msra.mxu1 %v7494_v7  ;;  %5201 = vmatprep.subr.bf16.mxu0 %v7499_v34  ;;  %v7572_v7 = vld [vmem:[#allocation11 + $0x18] sm:$0xff]   ;;  %v7583_v34 = vld [vmem:[#allocation11 + $0xe8] sm:$0xff]  }
 0x3ad   : > { %5242 = vmatprep.subr.bf16.mxu1 %v7502_v37  ;;  %v7574_v37 = vld [vmem:[#allocation11 + $0x10] sm:$0xff]  }
 0x3af   : > { %5202 = vmatpush1.bf16.msra.mxu0 %v7497_v42  ;;  %v7575_v42 = vld [vmem:[#allocation11 + $0x48] sm:$0xff]  }
 0x3b0   : > { %5243 = vmatpush1.bf16.msra.mxu1 %v7500_v43  ;;  %5203 = vmatprep.subr.bf16.mxu0 %v7505_v4  ;;  %v7584_v43 = vld [vmem:[#allocation11 + $0xa8] sm:$0xff]   ;;  %v7585_v4 = vld [vmem:[#allocation11 + $0xe0] sm:$0xff]  }
 0x3b1   : > { %5244 = vmatprep.subr.bf16.mxu1 %v7508_v38  ;;  %v7576_v38 = vld [vmem:[#allocation11 + $0x8] sm:$0xff]  }
 0x3b3   : > { %5204 = vmatpush1.bf16.msra.mxu0 %v7503_v39  ;;  %v7577_v39 = vld [vmem:[#allocation11 + $0x40] sm:$0xff]  }
 0x3b4   : > { %5245 = vmatpush1.bf16.msra.mxu1 %v7506_v40  ;;  %5205 = vmatprep.subr.bf16.mxu0 %v7511_v33  ;;  %v7586_v40 = vld [vmem:[#allocation11 + $0xa0] sm:$0xff]   ;;  %v7587_v33 = vld [vmem:[#allocation11 + $0xd8] sm:$0xff]  }
 0x3b5   : > { %5246 = vmatprep.subr.bf16.mxu1 %v7514_v61  ;;  %v7578_v61 = vld [vmem:[#allocation11] sm:$0xff]  }
 0x3b7   : > { %5206 = vmatpush1.bf16.msra.mxu0 %v7509_v1  ;;  %v7588_v1 = vld [vmem:[#allocation11 + $0x98] sm:$0xff]  }
 0x3b8   : > { %5247 = vmatpush1.bf16.msra.mxu1 %v7512_v45  ;;  %5207 = vmatprep.subr.bf16.mxu0 %v7517_v46  ;;  %v7589_v45 = vld [vmem:[#allocation11 + $0xd0] sm:$0xff]  }
 0x3b9   : > { %5248 = vmatprep.subr.bf16.mxu1 %v7520_v47  ;;  %v7590_v46 = vld [vmem:[#allocation11 + $0x90] sm:$0xff]   ;;  %v7591_v47 = vld [vmem:[#allocation11 + $0xc8] sm:$0xff]  }
 0x3bb   : > { %5208 = vmatpush2.bf16.msra.mxu0 %v7515_v49  ;;  %v7592_v49 = vld [vmem:[#allocation11 + $0x88] sm:$0xff]  }
 0x3bc   : > { %5249 = vmatpush2.bf16.msra.mxu1 %v7518_v56  ;;  %5209 = vmatprep.subr.bf16.mxu0 %v7523_v48  ;;  %v7593_v56 = vld [vmem:[#allocation11 + $0xc0] sm:$0xff]  }
 0x3bd   : > { %5250 = vmatprep.subr.bf16.mxu1 %v7526_v51  ;;  %v7594_v48 = vld [vmem:[#allocation11 + $0x80] sm:$0xff]   ;;  %v4447_v51 = vld [vmem:[#allocation9] sm:$0xf] }
 0x3bf   : > { %5210 = vmatpush2.bf16.msra.mxu0 %v7521_v30  ;;  %v4452_v30 = vrot.slane %v4447_v51, %v4259_v23  ;;  %v4460_v23 = vrot.slane %v4447_v51, %v4267_v27 }
 0x3c0   : > { %5251 = vmatpush2.bf16.msra.mxu1 %v7524_v29  ;;  %5211 = vmatprep.subr.bf16.mxu0 %v7529_v52  ;;  %v4456_v29 = vrot.slane %v4447_v51, %v4263_v28  ;;  %v4464_v28 = vrot.slane %v4447_v51, %v4271_v3 }
 0x3c1   : > { %5252 = vmatprep.subr.bf16.mxu1 %v7532_v53 }
 0x3c3   : > { %5212 = vmatpush2.bf16.msra.mxu0 %v7527_v54 }
 0x3c4   : > { %5253 = vmatpush2.bf16.msra.mxu1 %v7530_v36  ;;  %5213 = vmatprep.subr.bf16.mxu0 %v7535_v55 }
 0x3c5   : > { %5254 = vmatprep.subr.bf16.mxu1 %v7538_v60 }
 0x3c7   : > { %5214 = vmatpush2.bf16.msra.mxu0 %v7533_v57 }
 0x3c8   : > { %5255 = vmatpush2.bf16.msra.mxu1 %v7536_v58  ;;  %5215 = vmatprep.subr.bf16.mxu0 %v7541_v59 }
 0x3c9   : > { %5256 = vmatprep.subr.bf16.mxu1 %v7544_v62 }
 0x3cb   : > { %5216 = vmatpush2.bf16.msra.mxu0 %v7539_v63 }
 0x3cc   : > { %5257 = vmatpush2.bf16.msra.mxu1 %v7542_v0  ;;  %5217 = vmatprep.subr.bf16.mxu0 %v7547_v2 }
 0x3cd   : > { %5258 = vmatprep.subr.bf16.mxu1 %v7550_v14 }
 0x3cf   : > { %5218 = vmatpush2.bf16.msra.mxu0 %v7545_v19 }
 0x3d0   : > { %5259 = vmatpush2.bf16.msra.mxu1 %v7548_v25  ;;  %5219 = vmatprep.subr.bf16.mxu0 %v7553_v5 }
 0x3d1   : > { %5260 = vmatprep.subr.bf16.mxu1 %v7556_v9 }
 0x3d3   : > { %5220 = vmatpush2.bf16.msra.mxu0 %v7551_v6 }
 0x3d4   : > { %5261 = vmatpush2.bf16.msra.mxu1 %v7554_v10  ;;  %5221 = vmatprep.subr.bf16.mxu0 %v7559_v35 }
 0x3d5   : > { %5262 = vmatprep.subr.bf16.mxu1 %v7562_v18 }
 0x3d7   : > { %5222 = vmatpush2.bf16.msra.mxu0 %v7557_v24 }
 0x3d8   : > { %5263 = vmatpush2.bf16.msra.mxu1 %v7560_v32  ;;  %6453 = vmatprep.subr.bf16.mxu0 %v7563_v11 }
 0x3d9   : > { %6475 = vmatprep.subr.bf16.mxu1 %v7579_v22 }
 0x3da   : > { %5224 = vmatmul.mubr.bf16.vlgmr.msra.gmra.mxu0 %v8744_v15  ;;  %v7573_v15 = vld [vmem:[#allocation11 + $0x50] sm:$0xff]  }
 0x3db   : > { %5265 = vmatmul.mubr.bf16.vlgmr.msra.gmra.mxu1 %v8746_v8  ;;  %6454 = vmatpush3.bf16.msra.mxu0 %v7564_v12  ;;  %v7582_v8 = vld [vmem:[#allocation11 + $0xb0] sm:$0xff]  }
 0x3dc   : > { %6455 = vmatprep.subr.bf16.mxu0 %v7565_v13  ;;  %6476 = vmatpush3.bf16.msra.mxu1 %v7580_v26  ;;  %v6414_v26 = vld [vmem:[#allocation12] ss:$0 sm:$0xff] }
 0x3dd   : > { %6477 = vmatprep.subr.bf16.mxu1 %v7581_v31 }
 0x3df   : > { %6456 = vmatpush3.bf16.msra.mxu0 %v7566_v16 }
 0x3e0   : > { %6457 = vmatprep.subr.bf16.mxu0 %v7567_v50  ;;  %6478 = vmatpush3.bf16.msra.mxu1 %v7582_v8 }
 0x3e1   : > { %6479 = vmatprep.subr.bf16.mxu1 %v7583_v34 }
 0x3e3   : > { %6458 = vmatpush3.bf16.msra.mxu0 %v7568_v41 }
 0x3e4   : > { %6459 = vmatprep.subr.bf16.mxu0 %v7569_v17  ;;  %6480 = vmatpush3.bf16.msra.mxu1 %v7584_v43 }
 0x3e5   : > { %6481 = vmatprep.subr.bf16.mxu1 %v7585_v4 }
 0x3e7   : > { %6460 = vmatpush3.bf16.msra.mxu0 %v7570_v20 }
 0x3e8   : > { %6461 = vmatprep.subr.bf16.mxu0 %v7571_v21  ;;  %6482 = vmatpush3.bf16.msra.mxu1 %v7586_v40 }
 0x3e9   : > { %6483 = vmatprep.subr.bf16.mxu1 %v7587_v33 }
 0x3eb   : > { %6462 = vmatpush3.bf16.msra.mxu0 %v7572_v7 }
 0x3ec   : > { %6463 = vmatprep.subr.bf16.mxu0 %v7573_v15  ;;  %6484 = vmatpush3.bf16.msra.mxu1 %v7588_v1 }
 0x3ed   : > { %6485 = vmatprep.subr.bf16.mxu1 %v7589_v45 }
 0x3ef   : > { %6464 = vmatpush3.bf16.msra.mxu0 %v7574_v37 }
 0x3f0   : > { %6465 = vmatprep.subr.bf16.mxu0 %v7575_v42  ;;  %6486 = vmatpush3.bf16.msra.mxu1 %v7590_v46 }
 0x3f1   : > { %6487 = vmatprep.subr.bf16.mxu1 %v7591_v47 }
 0x3f3   : > { %6466 = vmatpush3.bf16.msra.mxu0 %v7576_v38 }
 0x3f4   : > { %6467 = vmatprep.subr.bf16.mxu0 %v7577_v39  ;;  %6488 = vmatpush3.bf16.msra.mxu1 %v7592_v49 }
 0x3f5   : > { %6489 = vmatprep.subr.bf16.mxu1 %v7593_v56 }
 0x3f7   : > { %6468 = vmatpush3.bf16.msra.mxu0 %v7578_v61 }
 0x3f8   : > { %6490 = vmatpush3.bf16.msra.mxu1 %v7594_v48 }
 0x45a   : > { %v5143_v52 = vpop.f32.mrf.mxu0 }
 0x45b   : > { %v5184_v53 = vpop.f32.mrf.mxu1  ;;  %v5144_v54 = vadd.f32 %v5143_v52, %v4452_v30 }
 0x45c   : > { %v5145_v36 = vpop.f32.mrf.mxu0 }
 0x45d   : > { %v5186_v55 = vpop.f32.mrf.mxu1  ;;  %v5185_v60 = vadd.f32 %v5184_v53, %v5144_v54  ;;  %v5146_v57 = vadd.f32 %v5145_v36, %v4456_v29 }
 0x45e   : > { %v5147_v58 = vpop.f32.mrf.mxu0 }
 0x45f   : > { %v5188_v59 = vpop.f32.mrf.mxu1  ;;  %v5187_v62 = vadd.f32 %v5186_v55, %v5146_v57  ;;  %v5273_v63 = vmax.f32 %v5185_v60, 0.0 }
 0x460   : > { %v5148_v0 = vpop.f32.mrf.mxu0 }
 0x461   : > { %v5189_v2 = vpop.f32.mrf.mxu1  ;;  %v5274_v14 = vmax.f32 %v5187_v62, 0.0  ;;  %v5277_v25 = vpack.c.bf16 %v5273_v63, %v5273_v63 }
 0x463   : > { %v5278_v19 = vpack.c.bf16 %v5274_v14, %v5274_v14 }
 0x465   : > { %5576 = vmatprep.mubr.bf16.mxu0 %v5278_v19 }
 0x466   : > { %5577 = vmatmul.mubr.bf16.vlgmr.msra.gmra.mxu0 %v5277_v25 }
 0x49a   : > { %v5225_v5 = vpop.f32.mrf.mxu0 }
 0x49b   : > { %v5266_v9 = vpop.f32.mrf.mxu1  ;;  %v5226_v6 = vadd.f32 %v5225_v5, %v4460_v23 }
 0x49c   : > { %v5227_v10 = vpop.f32.mrf.mxu0 }
 0x49d   : > { %v5268_v35 = vpop.f32.mrf.mxu1  ;;  %v5267_v18 = vadd.f32 %v5266_v9, %v5226_v6  ;;  %v5228_v24 = vadd.f32 %v5227_v10, %v4464_v28 }
 0x49e   : > { %v5229_v32 = vpop.f32.mrf.mxu0 }
 0x49f   : > { %v5270_v11 = vpop.f32.mrf.mxu1  ;;  %v5269_v12 = vadd.f32 %v5268_v35, %v5228_v24  ;;  %v5275_v13 = vmax.f32 %v5267_v18, 0.0 }
 0x4a0   : > { %v5230_v16 = vpop.f32.mrf.mxu0 }
 0x4a1   : > { %v5271_v50 = vpop.f32.mrf.mxu1  ;;  %v5276_v41 = vmax.f32 %v5269_v12, 0.0  ;;  %v5279_v20 = vpack.c.bf16 %v5275_v13, %v5275_v13 }
 0x4a3   : > { %v5280_v17 = vpack.c.bf16 %v5276_v41, %v5276_v41 }
 0x4a5   : > { %5616 = vmatprep.mubr.bf16.mxu1 %v5280_v17 }
 0x4a6   : > { %5617 = vmatmul.mubr.bf16.vlgmr.msra.gmra.mxu1 %v5279_v20 }
 0x526   : > { %v6469_v44 = vpop.f32.mrf.mxu0 }
 0x528   : > { %v6470_v27 = vpop.f32.mrf.mxu0 }
 0x529   : > { %v6471_v22 = vadd.f32 %v6470_v27, %v6469_v44 }
 0x52a   : > { %v6472_v3 = vpop.f32.mrf.mxu0 }
 0x52b   : > { %v5579_v15 = vadd.f32 %v6471_v22, %v6414_v26 }
 0x52c   : > { %v6473_v21 = vpop.f32.mrf.mxu0 }
 0x566   : > { %v6491_v31 = vpop.f32.mrf.mxu1 }
 0x568   : > { %v6492_v7 = vpop.f32.mrf.mxu1 }
 0x569   : > { %v6493_v8 = vadd.f32 %v6492_v7, %v6491_v31 }
 0x56a   : > { %v6494_v34 = vpop.f32.mrf.mxu1 }
 0x56b   : > { %v5619_v37 = vadd.f32 %v6493_v8, %v5579_v15 }
 0x56c   : > { %v6495_v42 = vpop.f32.mrf.mxu1 }
 0x56d   : > { %v5625_v43 = vsel %vm5624_vm0, %v5619_v37, -inf }
 0x56e   : > { %5626 = vmax.xlane.f32.xlu0 %v5625_v43 }
 0x5f7   : > { %v5627_v4 = vpop.xlane.xlu0 %5626 }
 0x5f8   : > { %v5628_v38 = vsub.f32 %v5619_v37, %v5627_v4 }
 0x5fa   : > { %v5629_v39 = vmul.f32 1.442695, %v5628_v38 }
 0x5fc   : > { %7595 = vpow2.f32 %v5629_v39 }
 0x609   : > { %v7596_v40 = vpop.eup %7595 }
 0x60a   : > { %v5631_v33 = vsel %vm5624_vm0, %v7596_v40, 0.0 }
 0x60b   : > { %5632 = vadd.xlane.f32.xlu0 %v5631_v33 }
 0x694   : > { %v5633_v61 = vpop.xlane.xlu0 %5632 }
 0x695   : > { %7597 = vlog2.f32 %v5633_v61 }
 0x6a2   : > { %v7598_v1 = vpop.eup %7597 }
 0x6a3   : > { %v5635_v45 = vmul.f32 0.6931472, %v7598_v1 }
 0x6a5   : > { %v5636_v46 = vsub.f32 %v5628_v38, %v5635_v45 }
 0x6a7   : > { %5637 = vst.msk [vmem:[#allocation14] sm:$0x3] %vm5624_vm0, %v5636_v46 }
 0x6a8 PF: > { %p6554_p13 = scmp.eq.s32.totalorder %s7908_s30, 3  ;;  %s7846_s19 = smov [#allocation14]  }
 0x6a9   : > { %s5645_s20 = sshll.u32 %s7846_s19, 4  ;;  %s5646_s20 = int_to_ptr.vmem [resolvable:$true] %s5645_s20 }
 0x6aa   : > { %s7757_s21 = scalar_lea.vmem %s5646_s20, 32  ;;  %p7764_p12 = scmp.lt.s32.totalorder %s5646_s20, %s5646_s20 }
 0x6ab   : > { %p7758_p1 = scmp.ne.s32.totalorder %s5646_s20, %s7757_s21  ;;  %p7765_p0 = scmp.lt.s32.totalorder %s7757_s21, %s7757_s21 }
 0x6ad   : > { %p7759_p4 = pnand %p7758_p1, %p6554_p13  ;;  %p7766_p6 = por %p7765_p0, %p7764_p12 }
 0x6af   : > { %p7760_p3 = pneg %p7759_p4 }
 0x6b1   : > { %p7767_p2 = pnand %p7766_p6, %p7760_p3 }
 0x6b3   : > { %7770 = shalt.err (!%p7767_p2)
}
 0x6b4   : > { %6520 = dma.vmem_to_hbm [thread:$0]  (%p6554_p13), %s5646_s20, 32, %s8795_s7, [#allocation5]  }
 0x6b5   : > { %7814 = dma.done.wait (%p6554_p13), [#allocation5], 32  }
 0x6b6   : > { %7816 = vsyncadd (%p6554_p13), [#allocation5], 4294967264 }
 0x6b7 PF: > { %p21_p7 = scmp.ge.s32.totalorder %s7978_s14, 6   ;;  %s8814_s24 = smov %s7823_s25 }
 0x6b8   : > { %s8815_s25 = smov %s7827_s26  ;;  %s8816_s26 = smov %s7989_s10 }
 0x6b9   : > { %s8817_s27 = smov %s7978_s14  ;;  %23 = sbr.rel (!%p21_p7) target bundleno = 7 (0x7), region = 116 }
 0x6be   :  { %5658 = vsyncpa [#allocation4], 1 }
 0x6bf   :  { %5660 = vsyncpa [#allocation4 + $0x1], 1 }
 0x6c0   :  { %5661 = vsyncpa [#allocation7], 1 }
 0x6c1   :  { %5662 = vsyncpa [#allocation10], 1 }
 0x6c2   :  { %5663 = vsyncpa [#allocation13], 1 }
 0x6c3   :  { %5664 = vsyncpa [#allocation5], 1 }
 0x6c4   :  { %5666 = vsyncpa [#allocation5 + $0x1], 1 }

</bundles_post_ra>
